<compile_context>
chip_gen: v5e
topology: v5e:2x2
jax: 0.10.0
libtpu: 0.0.40
codegen_flags: <defaults>
</compile_context>

<pallas_src>
import numpy as np
import jax
import jax.numpy as jnp
from jax.experimental import pallas as pl
from jax.experimental.pallas import tpu as pltpu


def _round_up(x, m):
    return (x + m - 1) // m * m


def _gru_kernel(len_ref, x_ref, wi_ref, wh_ref, b_ref, bhn_ref,
                out_ref, hid_ref, h_scr):
    """One grid step == one (batch block, time block). Inner loop over time."""
    tb = pl.program_id(1)                     # time-block index (inner, "arbitrary")
    t_blk = x_ref.shape[0]                    # static
    hp = h_scr.shape[-1]                      # padded hidden (multiple of 128)

    @pl.when(tb == 0)
    def _():
        h_scr[...] = jnp.zeros_like(h_scr)

    lens = len_ref[...]                       # (B_blk, 1) int32
    bias = b_ref[...]                         # (1, 3*Hp) f32 : [bi_r+bh_r, bi_z+bh_z, bi_n]
    bhn = bhn_ref[...]                        # (1, Hp)   f32 : b_hh_n (inside the r* term)
    t_base = tb * t_blk

    def step(s, h):                           # h: (B_blk, Hp) f32 carry
        x_t = x_ref[s]                        # (B_blk, Hp) bf16
        gi = jnp.dot(x_t, wi_ref[...],
                     preferred_element_type=jnp.float32) + bias        # (B, 3Hp) f32
        gh = jnp.dot(h.astype(jnp.bfloat16), wh_ref[...],
                     preferred_element_type=jnp.float32)                # (B, 3Hp) f32
        # gate order follows PyTorch nn.GRU: [r, z, n]
        r = jax.nn.sigmoid(gi[:, 0:hp] + gh[:, 0:hp])
        z = jax.nn.sigmoid(gi[:, hp:2 * hp] + gh[:, hp:2 * hp])
        n = jnp.tanh(gi[:, 2 * hp:3 * hp] + r * (gh[:, 2 * hp:3 * hp] + bhn))
        h_new = (1.0 - z) * n + z * h
        # packed-sequence semantics: only advance / emit where t < length[b]
        mask = (t_base + s) < lens            # (B_blk, 1) bool
        h_next = jnp.where(mask, h_new, h)
        out_ref[s] = jnp.where(mask, h_new, 0.0).astype(out_ref.dtype)
        return h_next

    h = jax.lax.fori_loop(0, t_blk, step, h_scr[...], unroll=True)
    h_scr[...] = h

    @pl.when(tb == pl.num_programs(1) - 1)
    def _():
        hid_ref[...] = h.astype(hid_ref.dtype)


def gru_forward(embedded, lengths, wi, wh, bias, bhn, *, hidden,
                b_blk=8, t_blk=8):
    """embedded: (B, T, H) bf16; lengths: (B,) int32.
    wi/wh: (Hp, 3*Hp) bf16; bias: (1, 3*Hp) f32; bhn: (1, Hp) f32."""
    B, T, H = embedded.shape
    Hp = wi.shape[0]
    Bp = _round_up(max(B, b_blk), b_blk)
    Tp = _round_up(max(T, t_blk), t_blk)

    x = embedded.astype(jnp.bfloat16)
    x = jnp.pad(x, ((0, Bp - B), (0, Tp - T), (0, Hp - H)))
    x = jnp.transpose(x, (1, 0, 2))                       # (Tp, Bp, Hp) time-major
    lens = jnp.pad(lengths.astype(jnp.int32), (0, Bp - B)).reshape(Bp, 1)

    grid = (Bp // b_blk, Tp // t_blk)                     # (batch blocks, time blocks)

    out, hid = pl.pallas_call(
        _gru_kernel,
        out_shape=(
            jax.ShapeDtypeStruct((Tp, Bp, Hp), jnp.float32),   # per-step outputs
            jax.ShapeDtypeStruct((Bp, Hp), jnp.float32),       # final hidden state
        ),
        grid_spec=pltpu.PrefetchScalarGridSpec(
            num_scalar_prefetch=0,
            grid=grid,
            in_specs=[
                pl.BlockSpec((b_blk, 1), lambda b, t: (b, 0)),           # lengths
                pl.BlockSpec((t_blk, b_blk, Hp), lambda b, t: (t, b, 0)),  # x time slab
                pl.BlockSpec((Hp, 3 * Hp), lambda b, t: (0, 0)),         # Wi (fused gates)
                pl.BlockSpec((Hp, 3 * Hp), lambda b, t: (0, 0)),         # Wh (fused gates)
                pl.BlockSpec((1, 3 * Hp), lambda b, t: (0, 0)),          # combined bias
                pl.BlockSpec((1, Hp), lambda b, t: (0, 0)),              # b_hh_n
            ],
            out_specs=[
                pl.BlockSpec((t_blk, b_blk, Hp), lambda b, t: (t, b, 0)),
                pl.BlockSpec((b_blk, Hp), lambda b, t: (b, 0)),
            ],
            scratch_shapes=[pltpu.VMEM((b_blk, Hp), jnp.float32)],
        ),
        compiler_params=pltpu.CompilerParams(
            dimension_semantics=("parallel", "arbitrary"),   # batch parallel, time recurrent
            vmem_limit_bytes=48 * 1024 * 1024,
        ),
    )(lens, x, wi, wh, bias, bhn)

    out = jnp.transpose(out, (1, 0, 2))[:B, :T, :hidden]
    hid = hid[:B, :hidden]
    return out, hid


class PlainEncoderPallas:
    def __init__(self, vocab_size, hidden_size, key):
        H = hidden_size
        Hp = _round_up(H, 128)
        k = jax.random.split(key, 5)
        bound = 1.0 / np.sqrt(H)
        # nn.Embedding default init ~ N(0, 1); kept bf16 for the matmul stream.
        self.embed = jax.random.normal(k[0], (vocab_size, H), jnp.float32).astype(jnp.bfloat16)
        # nn.GRU params: (3H, H) in gate order [r, z, n]; uniform(-1/sqrt(H), 1/sqrt(H))
        w_ih = jax.random.uniform(k[1], (3 * H, H), jnp.float32, -bound, bound)
        w_hh = jax.random.uniform(k[2], (3 * H, H), jnp.float32, -bound, bound)
        b_ih = jax.random.uniform(k[3], (3 * H,), jnp.float32, -bound, bound)
        b_hh = jax.random.uniform(k[4], (3 * H,), jnp.float32, -bound, bound)
        # keep raw params around for the reference check in the demo
        self._raw = (w_ih, w_hh, b_ih, b_hh)

        def pack_w(w):  # (3H, H) -> (Hp, 3Hp): per-gate transposed, zero-padded, bf16
            gates = []
            for g in range(3):
                wg = w[g * H:(g + 1) * H].T                      # x @ wg
                wg = jnp.pad(wg, ((0, Hp - H), (0, Hp - H)))
                gates.append(wg)
            return jnp.concatenate(gates, axis=1).astype(jnp.bfloat16)

        self.wi = pack_w(w_ih)                                   # (Hp, 3Hp) bf16
        self.wh = pack_w(w_hh)                                   # (Hp, 3Hp) bf16

        def pad_b(b):
            return jnp.pad(b, (0, Hp - H))

        # r/z hidden biases folded into the input-side bias (host pre-sum);
        # b_hh_n stays separate (it must sit inside the r * (...) term).
        b_r = pad_b(b_ih[0:H] + b_hh[0:H])
        b_z = pad_b(b_ih[H:2 * H] + b_hh[H:2 * H])
        b_n = pad_b(b_ih[2 * H:3 * H])
        self.bias = jnp.concatenate([b_r, b_z, b_n]).reshape(1, 3 * Hp).astype(jnp.float32)
        self.bhn = pad_b(b_hh[2 * H:3 * H]).reshape(1, Hp).astype(jnp.float32)
        self.H = H
        self.Hp = Hp

    def __call__(self, x, lengths):
        # x: (B, T) int32, lengths: (B,) int
        lengths_np = np.asarray(lengths)             # host value taken up-front (no sync
        max_len = int(lengths_np.max())              # between the gather and the kernel)
        embedded = jnp.take(self.embed, x, axis=0)   # (B, T, H) bf16 (glue)
        # TODO(synk): training-mode dropout not implemented (inference -> identity)
        out, hid = gru_forward(embedded, jnp.asarray(lengths_np, jnp.int32),
                               self.wi, self.wh, self.bias, self.bhn, hidden=self.H)
        out = out[:, :max_len, :]                    # pad_packed_sequence trims to max len
        hid = hid[None, :, :]                        # (1, B, H) == hid[[-1]]
        return out, hid


def _gru_reference(embedded_bf16, lengths, w_ih, w_hh, b_ih, b_hh, H):
    """Pure-JAX mirror of PyTorch nn.GRU + pack/pad masking (bf16 matmul operands)."""
    B, T, _ = embedded_bf16.shape
    h = jnp.zeros((B, H), jnp.float32)
    wi = [w_ih[g * H:(g + 1) * H].T.astype(jnp.bfloat16) for g in range(3)]
    wh = [w_hh[g * H:(g + 1) * H].T.astype(jnp.bfloat16) for g in range(3)]
    outs = []
    for t in range(T):
        x_t = embedded_bf16[:, t, :]
        hb = h.astype(jnp.bfloat16)
        gi = [jnp.dot(x_t, wi[g], preferred_element_type=jnp.float32) + b_ih[g * H:(g + 1) * H]
              for g in range(3)]
        gh = [jnp.dot(hb, wh[g], preferred_element_type=jnp.float32) + b_hh[g * H:(g + 1) * H]
              for g in range(3)]
        r = jax.nn.sigmoid(gi[0] + gh[0])
        z = jax.nn.sigmoid(gi[1] + gh[1])
        n = jnp.tanh(gi[2] + r * gh[2])
        h_new = (1.0 - z) * n + z * h
        mask = (t < lengths)[:, None]
        h = jnp.where(mask, h_new, h)
        outs.append(jnp.where(mask, h_new, 0.0))
    return jnp.stack(outs, axis=1), h


if __name__ == "__main__":
    key = jax.random.PRNGKey(0)
    vocab_size, hidden_size = 50, 32
    B, T = 4, 8

    enc = PlainEncoderPallas(vocab_size, hidden_size, key)

    kx, _ = jax.random.split(key)
    x = jax.random.randint(kx, (B, T), 0, vocab_size, dtype=jnp.int32)
    lengths = jnp.array([8, 5, 3, 6], dtype=jnp.int32)   # max == T

    out, hid = enc(x, lengths)
    out = jax.block_until_ready(out)
    hid = jax.block_until_ready(hid)

    assert out.shape == (B, T, hidden_size)
    assert hid.shape == (1, B, hidden_size)
    # padded positions must be exactly zero (pack/pad semantics)
    assert float(jnp.abs(out[1, 5:]).max()) == 0.0
    assert float(jnp.abs(out[2, 3:]).max()) == 0.0
    # hid must equal the last *valid* output per example
    for b, L in enumerate([8, 5, 3, 6]):
        np.testing.assert_allclose(np.asarray(hid[0, b]), np.asarray(out[b, L - 1]),
                                   rtol=1e-6, atol=1e-6)

    # numerical check against a pure-JAX GRU reference (same bf16 operand rounding)
    emb = jnp.take(enc.embed, x, axis=0)
    w_ih, w_hh, b_ih, b_hh = enc._raw
    ref_out, ref_h = _gru_reference(emb, lengths, w_ih, w_hh, b_ih, b_hh, hidden_size)
    np.testing.assert_allclose(np.asarray(out), np.asarray(ref_out), rtol=2e-3, atol=2e-3)
    np.testing.assert_allclose(np.asarray(hid[0]), np.asarray(ref_h), rtol=2e-3, atol=2e-3)

    print("KERNEL_OK")
</pallas_src>

<mosaic_0001>
module attributes {stable_mosaic.version = 11 : i64} {
  func.func @_gru_kernel(%arg0: i32, %arg1: i32, %arg2: memref<8x1xi32, #tpu.memory_space<vmem>>, %arg3: memref<8x8x128xbf16, #tpu.memory_space<vmem>>, %arg4: memref<128x384xbf16, #tpu.memory_space<vmem>>, %arg5: memref<128x384xbf16, #tpu.memory_space<vmem>>, %arg6: memref<1x384xf32, #tpu.memory_space<vmem>>, %arg7: memref<1x128xf32, #tpu.memory_space<vmem>>, %arg8: memref<8x8x128xf32, #tpu.memory_space<vmem>>, %arg9: memref<8x128xf32, #tpu.memory_space<vmem>>, %arg10: memref<8x128xf32, #tpu.memory_space<vmem>>) attributes {dimension_semantics = [#tpu.dimension_semantics<parallel>, #tpu.dimension_semantics<arbitrary>], iteration_bounds = array<i64: 1, 1>, scalar_prefetch = 0 : i64, scratch_operands = 1 : i64, tpu.core_type = #tpu.core_type<tc>, window_params = [{transform_indices = @transform_0, window_bounds = array<i64: 8, 1>}, {transform_indices = @transform_1, window_bounds = array<i64: 8, 8, 128>}, {pipeline_mode = #tpu.pipeline_mode<synchronous>, transform_indices = @transform_2, window_bounds = array<i64: 128, 384>}, {pipeline_mode = #tpu.pipeline_mode<synchronous>, transform_indices = @transform_3, window_bounds = array<i64: 128, 384>}, {pipeline_mode = #tpu.pipeline_mode<synchronous>, transform_indices = @transform_4, window_bounds = array<i64: 1, 384>}, {pipeline_mode = #tpu.pipeline_mode<synchronous>, transform_indices = @transform_5, window_bounds = array<i64: 1, 128>}, {transform_indices = @transform_6, window_bounds = array<i64: 8, 8, 128>}, {transform_indices = @transform_7, window_bounds = array<i64: 8, 128>}]} {
    %c0_i32 = arith.constant 0 : i32
    %0 = arith.cmpi eq, %arg1, %c0_i32 : i32
    %1 = arith.extui %0 : i1 to i32
    %c0_i32_0 = arith.constant 0 : i32
    %2 = arith.cmpi ne, %1, %c0_i32_0 : i32
    scf.if %2 {
      %cst_125 = arith.constant 0.000000e+00 : f32
      %428 = vector.broadcast %cst_125 : f32 to vector<8x128xf32>
      %c0_126 = arith.constant 0 : index
      %c0_127 = arith.constant 0 : index
      %429 = vector.load %arg10[%c0_126, %c0_127] : memref<8x128xf32, #tpu.memory_space<vmem>>, vector<8x128xf32>
      tpu.vector_store %arg10[%c0_126, %c0_127], %428 {strides = array<i32>} : memref<8x128xf32, #tpu.memory_space<vmem>>, vector<8x128xf32>,
    } else {
    }
    %c0 = arith.constant 0 : index
    %c0_1 = arith.constant 0 : index
    %3 = vector.load %arg2[%c0, %c0_1] : memref<8x1xi32, #tpu.memory_space<vmem>>, vector<8x1xi32>
    %c0_2 = arith.constant 0 : index
    %c0_3 = arith.constant 0 : index
    %4 = vector.load %arg6[%c0_2, %c0_3] : memref<1x384xf32, #tpu.memory_space<vmem>>, vector<1x384xf32>
    %c0_4 = arith.constant 0 : index
    %c0_5 = arith.constant 0 : index
    %5 = vector.load %arg7[%c0_4, %c0_5] : memref<1x128xf32, #tpu.memory_space<vmem>>, vector<1x128xf32>
    %c8_i32 = arith.constant 8 : i32
    %6 = arith.muli %arg1, %c8_i32 : i32
    %c0_6 = arith.constant 0 : index
    %c0_7 = arith.constant 0 : index
    %7 = vector.load %arg10[%c0_6, %c0_7] : memref<8x128xf32, #tpu.memory_space<vmem>>, vector<8x128xf32>
    %c0_i32_8 = arith.constant 0 : i32
    %8 = arith.index_cast %c0_i32_8 : i32 to index
    %c0_9 = arith.constant 0 : index
    %c0_10 = arith.constant 0 : index
    %9 = vector.load %arg3[%8, %c0_9, %c0_10] : memref<8x8x128xbf16, #tpu.memory_space<vmem>>, vector<1x8x128xbf16>
    %10 = vector.shape_cast %9 : vector<1x8x128xbf16> to vector<8x128xbf16>
    %c0_11 = arith.constant 0 : index
    %c0_12 = arith.constant 0 : index
    %11 = vector.load %arg4[%c0_11, %c0_12] : memref<128x384xbf16, #tpu.memory_space<vmem>>, vector<128x384xbf16>
    %cst = arith.constant dense<0.000000e+00> : vector<8x384xf32>
    %12 = tpu.matmul %10, %11, %cst {dimension_numbers = #tpu.dot_dimension_numbers<[1], [0], [0], [1], [0, 0, 1, 1], [], []>} : vector<8x128xbf16>, vector<128x384xbf16>, vector<8x384xf32> -> vector<8x384xf32>
    %13 = vector.broadcast %4 : vector<1x384xf32> to vector<8x384xf32>
    %14 = arith.addf %12, %13 : vector<8x384xf32>
    %15 = arith.truncf %7 : vector<8x128xf32> to vector<8x128xbf16>
    %c0_13 = arith.constant 0 : index
    %c0_14 = arith.constant 0 : index
    %16 = vector.load %arg5[%c0_13, %c0_14] : memref<128x384xbf16, #tpu.memory_space<vmem>>, vector<128x384xbf16>
    %cst_15 = arith.constant dense<0.000000e+00> : vector<8x384xf32>
    %17 = tpu.matmul %15, %16, %cst_15 {dimension_numbers = #tpu.dot_dimension_numbers<[1], [0], [0], [1], [0, 0, 1, 1], [], []>} : vector<8x128xbf16>, vector<128x384xbf16>, vector<8x384xf32> -> vector<8x384xf32>
    %18 = vector.extract_strided_slice %14 {offsets = [0, 0], sizes = [8, 128], strides = [1, 1]} : vector<8x384xf32> to vector<8x128xf32>
    %19 = vector.extract_strided_slice %17 {offsets = [0, 0], sizes = [8, 128], strides = [1, 1]} : vector<8x384xf32> to vector<8x128xf32>
    %20 = arith.addf %18, %19 : vector<8x128xf32>
    %21 = arith.negf %20 : vector<8x128xf32>
    %22 = math.exp %21 : vector<8x128xf32>
    %cst_16 = arith.constant 1.000000e+00 : f32
    %23 = vector.broadcast %cst_16 : f32 to vector<8x128xf32>
    %24 = arith.addf %23, %22 : vector<8x128xf32>
    %25 = arith.divf %23, %24 : vector<8x128xf32>
    %26 = vector.extract_strided_slice %14 {offsets = [0, 128], sizes = [8, 128], strides = [1, 1]} : vector<8x384xf32> to vector<8x128xf32>
    %27 = vector.extract_strided_slice %17 {offsets = [0, 128], sizes = [8, 128], strides = [1, 1]} : vector<8x384xf32> to vector<8x128xf32>
    %28 = arith.addf %26, %27 : vector<8x128xf32>
    %29 = arith.negf %28 : vector<8x128xf32>
    %30 = math.exp %29 : vector<8x128xf32>
    %cst_17 = arith.constant 1.000000e+00 : f32
    %31 = vector.broadcast %cst_17 : f32 to vector<8x128xf32>
    %32 = arith.addf %31, %30 : vector<8x128xf32>
    %33 = arith.divf %31, %32 : vector<8x128xf32>
    %34 = vector.extract_strided_slice %14 {offsets = [0, 256], sizes = [8, 128], strides = [1, 1]} : vector<8x384xf32> to vector<8x128xf32>
    %35 = vector.extract_strided_slice %17 {offsets = [0, 256], sizes = [8, 128], strides = [1, 1]} : vector<8x384xf32> to vector<8x128xf32>
    %36 = vector.broadcast %5 : vector<1x128xf32> to vector<8x128xf32>
    %37 = arith.addf %35, %36 : vector<8x128xf32>
    %38 = arith.mulf %25, %37 : vector<8x128xf32>
    %39 = arith.addf %34, %38 : vector<8x128xf32>
    %40 = math.tanh %39 : vector<8x128xf32>
    %cst_18 = arith.constant 1.000000e+00 : f32
    %41 = vector.broadcast %cst_18 : f32 to vector<8x128xf32>
    %42 = arith.subf %41, %33 : vector<8x128xf32>
    %43 = arith.mulf %42, %40 : vector<8x128xf32>
    %44 = arith.mulf %33, %7 : vector<8x128xf32>
    %45 = arith.addf %43, %44 : vector<8x128xf32>
    %46 = arith.addi %6, %c0_i32_8 : i32
    %47 = vector.broadcast %46 : i32 to vector<8x1xi32>
    %48 = arith.cmpi slt, %47, %3 : vector<8x1xi32>
    %49 = vector.shape_cast %48 : vector<8x1xi1> to vector<8x1xi1>
    %50 = vector.broadcast %49 : vector<8x1xi1> to vector<8x128xi1>
    %51 = arith.select %50, %45, %7 : vector<8x128xi1>, vector<8x128xf32>
    %cst_19 = arith.constant 0.000000e+00 : f32
    %52 = vector.shape_cast %48 : vector<8x1xi1> to vector<8x1xi1>
    %53 = vector.broadcast %52 : vector<8x1xi1> to vector<8x128xi1>
    %54 = vector.broadcast %cst_19 : f32 to vector<8x128xf32>
    %55 = arith.select %53, %45, %54 : vector<8x128xi1>, vector<8x128xf32>
    %56 = arith.index_cast %c0_i32_8 : i32 to index
    %c0_20 = arith.constant 0 : index
    %c0_21 = arith.constant 0 : index
    %57 = vector.load %arg8[%56, %c0_20, %c0_21] : memref<8x8x128xf32, #tpu.memory_space<vmem>>, vector<1x8x128xf32>
    %58 = vector.shape_cast %57 : vector<1x8x128xf32> to vector<8x128xf32>
    %59 = vector.shape_cast %55 : vector<8x128xf32> to vector<1x8x128xf32>
    tpu.vector_store %arg8[%56, %c0_20, %c0_21], %59 {strides = array<i32>} : memref<8x8x128xf32, #tpu.memory_space<vmem>>, vector<1x8x128xf32>,
    %c1_i32 = arith.constant 1 : i32
    %60 = arith.index_cast %c1_i32 : i32 to index
    %c0_22 = arith.constant 0 : index
    %c0_23 = arith.constant 0 : index
    %61 = vector.load %arg3[%60, %c0_22, %c0_23] : memref<8x8x128xbf16, #tpu.memory_space<vmem>>, vector<1x8x128xbf16>
    %62 = vector.shape_cast %61 : vector<1x8x128xbf16> to vector<8x128xbf16>
    %c0_24 = arith.constant 0 : index
    %c0_25 = arith.constant 0 : index
    %63 = vector.load %arg4[%c0_24, %c0_25] : memref<128x384xbf16, #tpu.memory_space<vmem>>, vector<128x384xbf16>
    %cst_26 = arith.constant dense<0.000000e+00> : vector<8x384xf32>
    %64 = tpu.matmul %62, %63, %cst_26 {dimension_numbers = #tpu.dot_dimension_numbers<[1], [0], [0], [1], [0, 0, 1, 1], [], []>} : vector<8x128xbf16>, vector<128x384xbf16>, vector<8x384xf32> -> vector<8x384xf32>
    %65 = vector.broadcast %4 : vector<1x384xf32> to vector<8x384xf32>
    %66 = arith.addf %64, %65 : vector<8x384xf32>
    %67 = arith.truncf %51 : vector<8x128xf32> to vector<8x128xbf16>
    %c0_27 = arith.constant 0 : index
    %c0_28 = arith.constant 0 : index
    %68 = vector.load %arg5[%c0_27, %c0_28] : memref<128x384xbf16, #tpu.memory_space<vmem>>, vector<128x384xbf16>
    %cst_29 = arith.constant dense<0.000000e+00> : vector<8x384xf32>
    %69 = tpu.matmul %67, %68, %cst_29 {dimension_numbers = #tpu.dot_dimension_numbers<[1], [0], [0], [1], [0, 0, 1, 1], [], []>} : vector<8x128xbf16>, vector<128x384xbf16>, vector<8x384xf32> -> vector<8x384xf32>
    %70 = vector.extract_strided_slice %66 {offsets = [0, 0], sizes = [8, 128], strides = [1, 1]} : vector<8x384xf32> to vector<8x128xf32>
    %71 = vector.extract_strided_slice %69 {offsets = [0, 0], sizes = [8, 128], strides = [1, 1]} : vector<8x384xf32> to vector<8x128xf32>
    %72 = arith.addf %70, %71 : vector<8x128xf32>
    %73 = arith.negf %72 : vector<8x128xf32>
    %74 = math.exp %73 : vector<8x128xf32>
    %cst_30 = arith.constant 1.000000e+00 : f32
    %75 = vector.broadcast %cst_30 : f32 to vector<8x128xf32>
    %76 = arith.addf %75, %74 : vector<8x128xf32>
    %77 = arith.divf %75, %76 : vector<8x128xf32>
    %78 = vector.extract_strided_slice %66 {offsets = [0, 128], sizes = [8, 128], strides = [1, 1]} : vector<8x384xf32> to vector<8x128xf32>
    %79 = vector.extract_strided_slice %69 {offsets = [0, 128], sizes = [8, 128], strides = [1, 1]} : vector<8x384xf32> to vector<8x128xf32>
    %80 = arith.addf %78, %79 : vector<8x128xf32>
    %81 = arith.negf %80 : vector<8x128xf32>
    %82 = math.exp %81 : vector<8x128xf32>
    %cst_31 = arith.constant 1.000000e+00 : f32
    %83 = vector.broadcast %cst_31 : f32 to vector<8x128xf32>
    %84 = arith.addf %83, %82 : vector<8x128xf32>
    %85 = arith.divf %83, %84 : vector<8x128xf32>
    %86 = vector.extract_strided_slice %66 {offsets = [0, 256], sizes = [8, 128], strides = [1, 1]} : vector<8x384xf32> to vector<8x128xf32>
    %87 = vector.extract_strided_slice %69 {offsets = [0, 256], sizes = [8, 128], strides = [1, 1]} : vector<8x384xf32> to vector<8x128xf32>
    %88 = vector.broadcast %5 : vector<1x128xf32> to vector<8x128xf32>
    %89 = arith.addf %87, %88 : vector<8x128xf32>
    %90 = arith.mulf %77, %89 : vector<8x128xf32>
    %91 = arith.addf %86, %90 : vector<8x128xf32>
    %92 = math.tanh %91 : vector<8x128xf32>
    %cst_32 = arith.constant 1.000000e+00 : f32
    %93 = vector.broadcast %cst_32 : f32 to vector<8x128xf32>
    %94 = arith.subf %93, %85 : vector<8x128xf32>
    %95 = arith.mulf %94, %92 : vector<8x128xf32>
    %96 = arith.mulf %85, %51 : vector<8x128xf32>
    %97 = arith.addf %95, %96 : vector<8x128xf32>
    %98 = arith.addi %6, %c1_i32 : i32
    %99 = vector.broadcast %98 : i32 to vector<8x1xi32>
    %100 = arith.cmpi slt, %99, %3 : vector<8x1xi32>
    %101 = vector.shape_cast %100 : vector<8x1xi1> to vector<8x1xi1>
    %102 = vector.broadcast %101 : vector<8x1xi1> to vector<8x128xi1>
    %103 = arith.select %102, %97, %51 : vector<8x128xi1>, vector<8x128xf32>
    %cst_33 = arith.constant 0.000000e+00 : f32
    %104 = vector.shape_cast %100 : vector<8x1xi1> to vector<8x1xi1>
    %105 = vector.broadcast %104 : vector<8x1xi1> to vector<8x128xi1>
    %106 = vector.broadcast %cst_33 : f32 to vector<8x128xf32>
    %107 = arith.select %105, %97, %106 : vector<8x128xi1>, vector<8x128xf32>
    %108 = arith.index_cast %c1_i32 : i32 to index
    %c0_34 = arith.constant 0 : index
    %c0_35 = arith.constant 0 : index
    %109 = vector.load %arg8[%108, %c0_34, %c0_35] : memref<8x8x128xf32, #tpu.memory_space<vmem>>, vector<1x8x128xf32>
    %110 = vector.shape_cast %109 : vector<1x8x128xf32> to vector<8x128xf32>
    %111 = vector.shape_cast %107 : vector<8x128xf32> to vector<1x8x128xf32>
    tpu.vector_store %arg8[%108, %c0_34, %c0_35], %111 {strides = array<i32>} : memref<8x8x128xf32, #tpu.memory_space<vmem>>, vector<1x8x128xf32>,
    %c2_i32 = arith.constant 2 : i32
    %112 = arith.index_cast %c2_i32 : i32 to index
    %c0_36 = arith.constant 0 : index
    %c0_37 = arith.constant 0 : index
    %113 = vector.load %arg3[%112, %c0_36, %c0_37] : memref<8x8x128xbf16, #tpu.memory_space<vmem>>, vector<1x8x128xbf16>
    %114 = vector.shape_cast %113 : vector<1x8x128xbf16> to vector<8x128xbf16>
    %c0_38 = arith.constant 0 : index
    %c0_39 = arith.constant 0 : index
    %115 = vector.load %arg4[%c0_38, %c0_39] : memref<128x384xbf16, #tpu.memory_space<vmem>>, vector<128x384xbf16>
    %cst_40 = arith.constant dense<0.000000e+00> : vector<8x384xf32>
    %116 = tpu.matmul %114, %115, %cst_40 {dimension_numbers = #tpu.dot_dimension_numbers<[1], [0], [0], [1], [0, 0, 1, 1], [], []>} : vector<8x128xbf16>, vector<128x384xbf16>, vector<8x384xf32> -> vector<8x384xf32>
    %117 = vector.broadcast %4 : vector<1x384xf32> to vector<8x384xf32>
    %118 = arith.addf %116, %117 : vector<8x384xf32>
    %119 = arith.truncf %103 : vector<8x128xf32> to vector<8x128xbf16>
    %c0_41 = arith.constant 0 : index
    %c0_42 = arith.constant 0 : index
    %120 = vector.load %arg5[%c0_41, %c0_42] : memref<128x384xbf16, #tpu.memory_space<vmem>>, vector<128x384xbf16>
    %cst_43 = arith.constant dense<0.000000e+00> : vector<8x384xf32>
    %121 = tpu.matmul %119, %120, %cst_43 {dimension_numbers = #tpu.dot_dimension_numbers<[1], [0], [0], [1], [0, 0, 1, 1], [], []>} : vector<8x128xbf16>, vector<128x384xbf16>, vector<8x384xf32> -> vector<8x384xf32>
    %122 = vector.extract_strided_slice %118 {offsets = [0, 0], sizes = [8, 128], strides = [1, 1]} : vector<8x384xf32> to vector<8x128xf32>
    %123 = vector.extract_strided_slice %121 {offsets = [0, 0], sizes = [8, 128], strides = [1, 1]} : vector<8x384xf32> to vector<8x128xf32>
    %124 = arith.addf %122, %123 : vector<8x128xf32>
    %125 = arith.negf %124 : vector<8x128xf32>
    %126 = math.exp %125 : vector<8x128xf32>
    %cst_44 = arith.constant 1.000000e+00 : f32
    %127 = vector.broadcast %cst_44 : f32 to vector<8x128xf32>
    %128 = arith.addf %127, %126 : vector<8x128xf32>
    %129 = arith.divf %127, %128 : vector<8x128xf32>
    %130 = vector.extract_strided_slice %118 {offsets = [0, 128], sizes = [8, 128], strides = [1, 1]} : vector<8x384xf32> to vector<8x128xf32>
    %131 = vector.extract_strided_slice %121 {offsets = [0, 128], sizes = [8, 128], strides = [1, 1]} : vector<8x384xf32> to vector<8x128xf32>
    %132 = arith.addf %130, %131 : vector<8x128xf32>
    %133 = arith.negf %132 : vector<8x128xf32>
    %134 = math.exp %133 : vector<8x128xf32>
    %cst_45 = arith.constant 1.000000e+00 : f32
    %135 = vector.broadcast %cst_45 : f32 to vector<8x128xf32>
    %136 = arith.addf %135, %134 : vector<8x128xf32>
    %137 = arith.divf %135, %136 : vector<8x128xf32>
    %138 = vector.extract_strided_slice %118 {offsets = [0, 256], sizes = [8, 128], strides = [1, 1]} : vector<8x384xf32> to vector<8x128xf32>
    %139 = vector.extract_strided_slice %121 {offsets = [0, 256], sizes = [8, 128], strides = [1, 1]} : vector<8x384xf32> to vector<8x128xf32>
    %140 = vector.broadcast %5 : vector<1x128xf32> to vector<8x128xf32>
    %141 = arith.addf %139, %140 : vector<8x128xf32>
    %142 = arith.mulf %129, %141 : vector<8x128xf32>
    %143 = arith.addf %138, %142 : vector<8x128xf32>
    %144 = math.tanh %143 : vector<8x128xf32>
    %cst_46 = arith.constant 1.000000e+00 : f32
    %145 = vector.broadcast %cst_46 : f32 to vector<8x128xf32>
    %146 = arith.subf %145, %137 : vector<8x128xf32>
    %147 = arith.mulf %146, %144 : vector<8x128xf32>
    %148 = arith.mulf %137, %103 : vector<8x128xf32>
    %149 = arith.addf %147, %148 : vector<8x128xf32>
    %150 = arith.addi %6, %c2_i32 : i32
    %151 = vector.broadcast %150 : i32 to vector<8x1xi32>
    %152 = arith.cmpi slt, %151, %3 : vector<8x1xi32>
    %153 = vector.shape_cast %152 : vector<8x1xi1> to vector<8x1xi1>
    %154 = vector.broadcast %153 : vector<8x1xi1> to vector<8x128xi1>
    %155 = arith.select %154, %149, %103 : vector<8x128xi1>, vector<8x128xf32>
    %cst_47 = arith.constant 0.000000e+00 : f32
    %156 = vector.shape_cast %152 : vector<8x1xi1> to vector<8x1xi1>
    %157 = vector.broadcast %156 : vector<8x1xi1> to vector<8x128xi1>
    %158 = vector.broadcast %cst_47 : f32 to vector<8x128xf32>
    %159 = arith.select %157, %149, %158 : vector<8x128xi1>, vector<8x128xf32>
    %160 = arith.index_cast %c2_i32 : i32 to index
    %c0_48 = arith.constant 0 : index
    %c0_49 = arith.constant 0 : index
    %161 = vector.load %arg8[%160, %c0_48, %c0_49] : memref<8x8x128xf32, #tpu.memory_space<vmem>>, vector<1x8x128xf32>
    %162 = vector.shape_cast %161 : vector<1x8x128xf32> to vector<8x128xf32>
    %163 = vector.shape_cast %159 : vector<8x128xf32> to vector<1x8x128xf32>
    tpu.vector_store %arg8[%160, %c0_48, %c0_49], %163 {strides = array<i32>} : memref<8x8x128xf32, #tpu.memory_space<vmem>>, vector<1x8x128xf32>,
    %c3_i32 = arith.constant 3 : i32
    %164 = arith.index_cast %c3_i32 : i32 to index
    %c0_50 = arith.constant 0 : index
    %c0_51 = arith.constant 0 : index
    %165 = vector.load %arg3[%164, %c0_50, %c0_51] : memref<8x8x128xbf16, #tpu.memory_space<vmem>>, vector<1x8x128xbf16>
    %166 = vector.shape_cast %165 : vector<1x8x128xbf16> to vector<8x128xbf16>
    %c0_52 = arith.constant 0 : index
    %c0_53 = arith.constant 0 : index
    %167 = vector.load %arg4[%c0_52, %c0_53] : memref<128x384xbf16, #tpu.memory_space<vmem>>, vector<128x384xbf16>
    %cst_54 = arith.constant dense<0.000000e+00> : vector<8x384xf32>
    %168 = tpu.matmul %166, %167, %cst_54 {dimension_numbers = #tpu.dot_dimension_numbers<[1], [0], [0], [1], [0, 0, 1, 1], [], []>} : vector<8x128xbf16>, vector<128x384xbf16>, vector<8x384xf32> -> vector<8x384xf32>
    %169 = vector.broadcast %4 : vector<1x384xf32> to vector<8x384xf32>
    %170 = arith.addf %168, %169 : vector<8x384xf32>
    %171 = arith.truncf %155 : vector<8x128xf32> to vector<8x128xbf16>
    %c0_55 = arith.constant 0 : index
    %c0_56 = arith.constant 0 : index
    %172 = vector.load %arg5[%c0_55, %c0_56] : memref<128x384xbf16, #tpu.memory_space<vmem>>, vector<128x384xbf16>
    %cst_57 = arith.constant dense<0.000000e+00> : vector<8x384xf32>
    %173 = tpu.matmul %171, %172, %cst_57 {dimension_numbers = #tpu.dot_dimension_numbers<[1], [0], [0], [1], [0, 0, 1, 1], [], []>} : vector<8x128xbf16>, vector<128x384xbf16>, vector<8x384xf32> -> vector<8x384xf32>
    %174 = vector.extract_strided_slice %170 {offsets = [0, 0], sizes = [8, 128], strides = [1, 1]} : vector<8x384xf32> to vector<8x128xf32>
    %175 = vector.extract_strided_slice %173 {offsets = [0, 0], sizes = [8, 128], strides = [1, 1]} : vector<8x384xf32> to vector<8x128xf32>
    %176 = arith.addf %174, %175 : vector<8x128xf32>
    %177 = arith.negf %176 : vector<8x128xf32>
    %178 = math.exp %177 : vector<8x128xf32>
    %cst_58 = arith.constant 1.000000e+00 : f32
    %179 = vector.broadcast %cst_58 : f32 to vector<8x128xf32>
    %180 = arith.addf %179, %178 : vector<8x128xf32>
    %181 = arith.divf %179, %180 : vector<8x128xf32>
    %182 = vector.extract_strided_slice %170 {offsets = [0, 128], sizes = [8, 128], strides = [1, 1]} : vector<8x384xf32> to vector<8x128xf32>
    %183 = vector.extract_strided_slice %173 {offsets = [0, 128], sizes = [8, 128], strides = [1, 1]} : vector<8x384xf32> to vector<8x128xf32>
    %184 = arith.addf %182, %183 : vector<8x128xf32>
    %185 = arith.negf %184 : vector<8x128xf32>
    %186 = math.exp %185 : vector<8x128xf32>
    %cst_59 = arith.constant 1.000000e+00 : f32
    %187 = vector.broadcast %cst_59 : f32 to vector<8x128xf32>
    %188 = arith.addf %187, %186 : vector<8x128xf32>
    %189 = arith.divf %187, %188 : vector<8x128xf32>
    %190 = vector.extract_strided_slice %170 {offsets = [0, 256], sizes = [8, 128], strides = [1, 1]} : vector<8x384xf32> to vector<8x128xf32>
    %191 = vector.extract_strided_slice %173 {offsets = [0, 256], sizes = [8, 128], strides = [1, 1]} : vector<8x384xf32> to vector<8x128xf32>
    %192 = vector.broadcast %5 : vector<1x128xf32> to vector<8x128xf32>
    %193 = arith.addf %191, %192 : vector<8x128xf32>
    %194 = arith.mulf %181, %193 : vector<8x128xf32>
    %195 = arith.addf %190, %194 : vector<8x128xf32>
    %196 = math.tanh %195 : vector<8x128xf32>
    %cst_60 = arith.constant 1.000000e+00 : f32
    %197 = vector.broadcast %cst_60 : f32 to vector<8x128xf32>
    %198 = arith.subf %197, %189 : vector<8x128xf32>
    %199 = arith.mulf %198, %196 : vector<8x128xf32>
    %200 = arith.mulf %189, %155 : vector<8x128xf32>
    %201 = arith.addf %199, %200 : vector<8x128xf32>
    %202 = arith.addi %6, %c3_i32 : i32
    %203 = vector.broadcast %202 : i32 to vector<8x1xi32>
    %204 = arith.cmpi slt, %203, %3 : vector<8x1xi32>
    %205 = vector.shape_cast %204 : vector<8x1xi1> to vector<8x1xi1>
    %206 = vector.broadcast %205 : vector<8x1xi1> to vector<8x128xi1>
    %207 = arith.select %206, %201, %155 : vector<8x128xi1>, vector<8x128xf32>
    %cst_61 = arith.constant 0.000000e+00 : f32
    %208 = vector.shape_cast %204 : vector<8x1xi1> to vector<8x1xi1>
    %209 = vector.broadcast %208 : vector<8x1xi1> to vector<8x128xi1>
    %210 = vector.broadcast %cst_61 : f32 to vector<8x128xf32>
    %211 = arith.select %209, %201, %210 : vector<8x128xi1>, vector<8x128xf32>
    %212 = arith.index_cast %c3_i32 : i32 to index
    %c0_62 = arith.constant 0 : index
    %c0_63 = arith.constant 0 : index
    %213 = vector.load %arg8[%212, %c0_62, %c0_63] : memref<8x8x128xf32, #tpu.memory_space<vmem>>, vector<1x8x128xf32>
    %214 = vector.shape_cast %213 : vector<1x8x128xf32> to vector<8x128xf32>
    %215 = vector.shape_cast %211 : vector<8x128xf32> to vector<1x8x128xf32>
    tpu.vector_store %arg8[%212, %c0_62, %c0_63], %215 {strides = array<i32>} : memref<8x8x128xf32, #tpu.memory_space<vmem>>, vector<1x8x128xf32>,
    %c4_i32 = arith.constant 4 : i32
    %216 = arith.index_cast %c4_i32 : i32 to index
    %c0_64 = arith.constant 0 : index
    %c0_65 = arith.constant 0 : index
    %217 = vector.load %arg3[%216, %c0_64, %c0_65] : memref<8x8x128xbf16, #tpu.memory_space<vmem>>, vector<1x8x128xbf16>
    %218 = vector.shape_cast %217 : vector<1x8x128xbf16> to vector<8x128xbf16>
    %c0_66 = arith.constant 0 : index
    %c0_67 = arith.constant 0 : index
    %219 = vector.load %arg4[%c0_66, %c0_67] : memref<128x384xbf16, #tpu.memory_space<vmem>>, vector<128x384xbf16>
    %cst_68 = arith.constant dense<0.000000e+00> : vector<8x384xf32>
    %220 = tpu.matmul %218, %219, %cst_68 {dimension_numbers = #tpu.dot_dimension_numbers<[1], [0], [0], [1], [0, 0, 1, 1], [], []>} : vector<8x128xbf16>, vector<128x384xbf16>, vector<8x384xf32> -> vector<8x384xf32>
    %221 = vector.broadcast %4 : vector<1x384xf32> to vector<8x384xf32>
    %222 = arith.addf %220, %221 : vector<8x384xf32>
    %223 = arith.truncf %207 : vector<8x128xf32> to vector<8x128xbf16>
    %c0_69 = arith.constant 0 : index
    %c0_70 = arith.constant 0 : index
    %224 = vector.load %arg5[%c0_69, %c0_70] : memref<128x384xbf16, #tpu.memory_space<vmem>>, vector<128x384xbf16>
    %cst_71 = arith.constant dense<0.000000e+00> : vector<8x384xf32>
    %225 = tpu.matmul %223, %224, %cst_71 {dimension_numbers = #tpu.dot_dimension_numbers<[1], [0], [0], [1], [0, 0, 1, 1], [], []>} : vector<8x128xbf16>, vector<128x384xbf16>, vector<8x384xf32> -> vector<8x384xf32>
    %226 = vector.extract_strided_slice %222 {offsets = [0, 0], sizes = [8, 128], strides = [1, 1]} : vector<8x384xf32> to vector<8x128xf32>
    %227 = vector.extract_strided_slice %225 {offsets = [0, 0], sizes = [8, 128], strides = [1, 1]} : vector<8x384xf32> to vector<8x128xf32>
    %228 = arith.addf %226, %227 : vector<8x128xf32>
    %229 = arith.negf %228 : vector<8x128xf32>
    %230 = math.exp %229 : vector<8x128xf32>
    %cst_72 = arith.constant 1.000000e+00 : f32
    %231 = vector.broadcast %cst_72 : f32 to vector<8x128xf32>
    %232 = arith.addf %231, %230 : vector<8x128xf32>
    %233 = arith.divf %231, %232 : vector<8x128xf32>
    %234 = vector.extract_strided_slice %222 {offsets = [0, 128], sizes = [8, 128], strides = [1, 1]} : vector<8x384xf32> to vector<8x128xf32>
    %235 = vector.extract_strided_slice %225 {offsets = [0, 128], sizes = [8, 128], strides = [1, 1]} : vector<8x384xf32> to vector<8x128xf32>
    %236 = arith.addf %234, %235 : vector<8x128xf32>
    %237 = arith.negf %236 : vector<8x128xf32>
    %238 = math.exp %237 : vector<8x128xf32>
    %cst_73 = arith.constant 1.000000e+00 : f32
    %239 = vector.broadcast %cst_73 : f32 to vector<8x128xf32>
    %240 = arith.addf %239, %238 : vector<8x128xf32>
    %241 = arith.divf %239, %240 : vector<8x128xf32>
    %242 = vector.extract_strided_slice %222 {offsets = [0, 256], sizes = [8, 128], strides = [1, 1]} : vector<8x384xf32> to vector<8x128xf32>
    %243 = vector.extract_strided_slice %225 {offsets = [0, 256], sizes = [8, 128], strides = [1, 1]} : vector<8x384xf32> to vector<8x128xf32>
    %244 = vector.broadcast %5 : vector<1x128xf32> to vector<8x128xf32>
    %245 = arith.addf %243, %244 : vector<8x128xf32>
    %246 = arith.mulf %233, %245 : vector<8x128xf32>
    %247 = arith.addf %242, %246 : vector<8x128xf32>
    %248 = math.tanh %247 : vector<8x128xf32>
    %cst_74 = arith.constant 1.000000e+00 : f32
    %249 = vector.broadcast %cst_74 : f32 to vector<8x128xf32>
    %250 = arith.subf %249, %241 : vector<8x128xf32>
    %251 = arith.mulf %250, %248 : vector<8x128xf32>
    %252 = arith.mulf %241, %207 : vector<8x128xf32>
    %253 = arith.addf %251, %252 : vector<8x128xf32>
    %254 = arith.addi %6, %c4_i32 : i32
    %255 = vector.broadcast %254 : i32 to vector<8x1xi32>
    %256 = arith.cmpi slt, %255, %3 : vector<8x1xi32>
    %257 = vector.shape_cast %256 : vector<8x1xi1> to vector<8x1xi1>
    %258 = vector.broadcast %257 : vector<8x1xi1> to vector<8x128xi1>
    %259 = arith.select %258, %253, %207 : vector<8x128xi1>, vector<8x128xf32>
    %cst_75 = arith.constant 0.000000e+00 : f32
    %260 = vector.shape_cast %256 : vector<8x1xi1> to vector<8x1xi1>
    %261 = vector.broadcast %260 : vector<8x1xi1> to vector<8x128xi1>
    %262 = vector.broadcast %cst_75 : f32 to vector<8x128xf32>
    %263 = arith.select %261, %253, %262 : vector<8x128xi1>, vector<8x128xf32>
    %264 = arith.index_cast %c4_i32 : i32 to index
    %c0_76 = arith.constant 0 : index
    %c0_77 = arith.constant 0 : index
    %265 = vector.load %arg8[%264, %c0_76, %c0_77] : memref<8x8x128xf32, #tpu.memory_space<vmem>>, vector<1x8x128xf32>
    %266 = vector.shape_cast %265 : vector<1x8x128xf32> to vector<8x128xf32>
    %267 = vector.shape_cast %263 : vector<8x128xf32> to vector<1x8x128xf32>
    tpu.vector_store %arg8[%264, %c0_76, %c0_77], %267 {strides = array<i32>} : memref<8x8x128xf32, #tpu.memory_space<vmem>>, vector<1x8x128xf32>,
    %c5_i32 = arith.constant 5 : i32
    %268 = arith.index_cast %c5_i32 : i32 to index
    %c0_78 = arith.constant 0 : index
    %c0_79 = arith.constant 0 : index
    %269 = vector.load %arg3[%268, %c0_78, %c0_79] : memref<8x8x128xbf16, #tpu.memory_space<vmem>>, vector<1x8x128xbf16>
    %270 = vector.shape_cast %269 : vector<1x8x128xbf16> to vector<8x128xbf16>
    %c0_80 = arith.constant 0 : index
    %c0_81 = arith.constant 0 : index
    %271 = vector.load %arg4[%c0_80, %c0_81] : memref<128x384xbf16, #tpu.memory_space<vmem>>, vector<128x384xbf16>
    %cst_82 = arith.constant dense<0.000000e+00> : vector<8x384xf32>
    %272 = tpu.matmul %270, %271, %cst_82 {dimension_numbers = #tpu.dot_dimension_numbers<[1], [0], [0], [1], [0, 0, 1, 1], [], []>} : vector<8x128xbf16>, vector<128x384xbf16>, vector<8x384xf32> -> vector<8x384xf32>
    %273 = vector.broadcast %4 : vector<1x384xf32> to vector<8x384xf32>
    %274 = arith.addf %272, %273 : vector<8x384xf32>
    %275 = arith.truncf %259 : vector<8x128xf32> to vector<8x128xbf16>
    %c0_83 = arith.constant 0 : index
    %c0_84 = arith.constant 0 : index
    %276 = vector.load %arg5[%c0_83, %c0_84] : memref<128x384xbf16, #tpu.memory_space<vmem>>, vector<128x384xbf16>
    %cst_85 = arith.constant dense<0.000000e+00> : vector<8x384xf32>
    %277 = tpu.matmul %275, %276, %cst_85 {dimension_numbers = #tpu.dot_dimension_numbers<[1], [0], [0], [1], [0, 0, 1, 1], [], []>} : vector<8x128xbf16>, vector<128x384xbf16>, vector<8x384xf32> -> vector<8x384xf32>
    %278 = vector.extract_strided_slice %274 {offsets = [0, 0], sizes = [8, 128], strides = [1, 1]} : vector<8x384xf32> to vector<8x128xf32>
    %279 = vector.extract_strided_slice %277 {offsets = [0, 0], sizes = [8, 128], strides = [1, 1]} : vector<8x384xf32> to vector<8x128xf32>
    %280 = arith.addf %278, %279 : vector<8x128xf32>
    %281 = arith.negf %280 : vector<8x128xf32>
    %282 = math.exp %281 : vector<8x128xf32>
    %cst_86 = arith.constant 1.000000e+00 : f32
    %283 = vector.broadcast %cst_86 : f32 to vector<8x128xf32>
    %284 = arith.addf %283, %282 : vector<8x128xf32>
    %285 = arith.divf %283, %284 : vector<8x128xf32>
    %286 = vector.extract_strided_slice %274 {offsets = [0, 128], sizes = [8, 128], strides = [1, 1]} : vector<8x384xf32> to vector<8x128xf32>
    %287 = vector.extract_strided_slice %277 {offsets = [0, 128], sizes = [8, 128], strides = [1, 1]} : vector<8x384xf32> to vector<8x128xf32>
    %288 = arith.addf %286, %287 : vector<8x128xf32>
    %289 = arith.negf %288 : vector<8x128xf32>
    %290 = math.exp %289 : vector<8x128xf32>
    %cst_87 = arith.constant 1.000000e+00 : f32
    %291 = vector.broadcast %cst_87 : f32 to vector<8x128xf32>
    %292 = arith.addf %291, %290 : vector<8x128xf32>
    %293 = arith.divf %291, %292 : vector<8x128xf32>
    %294 = vector.extract_strided_slice %274 {offsets = [0, 256], sizes = [8, 128], strides = [1, 1]} : vector<8x384xf32> to vector<8x128xf32>
    %295 = vector.extract_strided_slice %277 {offsets = [0, 256], sizes = [8, 128], strides = [1, 1]} : vector<8x384xf32> to vector<8x128xf32>
    %296 = vector.broadcast %5 : vector<1x128xf32> to vector<8x128xf32>
    %297 = arith.addf %295, %296 : vector<8x128xf32>
    %298 = arith.mulf %285, %297 : vector<8x128xf32>
    %299 = arith.addf %294, %298 : vector<8x128xf32>
    %300 = math.tanh %299 : vector<8x128xf32>
    %cst_88 = arith.constant 1.000000e+00 : f32
    %301 = vector.broadcast %cst_88 : f32 to vector<8x128xf32>
    %302 = arith.subf %301, %293 : vector<8x128xf32>
    %303 = arith.mulf %302, %300 : vector<8x128xf32>
    %304 = arith.mulf %293, %259 : vector<8x128xf32>
    %305 = arith.addf %303, %304 : vector<8x128xf32>
    %306 = arith.addi %6, %c5_i32 : i32
    %307 = vector.broadcast %306 : i32 to vector<8x1xi32>
    %308 = arith.cmpi slt, %307, %3 : vector<8x1xi32>
    %309 = vector.shape_cast %308 : vector<8x1xi1> to vector<8x1xi1>
    %310 = vector.broadcast %309 : vector<8x1xi1> to vector<8x128xi1>
    %311 = arith.select %310, %305, %259 : vector<8x128xi1>, vector<8x128xf32>
    %cst_89 = arith.constant 0.000000e+00 : f32
    %312 = vector.shape_cast %308 : vector<8x1xi1> to vector<8x1xi1>
    %313 = vector.broadcast %312 : vector<8x1xi1> to vector<8x128xi1>
    %314 = vector.broadcast %cst_89 : f32 to vector<8x128xf32>
    %315 = arith.select %313, %305, %314 : vector<8x128xi1>, vector<8x128xf32>
    %316 = arith.index_cast %c5_i32 : i32 to index
    %c0_90 = arith.constant 0 : index
    %c0_91 = arith.constant 0 : index
    %317 = vector.load %arg8[%316, %c0_90, %c0_91] : memref<8x8x128xf32, #tpu.memory_space<vmem>>, vector<1x8x128xf32>
    %318 = vector.shape_cast %317 : vector<1x8x128xf32> to vector<8x128xf32>
    %319 = vector.shape_cast %315 : vector<8x128xf32> to vector<1x8x128xf32>
    tpu.vector_store %arg8[%316, %c0_90, %c0_91], %319 {strides = array<i32>} : memref<8x8x128xf32, #tpu.memory_space<vmem>>, vector<1x8x128xf32>,
    %c6_i32 = arith.constant 6 : i32
    %320 = arith.index_cast %c6_i32 : i32 to index
    %c0_92 = arith.constant 0 : index
    %c0_93 = arith.constant 0 : index
    %321 = vector.load %arg3[%320, %c0_92, %c0_93] : memref<8x8x128xbf16, #tpu.memory_space<vmem>>, vector<1x8x128xbf16>
    %322 = vector.shape_cast %321 : vector<1x8x128xbf16> to vector<8x128xbf16>
    %c0_94 = arith.constant 0 : index
    %c0_95 = arith.constant 0 : index
    %323 = vector.load %arg4[%c0_94, %c0_95] : memref<128x384xbf16, #tpu.memory_space<vmem>>, vector<128x384xbf16>
    %cst_96 = arith.constant dense<0.000000e+00> : vector<8x384xf32>
    %324 = tpu.matmul %322, %323, %cst_96 {dimension_numbers = #tpu.dot_dimension_numbers<[1], [0], [0], [1], [0, 0, 1, 1], [], []>} : vector<8x128xbf16>, vector<128x384xbf16>, vector<8x384xf32> -> vector<8x384xf32>
    %325 = vector.broadcast %4 : vector<1x384xf32> to vector<8x384xf32>
    %326 = arith.addf %324, %325 : vector<8x384xf32>
    %327 = arith.truncf %311 : vector<8x128xf32> to vector<8x128xbf16>
    %c0_97 = arith.constant 0 : index
    %c0_98 = arith.constant 0 : index
    %328 = vector.load %arg5[%c0_97, %c0_98] : memref<128x384xbf16, #tpu.memory_space<vmem>>, vector<128x384xbf16>
    %cst_99 = arith.constant dense<0.000000e+00> : vector<8x384xf32>
    %329 = tpu.matmul %327, %328, %cst_99 {dimension_numbers = #tpu.dot_dimension_numbers<[1], [0], [0], [1], [0, 0, 1, 1], [], []>} : vector<8x128xbf16>, vector<128x384xbf16>, vector<8x384xf32> -> vector<8x384xf32>
    %330 = vector.extract_strided_slice %326 {offsets = [0, 0], sizes = [8, 128], strides = [1, 1]} : vector<8x384xf32> to vector<8x128xf32>
    %331 = vector.extract_strided_slice %329 {offsets = [0, 0], sizes = [8, 128], strides = [1, 1]} : vector<8x384xf32> to vector<8x128xf32>
    %332 = arith.addf %330, %331 : vector<8x128xf32>
    %333 = arith.negf %332 : vector<8x128xf32>
    %334 = math.exp %333 : vector<8x128xf32>
    %cst_100 = arith.constant 1.000000e+00 : f32
    %335 = vector.broadcast %cst_100 : f32 to vector<8x128xf32>
    %336 = arith.addf %335, %334 : vector<8x128xf32>
    %337 = arith.divf %335, %336 : vector<8x128xf32>
    %338 = vector.extract_strided_slice %326 {offsets = [0, 128], sizes = [8, 128], strides = [1, 1]} : vector<8x384xf32> to vector<8x128xf32>
    %339 = vector.extract_strided_slice %329 {offsets = [0, 128], sizes = [8, 128], strides = [1, 1]} : vector<8x384xf32> to vector<8x128xf32>
    %340 = arith.addf %338, %339 : vector<8x128xf32>
    %341 = arith.negf %340 : vector<8x128xf32>
    %342 = math.exp %341 : vector<8x128xf32>
    %cst_101 = arith.constant 1.000000e+00 : f32
    %343 = vector.broadcast %cst_101 : f32 to vector<8x128xf32>
    %344 = arith.addf %343, %342 : vector<8x128xf32>
    %345 = arith.divf %343, %344 : vector<8x128xf32>
    %346 = vector.extract_strided_slice %326 {offsets = [0, 256], sizes = [8, 128], strides = [1, 1]} : vector<8x384xf32> to vector<8x128xf32>
    %347 = vector.extract_strided_slice %329 {offsets = [0, 256], sizes = [8, 128], strides = [1, 1]} : vector<8x384xf32> to vector<8x128xf32>
    %348 = vector.broadcast %5 : vector<1x128xf32> to vector<8x128xf32>
    %349 = arith.addf %347, %348 : vector<8x128xf32>
    %350 = arith.mulf %337, %349 : vector<8x128xf32>
    %351 = arith.addf %346, %350 : vector<8x128xf32>
    %352 = math.tanh %351 : vector<8x128xf32>
    %cst_102 = arith.constant 1.000000e+00 : f32
    %353 = vector.broadcast %cst_102 : f32 to vector<8x128xf32>
    %354 = arith.subf %353, %345 : vector<8x128xf32>
    %355 = arith.mulf %354, %352 : vector<8x128xf32>
    %356 = arith.mulf %345, %311 : vector<8x128xf32>
    %357 = arith.addf %355, %356 : vector<8x128xf32>
    %358 = arith.addi %6, %c6_i32 : i32
    %359 = vector.broadcast %358 : i32 to vector<8x1xi32>
    %360 = arith.cmpi slt, %359, %3 : vector<8x1xi32>
    %361 = vector.shape_cast %360 : vector<8x1xi1> to vector<8x1xi1>
    %362 = vector.broadcast %361 : vector<8x1xi1> to vector<8x128xi1>
    %363 = arith.select %362, %357, %311 : vector<8x128xi1>, vector<8x128xf32>
    %cst_103 = arith.constant 0.000000e+00 : f32
    %364 = vector.shape_cast %360 : vector<8x1xi1> to vector<8x1xi1>
    %365 = vector.broadcast %364 : vector<8x1xi1> to vector<8x128xi1>
    %366 = vector.broadcast %cst_103 : f32 to vector<8x128xf32>
    %367 = arith.select %365, %357, %366 : vector<8x128xi1>, vector<8x128xf32>
    %368 = arith.index_cast %c6_i32 : i32 to index
    %c0_104 = arith.constant 0 : index
    %c0_105 = arith.constant 0 : index
    %369 = vector.load %arg8[%368, %c0_104, %c0_105] : memref<8x8x128xf32, #tpu.memory_space<vmem>>, vector<1x8x128xf32>
    %370 = vector.shape_cast %369 : vector<1x8x128xf32> to vector<8x128xf32>
    %371 = vector.shape_cast %367 : vector<8x128xf32> to vector<1x8x128xf32>
    tpu.vector_store %arg8[%368, %c0_104, %c0_105], %371 {strides = array<i32>} : memref<8x8x128xf32, #tpu.memory_space<vmem>>, vector<1x8x128xf32>,
    %c7_i32 = arith.constant 7 : i32
    %372 = arith.index_cast %c7_i32 : i32 to index
    %c0_106 = arith.constant 0 : index
    %c0_107 = arith.constant 0 : index
    %373 = vector.load %arg3[%372, %c0_106, %c0_107] : memref<8x8x128xbf16, #tpu.memory_space<vmem>>, vector<1x8x128xbf16>
    %374 = vector.shape_cast %373 : vector<1x8x128xbf16> to vector<8x128xbf16>
    %c0_108 = arith.constant 0 : index
    %c0_109 = arith.constant 0 : index
    %375 = vector.load %arg4[%c0_108, %c0_109] : memref<128x384xbf16, #tpu.memory_space<vmem>>, vector<128x384xbf16>
    %cst_110 = arith.constant dense<0.000000e+00> : vector<8x384xf32>
    %376 = tpu.matmul %374, %375, %cst_110 {dimension_numbers = #tpu.dot_dimension_numbers<[1], [0], [0], [1], [0, 0, 1, 1], [], []>} : vector<8x128xbf16>, vector<128x384xbf16>, vector<8x384xf32> -> vector<8x384xf32>
    %377 = vector.broadcast %4 : vector<1x384xf32> to vector<8x384xf32>
    %378 = arith.addf %376, %377 : vector<8x384xf32>
    %379 = arith.truncf %363 : vector<8x128xf32> to vector<8x128xbf16>
    %c0_111 = arith.constant 0 : index
    %c0_112 = arith.constant 0 : index
    %380 = vector.load %arg5[%c0_111, %c0_112] : memref<128x384xbf16, #tpu.memory_space<vmem>>, vector<128x384xbf16>
    %cst_113 = arith.constant dense<0.000000e+00> : vector<8x384xf32>
    %381 = tpu.matmul %379, %380, %cst_113 {dimension_numbers = #tpu.dot_dimension_numbers<[1], [0], [0], [1], [0, 0, 1, 1], [], []>} : vector<8x128xbf16>, vector<128x384xbf16>, vector<8x384xf32> -> vector<8x384xf32>
    %382 = vector.extract_strided_slice %378 {offsets = [0, 0], sizes = [8, 128], strides = [1, 1]} : vector<8x384xf32> to vector<8x128xf32>
    %383 = vector.extract_strided_slice %381 {offsets = [0, 0], sizes = [8, 128], strides = [1, 1]} : vector<8x384xf32> to vector<8x128xf32>
    %384 = arith.addf %382, %383 : vector<8x128xf32>
    %385 = arith.negf %384 : vector<8x128xf32>
    %386 = math.exp %385 : vector<8x128xf32>
    %cst_114 = arith.constant 1.000000e+00 : f32
    %387 = vector.broadcast %cst_114 : f32 to vector<8x128xf32>
    %388 = arith.addf %387, %386 : vector<8x128xf32>
    %389 = arith.divf %387, %388 : vector<8x128xf32>
    %390 = vector.extract_strided_slice %378 {offsets = [0, 128], sizes = [8, 128], strides = [1, 1]} : vector<8x384xf32> to vector<8x128xf32>
    %391 = vector.extract_strided_slice %381 {offsets = [0, 128], sizes = [8, 128], strides = [1, 1]} : vector<8x384xf32> to vector<8x128xf32>
    %392 = arith.addf %390, %391 : vector<8x128xf32>
    %393 = arith.negf %392 : vector<8x128xf32>
    %394 = math.exp %393 : vector<8x128xf32>
    %cst_115 = arith.constant 1.000000e+00 : f32
    %395 = vector.broadcast %cst_115 : f32 to vector<8x128xf32>
    %396 = arith.addf %395, %394 : vector<8x128xf32>
    %397 = arith.divf %395, %396 : vector<8x128xf32>
    %398 = vector.extract_strided_slice %378 {offsets = [0, 256], sizes = [8, 128], strides = [1, 1]} : vector<8x384xf32> to vector<8x128xf32>
    %399 = vector.extract_strided_slice %381 {offsets = [0, 256], sizes = [8, 128], strides = [1, 1]} : vector<8x384xf32> to vector<8x128xf32>
    %400 = vector.broadcast %5 : vector<1x128xf32> to vector<8x128xf32>
    %401 = arith.addf %399, %400 : vector<8x128xf32>
    %402 = arith.mulf %389, %401 : vector<8x128xf32>
    %403 = arith.addf %398, %402 : vector<8x128xf32>
    %404 = math.tanh %403 : vector<8x128xf32>
    %cst_116 = arith.constant 1.000000e+00 : f32
    %405 = vector.broadcast %cst_116 : f32 to vector<8x128xf32>
    %406 = arith.subf %405, %397 : vector<8x128xf32>
    %407 = arith.mulf %406, %404 : vector<8x128xf32>
    %408 = arith.mulf %397, %363 : vector<8x128xf32>
    %409 = arith.addf %407, %408 : vector<8x128xf32>
    %410 = arith.addi %6, %c7_i32 : i32
    %411 = vector.broadcast %410 : i32 to vector<8x1xi32>
    %412 = arith.cmpi slt, %411, %3 : vector<8x1xi32>
    %413 = vector.shape_cast %412 : vector<8x1xi1> to vector<8x1xi1>
    %414 = vector.broadcast %413 : vector<8x1xi1> to vector<8x128xi1>
    %415 = arith.select %414, %409, %363 : vector<8x128xi1>, vector<8x128xf32>
    %cst_117 = arith.constant 0.000000e+00 : f32
    %416 = vector.shape_cast %412 : vector<8x1xi1> to vector<8x1xi1>
    %417 = vector.broadcast %416 : vector<8x1xi1> to vector<8x128xi1>
    %418 = vector.broadcast %cst_117 : f32 to vector<8x128xf32>
    %419 = arith.select %417, %409, %418 : vector<8x128xi1>, vector<8x128xf32>
    %420 = arith.index_cast %c7_i32 : i32 to index
    %c0_118 = arith.constant 0 : index
    %c0_119 = arith.constant 0 : index
    %421 = vector.load %arg8[%420, %c0_118, %c0_119] : memref<8x8x128xf32, #tpu.memory_space<vmem>>, vector<1x8x128xf32>
    %422 = vector.shape_cast %421 : vector<1x8x128xf32> to vector<8x128xf32>
    %423 = vector.shape_cast %419 : vector<8x128xf32> to vector<1x8x128xf32>
    tpu.vector_store %arg8[%420, %c0_118, %c0_119], %423 {strides = array<i32>} : memref<8x8x128xf32, #tpu.memory_space<vmem>>, vector<1x8x128xf32>,
    %c8_i32_120 = arith.constant 8 : i32
    %c0_121 = arith.constant 0 : index
    %c0_122 = arith.constant 0 : index
    %424 = vector.load %arg10[%c0_121, %c0_122] : memref<8x128xf32, #tpu.memory_space<vmem>>, vector<8x128xf32>
    tpu.vector_store %arg10[%c0_121, %c0_122], %415 {strides = array<i32>} : memref<8x128xf32, #tpu.memory_space<vmem>>, vector<8x128xf32>,
    %c0_i32_123 = arith.constant 0 : i32
    %425 = arith.cmpi eq, %arg1, %c0_i32_123 : i32
    %426 = arith.extui %425 : i1 to i32
    %c0_i32_124 = arith.constant 0 : i32
    %427 = arith.cmpi ne, %426, %c0_i32_124 : i32
    scf.if %427 {
      %c0_125 = arith.constant 0 : index
      %c0_126 = arith.constant 0 : index
      %428 = vector.load %arg9[%c0_125, %c0_126] : memref<8x128xf32, #tpu.memory_space<vmem>>, vector<8x128xf32>
      tpu.vector_store %arg9[%c0_125, %c0_126], %415 {strides = array<i32>} : memref<8x128xf32, #tpu.memory_space<vmem>>, vector<8x128xf32>,
    } else {
    }
    return
  }
  func.func @transform_0(%arg0: i32, %arg1: i32) -> (i32, i32) {
    %c0_i32 = arith.constant 0 : i32
    %c0_i32_0 = arith.constant 0 : i32
    return %arg0, %c0_i32 : i32, i32
  }
  func.func @transform_1(%arg0: i32, %arg1: i32) -> (i32, i32, i32) {
    %c0_i32 = arith.constant 0 : i32
    %c0_i32_0 = arith.constant 0 : i32
    return %arg1, %arg0, %c0_i32 : i32, i32, i32
  }
  func.func @transform_2(%arg0: i32, %arg1: i32) -> (i32, i32) {
    %c0_i32 = arith.constant 0 : i32
    %c0_i32_0 = arith.constant 0 : i32
    %c0_i32_1 = arith.constant 0 : i32
    return %c0_i32, %c0_i32_0 : i32, i32
  }
  func.func @transform_3(%arg0: i32, %arg1: i32) -> (i32, i32) {
    %c0_i32 = arith.constant 0 : i32
    %c0_i32_0 = arith.constant 0 : i32
    %c0_i32_1 = arith.constant 0 : i32
    return %c0_i32, %c0_i32_0 : i32, i32
  }
  func.func @transform_4(%arg0: i32, %arg1: i32) -> (i32, i32) {
    %c0_i32 = arith.constant 0 : i32
    %c0_i32_0 = arith.constant 0 : i32
    %c0_i32_1 = arith.constant 0 : i32
    return %c0_i32, %c0_i32_0 : i32, i32
  }
  func.func @transform_5(%arg0: i32, %arg1: i32) -> (i32, i32) {
    %c0_i32 = arith.constant 0 : i32
    %c0_i32_0 = arith.constant 0 : i32
    %c0_i32_1 = arith.constant 0 : i32
    return %c0_i32, %c0_i32_0 : i32, i32
  }
  func.func @transform_6(%arg0: i32, %arg1: i32) -> (i32, i32, i32) {
    %c0_i32 = arith.constant 0 : i32
    %c0_i32_0 = arith.constant 0 : i32
    return %arg1, %arg0, %c0_i32 : i32, i32, i32
  }
  func.func @transform_7(%arg0: i32, %arg1: i32) -> (i32, i32) {
    %c0_i32 = arith.constant 0 : i32
    %c0_i32_0 = arith.constant 0 : i32
    return %arg0, %c0_i32 : i32, i32
  }
}

</mosaic_0001>

<bundles_post_ra>
// kernel: tpu_custom_call.1
= control target key start
LH: loop header
LB: loop body
LE: loop exit
PB: predicated region body
PF: predicated region fallthrough
CT: control target
= control target key end

     0   :  { %13 = vsyncpa [#allocation4], 0  ;;  %s6375_s0 = inlined_call_operand.vmem [shape: s32[8,1], index: 0, kind: input, shape index: {}]   ;;  %s6376_s1 = inlined_call_operand.hbm [shape: bf16[8,8,128], index: 1, kind: input, shape index: {}]   ;;  %s6377_s2 = inlined_call_operand.hbm [shape: bf16[128,384], index: 2, kind: input, shape index: {}]   ;;  %s6378_s3 = inlined_call_operand.hbm [shape: bf16[128,384], index: 3, kind: input, shape index: {}]   ;;  %s6379_s4 = inlined_call_operand.vmem [shape: f32[1,384], index: 4, kind: input, shape index: {}]   ;;  %s6380_s5 = inlined_call_operand.vmem [shape: f32[1,128], index: 5, kind: input, shape index: {}]   ;;  %s6381_s6 = inlined_call_operand.hbm [shape: f32[8,8,128], index: 6, kind: output, shape index: {0}]   ;;  %s6382_s7 = inlined_call_operand.hbm [shape: f32[8,128], index: 7, kind: output, shape index: {1}]  }
   0x1   :  { %14 = vsyncpa [#allocation7], 0 }
   0x2   :  { %15 = vsyncpa [#allocation5], 0  ;;  %s36_s26 = sshll.u32 %s6377_s2, 4  ;;  %s37_s26 = int_to_ptr.hbm [resolvable:$true] %s36_s26 }
   0x3   :  { %16 = vsyncpa [#allocation11], 0  ;;  %s6003_s27 = smov [#allocation6]   ;;  %s23_s8 = sshll.u32 %s6376_s1, 4  ;;  %s24_s8 = int_to_ptr.hbm [resolvable:$true] %s23_s8 }
   0x4   :  { %s38_s28 = sshll.u32 %s6003_s27, 4  ;;  %s6004_s9 = smov 192   ;;  %s39_s28 = int_to_ptr.vmem [resolvable:$true] %s38_s28 }
   0x5   :  { %s6005_s10 = smov 12   ;;  %s6006_s11 = smov [#allocation3]  }
   0x6   :  { %44 = dma.hbm_to_vmem [thread:$0]  %s37_s26, 3072, %s39_s28, [#allocation7], %s6004_s9, %s6004_s9, %s6005_s10  }
   0x7   :  { %s25_s12 = sshll.u32 %s6006_s11, 4  ;;  %s6007_s13 = smov 64   ;;  %s26_s12 = int_to_ptr.vmem [resolvable:$true] %s25_s12 }
   0x8   :  { %s6008_s14 = smov 4   ;;  %s49_s16 = sshll.u32 %s6378_s3, 4  ;;  %s50_s16 = int_to_ptr.hbm [resolvable:$true] %s49_s16 }
   0x9   :  { %31 = dma.hbm_to_vmem [thread:$0]  %s24_s8, 512, %s26_s12, [#allocation4], %s6007_s13, %s6007_s13, %s6008_s14  }
   0xa   :  { %s6009_s17 = smov [#allocation8]  }
   0xb   :  { %s51_s18 = sshll.u32 %s6009_s17, 4  ;;  %s52_s18 = int_to_ptr.vmem [resolvable:$true] %s51_s18 }
   0xc   :  { %57 = dma.hbm_to_vmem [thread:$0]  %s50_s16, 3072, %s52_s18, [#allocation7], %s6004_s9, %s6004_s9, %s6005_s10  }
   0xd   :  { %5995 = dma.done.wait [#allocation4], 512  }
   0xe   :  { %5996 = vsyncadd [#allocation4], 4294966784 }
   0xf   :  { %5997 = dma.done.wait [#allocation7], 6144  }
  0x10   :  { %5998 = vsyncadd [#allocation7], 4294961152  ;;  %v3906_v0 = vld [vmem:[#allocation6 + $0xa8] sm:$0xf]  ;;  %v5402_v1 = vld [vmem:[#allocation6 + $0xb0] sm:$0xf0] }
  0x11   :  { %v4002_v2 = vld [vmem:[#allocation8 + $0xa8] sm:$0xf]  ;;  %v3907_v3 = vor.u32 %v5402_v1, %v3906_v0  ;;  %v5426_v4 = vld [vmem:[#allocation8 + $0xb0] sm:$0xf0]  ;;  %v3894_v5 = vld [vmem:[#allocation6 + $0x90] sm:$0xf] }
  0x12   :  { %v5399_v6 = vld [vmem:[#allocation6 + $0x98] sm:$0xf0]  ;;  %v4003_v7 = vor.u32 %v5426_v4, %v4002_v2  ;;  %v3990_v8 = vld [vmem:[#allocation8 + $0x90] sm:$0xf]  ;;  %v5401_v10 = vld [vmem:[#allocation6 + $0xac] sm:$0xf] }
  0x13   :  { %v5423_v9 = vld [vmem:[#allocation8 + $0x98] sm:$0xf0]  ;;  %252 = vmatpush.bf16.msra.mxu0 %v3907_v3  ;;  %v3895_v11 = vor.u32 %v5399_v6, %v3894_v5  ;;  %v3908_v12 = vld [vmem:[#allocation6 + $0xb4] sm:$0xf0]  ;;  %v5396_v16 = vld [vmem:[#allocation6 + $0x80] sm:$0xf0] }
  0x14   :  { %452 = vmatpush.bf16.msra.mxu3 %v4003_v7  ;;  %v3991_v13 = vor.u32 %v5423_v9, %v3990_v8  ;;  %v3911_v14 = vor.u32 %v5401_v10, %v3908_v12  ;;  %v3882_v15 = vld [vmem:[#allocation6 + $0x78] sm:$0xf]  ;;  %v5398_v17 = vld [vmem:[#allocation6 + $0x94] sm:$0xf]  ;;  %v5420_v19 = vld [vmem:[#allocation8 + $0x80] sm:$0xf0] }
  0x15   :  { %v3978_v18 = vld [vmem:[#allocation8 + $0x78] sm:$0xf]  ;;  %v3896_v20 = vld [vmem:[#allocation6 + $0x9c] sm:$0xf0]  ;;  %v3883_v22 = vor.u32 %v5396_v16, %v3882_v15  ;;  %v5395_v23 = vld [vmem:[#allocation6 + $0x7c] sm:$0xf] }
  0x16   :  { %265 = vmatpush.bf16.msra.mxu1 %v3911_v14  ;;  %v3899_v21 = vor.u32 %v5398_v17, %v3896_v20  ;;  %v3884_v24 = vld [vmem:[#allocation6 + $0x84] sm:$0xf0]  ;;  %v3979_v25 = vor.u32 %v5420_v19, %v3978_v18  ;;  %v3870_v26 = vld [vmem:[#allocation6 + $0x60] sm:$0xf]  ;;  %v5393_v27 = vld [vmem:[#allocation6 + $0x68] sm:$0xf0] }
  0x17   :  { %253 = vmatpush.bf16.msra.mxu0 %v3895_v11  ;;  %v3966_v28 = vld [vmem:[#allocation8 + $0x60] sm:$0xf]  ;;  %v5417_v29 = vld [vmem:[#allocation8 + $0x68] sm:$0xf0]  ;;  %v3887_v30 = vor.u32 %v5395_v23, %v3884_v24  ;;  %v3871_v31 = vor.u32 %v5393_v27, %v3870_v26  ;;  %v5392_v32 = vld [vmem:[#allocation6 + $0x64] sm:$0xf] }
  0x18   :  { %453 = vmatpush.bf16.msra.mxu3 %v3991_v13  ;;  %v3872_v33 = vld [vmem:[#allocation6 + $0x6c] sm:$0xf0]  ;;  %v3967_v34 = vor.u32 %v5417_v29, %v3966_v28  ;;  %v3858_v35 = vld [vmem:[#allocation6 + $0x48] sm:$0xf]  ;;  %v5390_v36 = vld [vmem:[#allocation6 + $0x50] sm:$0xf0] }
  0x19   :  { %v3954_v37 = vld [vmem:[#allocation8 + $0x48] sm:$0xf]  ;;  %v5414_v38 = vld [vmem:[#allocation8 + $0x50] sm:$0xf0]  ;;  %v3875_v39 = vor.u32 %v5392_v32, %v3872_v33  ;;  %v3859_v40 = vor.u32 %v5390_v36, %v3858_v35  ;;  %v3846_v41 = vld [vmem:[#allocation6 + $0x30] sm:$0xf] }
  0x1a   :  { %266 = vmatpush.bf16.msra.mxu1 %v3899_v21  ;;  %v5389_v42 = vld [vmem:[#allocation6 + $0x4c] sm:$0xf]  ;;  %v3860_v43 = vld [vmem:[#allocation6 + $0x54] sm:$0xf0]  ;;  %v3955_v44 = vor.u32 %v5414_v38, %v3954_v37  ;;  %v5387_v45 = vld [vmem:[#allocation6 + $0x38] sm:$0xf0] }
  0x1b   :  { %254 = vmatpush.bf16.msra.mxu0 %v3883_v22  ;;  %v3914_v46 = vld [vmem:[#allocation6 + $0xb0] sm:$0xf]  ;;  %v5403_v47 = vld [vmem:[#allocation6 + $0xb8] sm:$0xf0]  ;;  %v3863_v51 = vor.u32 %v5389_v42, %v3860_v43  ;;  %v3902_v52 = vld [vmem:[#allocation6 + $0x98] sm:$0xf]  ;;  %v3847_v54 = vor.u32 %v5387_v45, %v3846_v41 }
  0x1c   :  { %454 = vmatpush.bf16.msra.mxu3 %v3979_v25  ;;  %v3942_v48 = vld [vmem:[#allocation8 + $0x30] sm:$0xf]  ;;  %v5411_v49 = vld [vmem:[#allocation8 + $0x38] sm:$0xf0]  ;;  %v3915_v50 = vor.u32 %v5403_v47, %v3914_v46  ;;  %v5400_v53 = vld [vmem:[#allocation6 + $0xa0] sm:$0xf0] }
  0x1d   :  { %v5386_v55 = vld [vmem:[#allocation6 + $0x34] sm:$0xf]  ;;  %v3848_v56 = vld [vmem:[#allocation6 + $0x3c] sm:$0xf0]  ;;  %v3903_v57 = vor.u32 %v5400_v53, %v3902_v52  ;;  %v3943_v58 = vor.u32 %v5411_v49, %v3942_v48  ;;  %v3834_v59 = vld [vmem:[#allocation6 + $0x18] sm:$0xf] }
  0x1e   :  { %267 = vmatpush.bf16.msra.mxu1 %v3887_v30  ;;  %278 = vmatpush.bf16.msra.mxu2 %v3915_v50  ;;  %v5384_v60 = vld [vmem:[#allocation6 + $0x20] sm:$0xf0]  ;;  %v3890_v61 = vld [vmem:[#allocation6 + $0x80] sm:$0xf]  ;;  %v3930_v62 = vld [vmem:[#allocation8 + $0x18] sm:$0xf]  ;;  %v3851_v1 = vor.u32 %v5386_v55, %v3848_v56 }
  0x1f   :  { %255 = vmatpush.bf16.msra.mxu0 %v3871_v31  ;;  %v5408_v63 = vld [vmem:[#allocation8 + $0x20] sm:$0xf0]  ;;  %v5397_v0 = vld [vmem:[#allocation6 + $0x88] sm:$0xf0]  ;;  %v3822_v2 = vld [vmem:[#allocation6] sm:$0xf]  ;;  %v3835_v3 = vor.u32 %v5384_v60, %v3834_v59 }
  0x20   :  { %455 = vmatpush.bf16.msra.mxu3 %v3967_v34  ;;  %v5381_v4 = vld [vmem:[#allocation6 + $0x8] sm:$0xf0]  ;;  %v5383_v5 = vld [vmem:[#allocation6 + $0x1c] sm:$0xf]  ;;  %v3836_v6 = vld [vmem:[#allocation6 + $0x24] sm:$0xf0]  ;;  %v3891_v7 = vor.u32 %v5397_v0, %v3890_v61  ;;  %v3931_v8 = vor.u32 %v5408_v63, %v3930_v62 }
  0x21   :  { %v3918_v9 = vld [vmem:[#allocation8] sm:$0xf]  ;;  %v3878_v10 = vld [vmem:[#allocation6 + $0x68] sm:$0xf]  ;;  %v5394_v11 = vld [vmem:[#allocation6 + $0x70] sm:$0xf0]  ;;  %v3839_v15 = vor.u32 %v5383_v5, %v3836_v6  ;;  %v3823_v16 = vor.u32 %v5381_v4, %v3822_v2 }
  0x22   :  { %268 = vmatpush.bf16.msra.mxu1 %v3875_v39  ;;  %279 = vmatpush.bf16.msra.mxu2 %v3903_v57  ;;  %v5405_v12 = vld [vmem:[#allocation8 + $0x8] sm:$0xf0]  ;;  %v4004_v14 = vld [vmem:[#allocation8 + $0xb4] sm:$0xf0]  ;;  %v5380_v17 = vld [vmem:[#allocation6 + $0x4] sm:$0xf]  ;;  %v3879_v19 = vor.u32 %v5394_v11, %v3878_v10 }
  0x23   :  { %256 = vmatpush.bf16.msra.mxu0 %v3859_v40  ;;  %v5425_v13 = vld [vmem:[#allocation8 + $0xac] sm:$0xf]  ;;  %v3824_v18 = vld [vmem:[#allocation6 + $0xc] sm:$0xf0]  ;;  %v3919_v20 = vor.u32 %v5405_v12, %v3918_v9  ;;  %v5422_v22 = vld [vmem:[#allocation8 + $0x94] sm:$0xf] }
  0x24   :  { %456 = vmatpush.bf16.msra.mxu3 %v3955_v44  ;;  %v4007_v21 = vor.u32 %v5425_v13, %v4004_v14  ;;  %v4010_v23 = vld [vmem:[#allocation8 + $0xb0] sm:$0xf]  ;;  %v5427_v24 = vld [vmem:[#allocation8 + $0xb8] sm:$0xf0]  ;;  %v3992_v25 = vld [vmem:[#allocation8 + $0x9c] sm:$0xf0]  ;;  %v3827_v28 = vor.u32 %v5380_v17, %v3824_v18 }
  0x25   :  { %v3866_v26 = vld [vmem:[#allocation6 + $0x50] sm:$0xf]  ;;  %v5391_v27 = vld [vmem:[#allocation6 + $0x58] sm:$0xf0]  ;;  %v4011_v29 = vor.u32 %v5427_v24, %v4010_v23  ;;  %v6065_v30 = vld [vmem:[#allocation3] sm:$0xf]  ;;  %v3995_v32 = vor.u32 %v5422_v22, %v3992_v25 }
  0x26   :  { %269 = vmatpush.bf16.msra.mxu1 %v3863_v51  ;;  %280 = vmatpush.bf16.msra.mxu2 %v3891_v7  ;;  %v5419_v31 = vld [vmem:[#allocation8 + $0x7c] sm:$0xf]  ;;  %v3998_v33 = vld [vmem:[#allocation8 + $0x98] sm:$0xf]  ;;  %v5424_v34 = vld [vmem:[#allocation8 + $0xa0] sm:$0xf0]  ;;  %v3867_v35 = vor.u32 %v5391_v27, %v3866_v26 }
  0x27   :  { %257 = vmatpush.bf16.msra.mxu0 %v3847_v54  ;;  %v3980_v36 = vld [vmem:[#allocation8 + $0x84] sm:$0xf0]  ;;  %v3854_v37 = vld [vmem:[#allocation6 + $0x38] sm:$0xf]  ;;  %v5388_v38 = vld [vmem:[#allocation6 + $0x40] sm:$0xf0]  ;;  %v3999_v41 = vor.u32 %v5424_v34, %v3998_v33 }
  0x28   :  { %457 = vmatpush.bf16.msra.mxu3 %v3943_v58  ;;  %v79_v39 = vld [vmem:[%s6375_s0] sm:$0xff]  ;;  %v6010_v40 = vmov 0.0|0.0   ;;  %v3983_v43 = vor.u32 %v5419_v31, %v3980_v36  ;;  %v5421_v45 = vld [vmem:[#allocation8 + $0x88] sm:$0xf0]  ;;  %v3855_v46 = vor.u32 %v5388_v38, %v3854_v37  ;;  %v6011_v47 = vmov 0   ;;  %s3790_s11 = sshll.u32 %s6381_s6, 4  ;;  %s3791_s11 = int_to_ptr.hbm [resolvable:$true] %s3790_s11 }
  0x29   :  { %v5416_v42 = vld [vmem:[#allocation8 + $0x64] sm:$0xf]  ;;  %vm4014_vm0 = vcmp.gt.s32.totalorder %v79_v39, 0  ;;  %v3986_v44 = vld [vmem:[#allocation8 + $0x80] sm:$0xf]  ;;  %5786 = vset.pattern.permute.xlu0 %v6011_v47  ;;  %5787 = vset.pattern.permute.xlu1 %v6011_v47  ;;  %vm4209_vm1 = vcmp.gt.s32.totalorder %v79_v39, 1 }
  0x2a   :  { %270 = vmatpush.bf16.msra.mxu1 %v3851_v1  ;;  %281 = vmatpush.bf16.msra.mxu2 %v3879_v19  ;;  %v544_v48 = vsel %vm4014_vm0, 1, %v6011_v47  ;;  %v3968_v49 = vld [vmem:[#allocation8 + $0x6c] sm:$0xf0]  ;;  %v3842_v50 = vld [vmem:[#allocation6 + $0x20] sm:$0xf]  ;;  %v3987_v52 = vor.u32 %v5421_v45, %v3986_v44  ;;  %v1004_v62 = vsel %vm4209_vm1, 1, %v6011_v47 }
  0x2b   :  { %258 = vmatpush.bf16.msra.mxu0 %v3835_v3  ;;  %v5385_v51 = vld [vmem:[#allocation6 + $0x28] sm:$0xf0]  ;;  %546 = vperm.xlu0 %5786, %v544_v48   ;;  %v3971_v54 = vor.u32 %v5416_v42, %v3968_v49  ;;  %v3974_v55 = vld [vmem:[#allocation8 + $0x68] sm:$0xf]  ;;  %v5418_v56 = vld [vmem:[#allocation8 + $0x70] sm:$0xf0] }
  0x2c   :  { %458 = vmatpush.bf16.msra.mxu3 %v3931_v8  ;;  %v5413_v53 = vld [vmem:[#allocation8 + $0x4c] sm:$0xf]  ;;  %5788 = vset.pattern.permute.xlu2 %v6011_v47  ;;  %v3843_v57 = vor.u32 %v5385_v51, %v3842_v50  ;;  %v3956_v58 = vld [vmem:[#allocation8 + $0x54] sm:$0xf0]  ;;  %v3830_v59 = vld [vmem:[#allocation6 + $0x8] sm:$0xf]  ;;  %v3975_v61 = vor.u32 %v5418_v56, %v3974_v55 }
  0x2d   :  { %v5382_v60 = vld [vmem:[#allocation6 + $0x10] sm:$0xf0]  ;;  %v3959_v63 = vor.u32 %v5413_v53, %v3956_v58  ;;  %v3962_v0 = vld [vmem:[#allocation8 + $0x50] sm:$0xf]  ;;  %v5415_v1 = vld [vmem:[#allocation8 + $0x58] sm:$0xf0] }
  0x2e   :  { %271 = vmatpush.bf16.msra.mxu1 %v3839_v15  ;;  %282 = vmatpush.bf16.msra.mxu2 %v3867_v35  ;;  %v3831_v2 = vor.u32 %v5382_v60, %v3830_v59  ;;  %v5410_v3 = vld [vmem:[#allocation8 + $0x34] sm:$0xf]  ;;  %v3944_v4 = vld [vmem:[#allocation8 + $0x3c] sm:$0xf0]  ;;  %v3963_v5 = vor.u32 %v5415_v1, %v3962_v0  ;;  %v3950_v7 = vld [vmem:[#allocation8 + $0x38] sm:$0xf] }
  0x2f   :  { %259 = vmatpush.bf16.msra.mxu0 %v3823_v16  ;;  %v3947_v6 = vor.u32 %v5410_v3, %v3944_v4  ;;  %v5412_v8 = vld [vmem:[#allocation8 + $0x40] sm:$0xf0]  ;;  %vm5184_vm2 = vcmp.gt.s32.totalorder %v79_v39, 6  ;;  %v5407_v9 = vld [vmem:[#allocation8 + $0x1c] sm:$0xf]  ;;  %s6013_s12 = smov [#allocation10]  }
  0x30   :  { %459 = vmatpush.bf16.msra.mxu3 %v3919_v20  ;;  %v3932_v10 = vld [vmem:[#allocation8 + $0x24] sm:$0xf0]  ;;  %v3951_v11 = vor.u32 %v5412_v8, %v3950_v7  ;;  %v3309_v12 = vsel %vm5184_vm2, 1, %v6011_v47  ;;  %v3938_v14 = vld [vmem:[#allocation8 + $0x20] sm:$0xf]  ;;  %s3802_s13 = sshll.u32 %s6013_s12, 4  ;;  %s3803_s13 = int_to_ptr.vmem [resolvable:$true] %s3802_s13 }
  0x31   :  { %v3935_v13 = vor.u32 %v5407_v9, %v3932_v10  ;;  %v5409_v15 = vld [vmem:[#allocation8 + $0x28] sm:$0xf0]  ;;  %v5404_v16 = vld [vmem:[#allocation8 + $0x4] sm:$0xf]  ;;  %v3920_v17 = vld [vmem:[#allocation8 + $0xc] sm:$0xf0] }
  0x32   :  { %272 = vmatpush.bf16.msra.mxu1 %v3827_v28  ;;  %260 = vmatmul.bf16.vlgmr.msra.gmra.mxu0 %v6065_v30  ;;  %v3939_v18 = vor.u32 %v5409_v15, %v3938_v14  ;;  %v3923_v19 = vor.u32 %v5404_v16, %v3920_v17  ;;  %v3926_v20 = vld [vmem:[#allocation8 + $0x8] sm:$0xf]  ;;  %v5450_v24 = vld [vmem:[#allocation6 + $0xb0] sm:$0xf0]  ;;  %v5449_v25 = vld [vmem:[#allocation6 + $0xac] sm:$0xf] }
  0x33   :  { %465 = vmatpush.bf16.msrb.mxu0 %v4007_v21  ;;  %460 = vmatmul.bf16.vlgmr.msra.gmra.mxu3 %v6010_v40  ;;  %v5406_v21 = vld [vmem:[#allocation8 + $0x10] sm:$0xf0]  ;;  %v4101_v23 = vld [vmem:[#allocation6 + $0xa8] sm:$0xf]  ;;  %v4103_v27 = vld [vmem:[#allocation6 + $0xb4] sm:$0xf0] }
  0x34   :  { %283 = vmatpush.bf16.msra.mxu2 %v3855_v46  ;;  %1006 = vperm.xlu0 %5786, %v1004_v62   ;;  %v3927_v22 = vor.u32 %v5406_v21, %v3926_v20  ;;  %v4102_v26 = vor.u32 %v5450_v24, %v4101_v23  ;;  %v4106_v28 = vor.u32 %v5449_v25, %v4103_v27  ;;  %v5446_v31 = vld [vmem:[#allocation6 + $0x94] sm:$0xf]  ;;  %v4091_v33 = vld [vmem:[#allocation6 + $0x9c] sm:$0xf0]  ;;  %v4077_v35 = vld [vmem:[#allocation6 + $0x78] sm:$0xf] }
  0x35   :  { %273 = vmatmul.bf16.vlgmr.msra.gmra.mxu1 %v6065_v30  ;;  %v4094_v34 = vor.u32 %v5446_v31, %v4091_v33  ;;  %v5444_v36 = vld [vmem:[#allocation6 + $0x80] sm:$0xf0]  ;;  %v5443_v37 = vld [vmem:[#allocation6 + $0x7c] sm:$0xf]  ;;  %v4079_v39 = vld [vmem:[#allocation6 + $0x84] sm:$0xf0] }
  0x36   :  { %478 = vmatpush.bf16.msrb.mxu1 %v4011_v29  ;;  %727 = vmatpush.bf16.msrb.mxu3 %v4106_v28  ;;  %v4089_v29 = vld [vmem:[#allocation6 + $0x90] sm:$0xf]  ;;  %v4078_v38 = vor.u32 %v5444_v36, %v4077_v35  ;;  %v5441_v42 = vld [vmem:[#allocation6 + $0x68] sm:$0xf0]  ;;  %v4053_v48 = vld [vmem:[#allocation6 + $0x48] sm:$0xf] }
  0x37   :  { %466 = vmatpush.bf16.msrb.mxu0 %v3995_v32  ;;  %v4067_v45 = vld [vmem:[#allocation6 + $0x6c] sm:$0xf0]  ;;  %v5438_v49 = vld [vmem:[#allocation6 + $0x50] sm:$0xf0]  ;;  %v5437_v51 = vld [vmem:[#allocation6 + $0x4c] sm:$0xf] }
  0x38   :  { %284 = vmatpush.bf16.msra.mxu2 %v3843_v57  ;;  %v4054_v50 = vor.u32 %v5438_v49, %v4053_v48  ;;  %v4041_v53 = vld [vmem:[#allocation6 + $0x30] sm:$0xf]  ;;  %v5435_v55 = vld [vmem:[#allocation6 + $0x38] sm:$0xf0]  ;;  %v5434_v56 = vld [vmem:[#allocation6 + $0x34] sm:$0xf] }
  0x39   :  { %v4043_v57 = vld [vmem:[#allocation6 + $0x3c] sm:$0xf0]  ;;  %v4042_v58 = vor.u32 %v5435_v55, %v4041_v53  ;;  %v5432_v62 = vld [vmem:[#allocation6 + $0x20] sm:$0xf0]  ;;  %v4031_v1 = vld [vmem:[#allocation6 + $0x24] sm:$0xf0] }
  0x3a   :  { %479 = vmatpush.bf16.msrb.mxu1 %v3999_v41  ;;  %728 = vmatpush.bf16.msrb.mxu3 %v4094_v34  ;;  %v4065_v41 = vld [vmem:[#allocation6 + $0x60] sm:$0xf]  ;;  %v4046_v59 = vor.u32 %v5434_v56, %v4043_v57  ;;  %v5428_v9 = vld [vmem:[#allocation6 + $0x4] sm:$0xf]  ;;  %v4019_v10 = vld [vmem:[#allocation6 + $0xc] sm:$0xf0] }
  0x3b   :  { %467 = vmatpush.bf16.msrb.mxu0 %v3983_v43  ;;  %v5440_v43 = vld [vmem:[#allocation6 + $0x64] sm:$0xf]  ;;  %v4066_v44 = vor.u32 %v5441_v42, %v4065_v41  ;;  %v6085_v60 = vld [vmem:[%s6379_s4] sm:$0x7]  ;;  %v5474_v14 = vld [vmem:[#allocation8 + $0xb0] sm:$0xf0] }
  0x3c   :  { %285 = vmatpush.bf16.msra.mxu2 %v3831_v2  ;;  %3311 = vperm.xlu0 %5786, %v3309_v12   ;;  %v4070_v46 = vor.u32 %v5440_v43, %v4067_v45  ;;  %v6088_v2 = vperm.slane %v6085_v60, 0  ;;  %v5473_v15 = vld [vmem:[#allocation8 + $0xac] sm:$0xf]  ;;  %v4199_v17 = vld [vmem:[#allocation8 + $0xb4] sm:$0xf0]  ;;  %s3804_s15 = sshll.u32 %s6382_s7, 4  ;;  %s3805_s15 = int_to_ptr.hbm [resolvable:$true] %s3804_s15 }
  0x3d   :  { %v4202_v20 = vor.u32 %v5473_v15, %v4199_v17  ;;  %v4185_v23 = vld [vmem:[#allocation8 + $0x90] sm:$0xf]  ;;  %v5471_v24 = vld [vmem:[#allocation8 + $0x98] sm:$0xf0]  ;;  %v5470_v25 = vld [vmem:[#allocation8 + $0x94] sm:$0xf] }
  0x3e   :  { %480 = vmatpush.bf16.msrb.mxu1 %v3987_v52  ;;  %v4055_v52 = vld [vmem:[#allocation6 + $0x54] sm:$0xf0]  ;;  %v4186_v28 = vor.u32 %v5471_v24, %v4185_v23  ;;  %v5472_v31 = vld [vmem:[#allocation8 + $0xa0] sm:$0xf0]  ;;  %v4181_v41 = vld [vmem:[#allocation8 + $0x80] sm:$0xf] }
  0x3f   :  { %468 = vmatpush.bf16.msrb.mxu0 %v3971_v54  ;;  %286 = vmatmul.bf16.vlgmr.msra.gmra.mxu2 %v6065_v30  ;;  %v5447_v30 = vld [vmem:[#allocation6 + $0x98] sm:$0xf0]  ;;  %v4058_v54 = vor.u32 %v5437_v51, %v4055_v52  ;;  %v4173_v36 = vld [vmem:[#allocation8 + $0x78] sm:$0xf]  ;;  %v5469_v42 = vld [vmem:[#allocation8 + $0x88] sm:$0xf0] }
  0x40   :  { %714 = vmatpush.bf16.msrb.mxu2 %v4102_v26  ;;  %v4090_v32 = vor.u32 %v5447_v30, %v4089_v29  ;;  %v4187_v29 = vld [vmem:[#allocation8 + $0x9c] sm:$0xf0]  ;;  %v4193_v30 = vld [vmem:[#allocation8 + $0x98] sm:$0xf]  ;;  %v5465_v49 = vld [vmem:[#allocation8 + $0x68] sm:$0xf0] }
  0x41   :  { %v4194_v33 = vor.u32 %v5472_v31, %v4193_v30  ;;  %v4161_v48 = vld [vmem:[#allocation8 + $0x60] sm:$0xf]  ;;  %v5464_v51 = vld [vmem:[#allocation8 + $0x64] sm:$0xf]  ;;  %v4163_v52 = vld [vmem:[#allocation8 + $0x6c] sm:$0xf0] }
  0x42   :  { %481 = vmatpush.bf16.msrb.mxu1 %v3975_v61  ;;  %v4029_v61 = vld [vmem:[#allocation6 + $0x18] sm:$0xf]  ;;  %v4169_v53 = vld [vmem:[#allocation8 + $0x68] sm:$0xf]  ;;  %v5466_v55 = vld [vmem:[#allocation8 + $0x70] sm:$0xf0] }
  0x43   :  { %469 = vmatpush.bf16.msrb.mxu0 %v3959_v63  ;;  %v5431_v63 = vld [vmem:[#allocation6 + $0x1c] sm:$0xf]  ;;  %v4030_v0 = vor.u32 %v5432_v62, %v4029_v61  ;;  %v4170_v57 = vor.u32 %v5466_v55, %v4169_v53  ;;  %v5462_v61 = vld [vmem:[#allocation8 + $0x50] sm:$0xf0]  ;;  %v4109_v17 = vld [vmem:[#allocation6 + $0xb0] sm:$0xf] }
  0x44   :  { %715 = vmatpush.bf16.msrb.mxu2 %v4090_v32  ;;  %v4034_v4 = vor.u32 %v5431_v63, %v4031_v1  ;;  %v4190_v32 = vor.u32 %v5470_v25, %v4187_v29  ;;  %v5461_v63 = vld [vmem:[#allocation8 + $0x4c] sm:$0xf]  ;;  %v4157_v1 = vld [vmem:[#allocation8 + $0x50] sm:$0xf]  ;;  %v4125_v23 = vld [vmem:[#allocation8 + $0x18] sm:$0xf] }
  0x45   :  { %v5456_v24 = vld [vmem:[#allocation8 + $0x20] sm:$0xf0]  ;;  %v5455_v25 = vld [vmem:[#allocation8 + $0x1c] sm:$0xf]  ;;  %v4133_v29 = vld [vmem:[#allocation8 + $0x20] sm:$0xf] }
  0x46   :  { %482 = vmatpush.bf16.msrb.mxu1 %v3963_v5  ;;  %v4017_v5 = vld [vmem:[#allocation6] sm:$0xf]  ;;  %v5457_v30 = vld [vmem:[#allocation8 + $0x28] sm:$0xf0]  ;;  %s6014_s6 = smov 128   ;;  %s6015_s16 = smov 8  }
  0x47   :  { %470 = vmatpush.bf16.msrb.mxu0 %v3947_v6  ;;  %v5429_v6 = vld [vmem:[#allocation6 + $0x8] sm:$0xf0] }
  0x48   :  { %716 = vmatpush.bf16.msrb.mxu2 %v4078_v38  ;;  %v4018_v8 = vor.u32 %v5429_v6, %v4017_v5  ;;  %v5467_v38 = vld [vmem:[#allocation8 + $0x7c] sm:$0xf]  ;;  %v5445_v53 = vld [vmem:[#allocation6 + $0x88] sm:$0xf0] }
  0x4a   :  { %483 = vmatpush.bf16.msrb.mxu1 %v3951_v11  ;;  %v4197_v11 = vld [vmem:[#allocation8 + $0xa8] sm:$0xf] }
  0x4b   :  { %471 = vmatpush.bf16.msrb.mxu0 %v3935_v13  ;;  %v4022_v13 = vor.u32 %v5428_v9, %v4019_v10  ;;  %v4198_v16 = vor.u32 %v5474_v14, %v4197_v11  ;;  %v4137_v9 = vld [vmem:[#allocation8 + $0x30] sm:$0xf]  ;;  %v5459_v10 = vld [vmem:[#allocation8 + $0x38] sm:$0xf0]  ;;  %v4145_v14 = vld [vmem:[#allocation8 + $0x38] sm:$0xf] }
  0x4c   :  { %717 = vmatpush.bf16.msrb.mxu2 %v4066_v44  ;;  %v4182_v44 = vor.u32 %v5469_v42, %v4181_v41  ;;  %v4138_v11 = vor.u32 %v5459_v10, %v4137_v9  ;;  %v5452_v41 = vld [vmem:[#allocation8 + $0x4] sm:$0xf] }
  0x4e   :  { %484 = vmatpush.bf16.msrb.mxu1 %v3939_v18  ;;  %v4205_v18 = vld [vmem:[#allocation8 + $0xb0] sm:$0xf] }
  0x4f   :  { %472 = vmatpush.bf16.msrb.mxu0 %v3923_v19  ;;  %v5475_v19 = vld [vmem:[#allocation8 + $0xb8] sm:$0xf0] }
  0x50   :  { %718 = vmatpush.bf16.msrb.mxu2 %v4054_v50  ;;  %v4206_v21 = vor.u32 %v5475_v19, %v4205_v18  ;;  %v4162_v50 = vor.u32 %v5465_v49, %v4161_v48  ;;  %v5451_v18 = vld [vmem:[#allocation6 + $0xb8] sm:$0xf0]  ;;  %v4121_v48 = vld [vmem:[#allocation8 + $0x8] sm:$0xf] }
  0x52   :  { %473 = vmatmul.bf16.vlgmr.msrb.gmra.mxu0 %v6010_v40  ;;  %485 = vmatpush.bf16.msrb.mxu1 %v3927_v22 }
  0x54   :  { %719 = vmatpush.bf16.msrb.mxu2 %v4042_v58 }
  0x55   :  { %486 = vmatmul.bf16.vlgmr.msrb.gmra.mxu1 %v6010_v40  ;;  %v4082_v40 = vor.u32 %v5443_v37, %v4079_v39  ;;  %v5468_v37 = vld [vmem:[#allocation8 + $0x80] sm:$0xf0] }
  0x56   :  { %914 = vmatpush.bf16.msra.mxu1 %v4198_v16  ;;  %v4174_v39 = vor.u32 %v5468_v37, %v4173_v36  ;;  %v5460_v16 = vld [vmem:[#allocation8 + $0x40] sm:$0xf0] }
  0x57   :  { %729 = vmatpush.bf16.msrb.mxu3 %v4082_v40  ;;  %v4175_v40 = vld [vmem:[#allocation8 + $0x84] sm:$0xf0] }
  0x58   :  { %720 = vmatpush.bf16.msrb.mxu2 %v4030_v0  ;;  %v4178_v43 = vor.u32 %v5467_v38, %v4175_v40  ;;  %v4151_v0 = vld [vmem:[#allocation8 + $0x54] sm:$0xf0]  ;;  %v5453_v40 = vld [vmem:[#allocation8 + $0x8] sm:$0xf0] }
  0x59   :  { %v4154_v5 = vor.u32 %v5461_v63, %v4151_v0  ;;  %v4061_v0 = vld [vmem:[#allocation6 + $0x50] sm:$0xf] }
  0x5a   :  { %915 = vmatpush.bf16.msra.mxu1 %v4186_v28  ;;  %v4127_v28 = vld [vmem:[#allocation8 + $0x24] sm:$0xf0] }
  0x5b   :  { %730 = vmatpush.bf16.msrb.mxu3 %v4070_v46  ;;  %v6093_v46 = vld [vmem:[#allocation3 + $0x4] sm:$0xf] }
  0x5c   :  { %721 = vmatpush.bf16.msrb.mxu2 %v4018_v8 }
  0x5e   :  { %916 = vmatpush.bf16.msra.mxu1 %v4174_v39  ;;  %v4113_v39 = vld [vmem:[#allocation8] sm:$0xf] }
  0x5f   :  { %731 = vmatpush.bf16.msrb.mxu3 %v4058_v54  ;;  %722 = vmatmul.bf16.vlgmr.msrb.gmra.mxu2 %v6093_v46  ;;  %v4166_v54 = vor.u32 %v5464_v51, %v4163_v52  ;;  %v5454_v51 = vld [vmem:[#allocation8 + $0x10] sm:$0xf0]  ;;  %v4085_v52 = vld [vmem:[#allocation6 + $0x80] sm:$0xf] }
  0x60   :  { %927 = vmatpush.bf16.msra.mxu2 %v4202_v20  ;;  %v4146_v20 = vor.u32 %v5460_v16, %v4145_v14  ;;  %v4086_v55 = vor.u32 %v5445_v53, %v4085_v52  ;;  %v4049_v14 = vld [vmem:[#allocation6 + $0x38] sm:$0xf]  ;;  %v6125_v16 = vperm.slane %v6085_v60, 2  ;;  %v5494_v52 = vld [vmem:[#allocation6 + $0x94] sm:$0xf] }
  0x62   :  { %917 = vmatpush.bf16.msra.mxu1 %v4162_v50 }
  0x63   :  { %732 = vmatpush.bf16.msrb.mxu3 %v4046_v59  ;;  %v4149_v59 = vld [vmem:[#allocation8 + $0x48] sm:$0xf] }
  0x64   :  { %928 = vmatpush.bf16.msra.mxu2 %v4190_v32  ;;  %v4150_v62 = vor.u32 %v5462_v61, %v4149_v59  ;;  %v4134_v32 = vor.u32 %v5457_v30, %v4133_v29  ;;  %v4073_v59 = vld [vmem:[#allocation6 + $0x68] sm:$0xf]  ;;  %v5442_v61 = vld [vmem:[#allocation6 + $0x70] sm:$0xf0] }
  0x65   :  { %v4074_v63 = vor.u32 %v5442_v61, %v4073_v59  ;;  %v5491_v59 = vld [vmem:[#allocation6 + $0x7c] sm:$0xf]  ;;  %v4274_v61 = vld [vmem:[#allocation6 + $0x84] sm:$0xf0] }
  0x66   :  { %918 = vmatpush.bf16.msra.mxu1 %v4150_v62 }
  0x67   :  { %733 = vmatpush.bf16.msrb.mxu3 %v4034_v4  ;;  %v6101_v4 = vperm.slane %v6085_v60, 1 }
  0x68   :  { %929 = vmatpush.bf16.msra.mxu2 %v4178_v43 }
  0x6a   :  { %919 = vmatpush.bf16.msra.mxu1 %v4138_v11 }
  0x6b   :  { %734 = vmatpush.bf16.msrb.mxu3 %v4022_v13  ;;  %v4139_v13 = vld [vmem:[#allocation8 + $0x3c] sm:$0xf0] }
  0x6c   :  { %930 = vmatpush.bf16.msra.mxu2 %v4166_v54  ;;  %v4122_v54 = vor.u32 %v5454_v51, %v4121_v48  ;;  %v5495_v51 = vld [vmem:[#allocation6 + $0x98] sm:$0xf0] }
  0x6e   :  { %735 = vmatmul.bf16.vlgmr.msrb.gmra.mxu3 %v6093_v46 }
  0x6f   :  { %940 = vmatpush.bf16.msra.mxu3 %v4206_v21  ;;  %v4110_v21 = vor.u32 %v5451_v18, %v4109_v17 }
  0x70   :  { %931 = vmatpush.bf16.msra.mxu2 %v4154_v5  ;;  %v6120_v5 = vld [vmem:[%s6380_s5] ss:$0 sm:$0xff] }
  0x71   :  { %740 = vmatpush.bf16.msra.mxu0 %v4110_v21 }
  0x73   :  { %941 = vmatpush.bf16.msra.mxu3 %v4194_v33  ;;  %v4097_v33 = vld [vmem:[#allocation6 + $0x98] sm:$0xf] }
  0x77   :  { %942 = vmatpush.bf16.msra.mxu3 %v4182_v44  ;;  %v4114_v44 = vor.u32 %v5453_v40, %v4113_v39 }
  0x7b   :  { %943 = vmatpush.bf16.msra.mxu3 %v4170_v57 }
  0xaf   :  { %v261_v3 = vpop.f32.mrf.mxu0 }
  0xb0   :  { %v262_v12 = vadd.f32 %v261_v3, %v6088_v2  ;;  %v5463_v3 = vld [vmem:[#allocation8 + $0x58] sm:$0xf0] }
  0xb1   :  { %v4158_v6 = vor.u32 %v5463_v3, %v4157_v1  ;;  %v5439_v1 = vld [vmem:[#allocation6 + $0x58] sm:$0xf0] }
  0xb2   :  { %v6090_v7 = vpop.f32.mrf.mxu1 }
  0xb3   :  { %944 = vmatpush.bf16.msra.mxu3 %v4158_v6  ;;  %v275_v19 = vadd.f32 %v6090_v7, %v6101_v4  ;;  %v4130_v7 = vor.u32 %v5455_v25, %v4127_v28 }
  0xb6   :  { %v461_v22 = vpop.f32.mrf.mxu3 }
  0xb7   :  { %v491_v26 = vadd.f32 %v461_v22, %v262_v12  ;;  %v263_v27 = vpop.f32.mrf.mxu0  ;;  %v5458_v12 = vld [vmem:[#allocation8 + $0x34] sm:$0xf]  ;;  %945 = vmatpush.bf16.msra.mxu3 %v4146_v20  ;;  %v5433_v20 = vld [vmem:[#allocation6 + $0x28] sm:$0xf0] }
  0xb8   :  { %v4142_v15 = vor.u32 %v5458_v12, %v4139_v13  ;;  %v4126_v27 = vor.u32 %v5456_v24, %v4125_v23  ;;  %v4062_v12 = vor.u32 %v5439_v1, %v4061_v0 }
  0xb9   :  { %v4012_v34 = vmul.f32 -1.442695, %v491_v26 }
  0xba   :  { %v276_v35 = vpop.f32.mrf.mxu1  ;;  %932 = vmatpush.bf16.msra.mxu2 %v4142_v15  ;;  %920 = vmatpush.bf16.msra.mxu1 %v4126_v27  ;;  %v5436_v15 = vld [vmem:[#allocation6 + $0x40] sm:$0xf0]  ;;  %v5430_v27 = vld [vmem:[#allocation6 + $0x10] sm:$0xf0] }
  0xbb   :  { %5790 = vpow2.f32 %v4012_v34  ;;  %v5448_v34 = vld [vmem:[#allocation6 + $0xa0] sm:$0xf0]  ;;  %946 = vmatpush.bf16.msra.mxu3 %v4134_v32  ;;  %v4050_v18 = vor.u32 %v5436_v15, %v4049_v14  ;;  %v4248_v15 = vld [vmem:[#allocation6 + $0x48] sm:$0xf] }
  0xbc   :  { %v4098_v37 = vor.u32 %v5448_v34, %v4097_v33 }
  0xbe   :  { %v463_v45 = vpop.f32.mrf.mxu3  ;;  %933 = vmatpush.bf16.msra.mxu2 %v4130_v7  ;;  %741 = vmatpush.bf16.msra.mxu0 %v4098_v37  ;;  %v547_v37 = vpop.permute.xlu0 %546 }
  0xbf   :  { %v4115_v45 = vld [vmem:[#allocation8 + $0xc] sm:$0xf0]  ;;  %921 = vmatpush.bf16.msra.mxu1 %v4114_v44  ;;  %947 = vmatpush.bf16.msra.mxu3 %v4122_v54  ;;  %vm548_vm11 = vcmp.eq.s32.totalorder %v547_v37, 1  ;;  %v5498_v44 = vld [vmem:[#allocation6 + $0xb0] sm:$0xf0] }
  0xc0   :  { %v4118_v50 = vor.u32 %v5452_v41, %v4115_v45  ;;  %vm5764_vm12 = vmpackc.low %vm548_vm11, %vm548_vm11  ;;  %v5497_v45 = vld [vmem:[#allocation6 + $0xac] sm:$0xf]  ;;  %v4286_v54 = vld [vmem:[#allocation6 + $0x9c] sm:$0xf0] }
  0xc1   :  { %v5791_v56 = vpop.eup %5790 }
  0xc2   :  { %v6097_v58 = vadd.f32 1.0, %v5791_v56  ;;  %v6103_v8 = vpop.f32.mrf.mxu2  ;;  %934 = vmatpush.bf16.msra.mxu2 %v4118_v50  ;;  %742 = vmatpush.bf16.msra.mxu0 %v4086_v55  ;;  %v4284_v50 = vld [vmem:[#allocation6 + $0x90] sm:$0xf]  ;;  %v4272_v55 = vld [vmem:[#allocation6 + $0x78] sm:$0xf] }
  0xc3   :  { %v4285_v53 = vor.u32 %v5495_v51, %v4284_v50  ;;  %v4382_v51 = vld [vmem:[#allocation8 + $0x9c] sm:$0xf0] }
  0xc4   :  { %5792 = vrcp.f32 %v6097_v58  ;;  %vm501_vm3 = vweird.f32 %v6097_v58  ;;  %v507_v62 = vand.u32 2147483648, %v6097_v58  ;;  %v505_v3 = vand.u32 2147483647, %v6097_v58 }
  0xc6   :  { %743 = vmatpush.bf16.msra.mxu0 %v4074_v63  ;;  %v508_v13 = vor.u32 1.1754944e-38, %v507_v62  ;;  %vm506_vm6 = vcmp.eq.f32.partialorder %v505_v3, 8.507059e+37  ;;  %v4277_v63 = vor.u32 %v5491_v59, %v4274_v61  ;;  %v5516_v59 = vld [vmem:[#allocation8 + $0x80] sm:$0xf0]  ;;  %v5515_v61 = vld [vmem:[#allocation8 + $0x7c] sm:$0xf] }
  0xca   :  { %v6107_v22 = vpop.eup %5792  ;;  %v289_v38 = vpop.f32.mrf.mxu2  ;;  %744 = vmatpush.bf16.msra.mxu0 %v4062_v12 }
  0xcb   :  { %v497_v26 = vmul.f32 %v6107_v22, %v6097_v58  ;;  %vm502_vm4 = vweird.f32 %v6107_v22 }
  0xcc   :  { %vm503_vm5 = vmor %vm501_vm3, %vm502_vm4 }
  0xcd   :  { %v498_v36 = vsub.f32 1.0, %v497_v26  ;;  %v4025_v26 = vld [vmem:[#allocation6 + $0x8] sm:$0xf] }
  0xce   :  { %745 = vmatpush.bf16.msra.mxu0 %v4050_v18  ;;  %v4026_v60 = vor.u32 %v5430_v27, %v4025_v26  ;;  %v4224_v27 = vld [vmem:[#allocation6 + $0x18] sm:$0xf] }
  0xcf   :  { %v474_v31 = vpop.f32.mrf.mxu0  ;;  %v499_v49 = vmul.f32 %v6107_v22, %v498_v36 }
  0xd0   :  { %v511_v35 = vadd.f32 %v474_v31, %v275_v19  ;;  %v4037_v19 = vld [vmem:[#allocation6 + $0x20] sm:$0xf] }
  0xd1   :  { %v500_v56 = vadd.f32 %v6107_v22, %v499_v49  ;;  %v4038_v24 = vor.u32 %v5433_v20, %v4037_v19  ;;  %v4250_v19 = vld [vmem:[#allocation6 + $0x54] sm:$0xf0] }
  0xd2   :  { %v4013_v42 = vmul.f32 -1.442695, %v511_v35  ;;  %v487_v43 = vpop.f32.mrf.mxu1 }
  0xd3   :  { %v504_v11 = vsel %vm503_vm5, %v6107_v22, %v500_v56  ;;  %v534_v58 = vadd.f32 %v6120_v5, %v487_v43  ;;  %v288_v22 = vadd.f32 %v6103_v8, %v6125_v16  ;;  %746 = vmatpush.bf16.msra.mxu0 %v4038_v24  ;;  %v4296_v43 = vld [vmem:[#allocation6 + $0xa8] sm:$0xf]  ;;  %v5492_v56 = vld [vmem:[#allocation6 + $0x80] sm:$0xf0] }
  0xd4   :  { %5794 = vpow2.f32 %v4013_v42  ;;  %v509_v17 = vsel %vm506_vm6, %v508_v13, %v504_v11  ;;  %v4297_v48 = vor.u32 %v5498_v44, %v4296_v43  ;;  %v4273_v62 = vor.u32 %v5492_v56, %v4272_v55  ;;  %v5488_v11 = vld [vmem:[#allocation6 + $0x64] sm:$0xf]  ;;  %v4262_v13 = vld [vmem:[#allocation6 + $0x6c] sm:$0xf0]  ;;  %v5523_v44 = vld [vmem:[#allocation8 + $0xb8] sm:$0xf0] }
  0xd5   :  { %v535_v21 = vmul.f32 %v534_v58, %v509_v17  ;;  %v4265_v14 = vor.u32 %v5488_v11, %v4262_v13  ;;  %v5486_v58 = vld [vmem:[#allocation6 + $0x50] sm:$0xf0]  ;;  %v5485_v17 = vld [vmem:[#allocation6 + $0x4c] sm:$0xf]  ;;  %v4356_v11 = vld [vmem:[#allocation8 + $0x60] sm:$0xf] }
  0xd6   :  { %v4249_v18 = vor.u32 %v5486_v58, %v4248_v15  ;;  %v4253_v20 = vor.u32 %v5485_v17, %v4250_v19  ;;  %v5512_v13 = vld [vmem:[#allocation8 + $0x64] sm:$0xf]  ;;  %v4358_v15 = vld [vmem:[#allocation8 + $0x6c] sm:$0xf0]  ;;  %v4364_v58 = vld [vmem:[#allocation8 + $0x68] sm:$0xf] }
  0xd7   :  { %v476_v57 = vpop.f32.mrf.mxu0  ;;  %v536_v28 = vadd.f32 %v535_v21, %v288_v22  ;;  %747 = vmatpush.bf16.msra.mxu0 %v4026_v60  ;;  %v4236_v21 = vld [vmem:[#allocation6 + $0x30] sm:$0xf]  ;;  %v5483_v22 = vld [vmem:[#allocation6 + $0x38] sm:$0xf0]  ;;  %v4226_v60 = vld [vmem:[#allocation6 + $0x24] sm:$0xf0] }
  0xd8   :  { %v4289_v57 = vor.u32 %v5494_v52, %v4286_v54  ;;  %v4237_v24 = vor.u32 %v5483_v22, %v4236_v21  ;;  %v4388_v52 = vld [vmem:[#allocation8 + $0x98] sm:$0xf]  ;;  %v5514_v17 = vld [vmem:[#allocation8 + $0x70] sm:$0xf0] }
  0xd9   :  { %v4365_v19 = vor.u32 %v5514_v17, %v4364_v58  ;;  %v5502_v17 = vld [vmem:[#allocation8 + $0x10] sm:$0xf0] }
  0xda   :  { %v5795_v6 = vpop.eup %5794  ;;  %v489_v9 = vpop.f32.mrf.mxu1  ;;  %748 = vmatmul.bf16.vlgmr.msra.gmra.mxu0 %v6093_v46  ;;  %v4298_v46 = vld [vmem:[#allocation6 + $0xb4] sm:$0xf0] }
  0xdb   :  { %v515_v10 = vadd.f32 1.0, %v5795_v6  ;;  %v4301_v49 = vor.u32 %v5497_v45, %v4298_v46  ;;  %1175 = vmatpush.bf16.msrb.mxu0 %v4297_v48  ;;  %v4260_v9 = vld [vmem:[#allocation6 + $0x60] sm:$0xf]  ;;  %v4380_v48 = vld [vmem:[#allocation8 + $0x90] sm:$0xf] }
  0xdc   :  { %v5519_v46 = vld [vmem:[#allocation8 + $0x98] sm:$0xf0] }
  0xdd   :  { %5796 = vrcp.f32 %v515_v10  ;;  %v527_v30 = vand.u32 2147483648, %v515_v10  ;;  %v525_v7 = vand.u32 2147483647, %v515_v10  ;;  %vm521_vm8 = vweird.f32 %v515_v10  ;;  %1188 = vmatpush.bf16.msrb.mxu1 %v4301_v49  ;;  %v5518_v49 = vld [vmem:[#allocation8 + $0x94] sm:$0xf] }
  0xde   :  { %5798 = vtanh.f32 %v536_v28  ;;  %v5480_v28 = vld [vmem:[#allocation6 + $0x20] sm:$0xf0]  ;;  %v4381_v50 = vor.u32 %v5519_v46, %v4380_v48  ;;  %v4385_v54 = vor.u32 %v5518_v49, %v4382_v51  ;;  %v4320_v49 = vld [vmem:[#allocation8 + $0x18] sm:$0xf]  ;;  %v5503_v51 = vld [vmem:[#allocation8 + $0x1c] sm:$0xf] }
  0xdf   :  { %v528_v33 = vor.u32 1.1754944e-38, %v527_v30  ;;  %vm526_vm10 = vcmp.eq.f32.partialorder %v525_v7, 8.507059e+37  ;;  %1176 = vmatpush.bf16.msrb.mxu0 %v4285_v53  ;;  %v4225_v30 = vor.u32 %v5480_v28, %v4224_v27  ;;  %v4212_v7 = vld [vmem:[#allocation6] sm:$0xf]  ;;  %v5520_v53 = vld [vmem:[#allocation8 + $0xa0] sm:$0xf0] }
  0xe0   :  { %v4389_v55 = vor.u32 %v5520_v53, %v4388_v52  ;;  %v6141_v27 = vld [vmem:[#allocation3 + $0x8] sm:$0xf] }
  0xe1   :  { %1189 = vmatpush.bf16.msrb.mxu1 %v4289_v57  ;;  %v4368_v57 = vld [vmem:[#allocation8 + $0x78] sm:$0xf] }
  0xe2   :  { %v6133_v0 = vpop.f32.mrf.mxu2 }
  0xe3   :  { %v5797_v23 = vpop.eup %5796  ;;  %1177 = vmatpush.bf16.msrb.mxu0 %v4273_v62  ;;  %v4369_v62 = vor.u32 %v5516_v59, %v4368_v57  ;;  %v5505_v59 = vld [vmem:[#allocation8 + $0x28] sm:$0xf0] }
  0xe4   :  { %v517_v25 = vmul.f32 %v5797_v23, %v515_v10  ;;  %vm522_vm7 = vweird.f32 %v5797_v23  ;;  %v5799_v36 = vpop.eup %5798  ;;  %v5489_v10 = vld [vmem:[#allocation6 + $0x68] sm:$0xf0] }
  0xe5   :  { %vm523_vm9 = vmor %vm521_vm8, %vm522_vm7  ;;  %1190 = vmatpush.bf16.msrb.mxu1 %v4277_v63  ;;  %v4261_v12 = vor.u32 %v5489_v10, %v4260_v9  ;;  %v4370_v63 = vld [vmem:[#allocation8 + $0x84] sm:$0xf0] }
  0xe6   :  { %v518_v29 = vsub.f32 1.0, %v517_v25  ;;  %v4238_v25 = vld [vmem:[#allocation6 + $0x3c] sm:$0xf0]  ;;  %v4373_v9 = vor.u32 %v5515_v61, %v4370_v63  ;;  %v4292_v61 = vld [vmem:[#allocation6 + $0x98] sm:$0xf] }
  0xe7   :  { %1178 = vmatpush.bf16.msrb.mxu0 %v4261_v12  ;;  %v5513_v12 = vld [vmem:[#allocation8 + $0x68] sm:$0xf0] }
  0xe8   :  { %v519_v31 = vmul.f32 %v5797_v23, %v518_v29  ;;  %v5479_v29 = vld [vmem:[#allocation6 + $0x1c] sm:$0xf] }
  0xe9   :  { %1191 = vmatpush.bf16.msrb.mxu1 %v4265_v14  ;;  %v4357_v14 = vor.u32 %v5513_v12, %v4356_v11  ;;  %v5501_v11 = vld [vmem:[#allocation8 + $0x8] sm:$0xf0] }
  0xea   :  { %v520_v32 = vadd.f32 %v5797_v23, %v519_v31  ;;  %v725_v3 = vpop.f32.mrf.mxu2  ;;  %v4229_v31 = vor.u32 %v5479_v29, %v4226_v60  ;;  %v4346_v29 = vld [vmem:[#allocation8 + $0x54] sm:$0xf0] }
  0xeb   :  { %1179 = vmatpush.bf16.msrb.mxu0 %v4249_v18  ;;  %v4376_v3 = vld [vmem:[#allocation8 + $0x80] sm:$0xf]  ;;  %v4361_v18 = vor.u32 %v5512_v13, %v4358_v15  ;;  %v5500_v13 = vld [vmem:[#allocation8 + $0x4] sm:$0xf]  ;;  %v4316_v15 = vld [vmem:[#allocation8 + $0x8] sm:$0xf] }
  0xec   :  { %v524_v8 = vsel %vm523_vm9, %v5797_v23, %v520_v32  ;;  %v5482_v23 = vld [vmem:[#allocation6 + $0x34] sm:$0xf]  ;;  %v5477_v32 = vld [vmem:[#allocation6 + $0x8] sm:$0xf0] }
  0xed   :  { %v529_v34 = vsel %vm526_vm10, %v528_v33, %v524_v8  ;;  %1192 = vmatpush.bf16.msrb.mxu1 %v4253_v20  ;;  %v4241_v26 = vor.u32 %v5482_v23, %v4238_v25  ;;  %v5476_v33 = vld [vmem:[#allocation6 + $0x4] sm:$0xf]  ;;  %v4213_v8 = vor.u32 %v5477_v32, %v4212_v7  ;;  %v724_v20 = vadd.f32 %v6133_v0, %v6088_v2  ;;  %v4344_v23 = vld [vmem:[#allocation8 + $0x48] sm:$0xf]  ;;  %v5509_v25 = vld [vmem:[#allocation8 + $0x4c] sm:$0xf] }
  0xee   :  { %v538_v35 = vsub.f32 1.0, %v529_v34  ;;  %v540_v39 = vmul.f32 0.0, %v529_v34  ;;  %v4214_v34 = vld [vmem:[#allocation6 + $0xc] sm:$0xf0]  ;;  %v4349_v60 = vor.u32 %v5509_v25, %v4346_v29  ;;  %v5511_v0 = vld [vmem:[#allocation8 + $0x58] sm:$0xf0] }
  0xef   :  { %1180 = vmatpush.bf16.msrb.mxu0 %v4237_v24  ;;  %v4217_v37 = vor.u32 %v5476_v33, %v4214_v34  ;;  %v5510_v24 = vld [vmem:[#allocation8 + $0x50] sm:$0xf0]  ;;  %v4332_v33 = vld [vmem:[#allocation8 + $0x30] sm:$0xf] }
  0xf0   :  { %v539_v38 = vmul.f32 %v5799_v36, %v538_v35  ;;  %v4392_v35 = vld [vmem:[#allocation8 + $0xa8] sm:$0xf]  ;;  %v5522_v36 = vld [vmem:[#allocation8 + $0xb0] sm:$0xf0]  ;;  %v4345_v28 = vor.u32 %v5510_v24, %v4344_v23 }
  0xf1   :  { %v6135_v1 = vpop.f32.mrf.mxu3  ;;  %1193 = vmatpush.bf16.msrb.mxu1 %v4241_v26  ;;  %v5506_v34 = vld [vmem:[#allocation8 + $0x34] sm:$0xf] }
  0xf2   :  { %v541_v40 = vadd.f32 %v540_v39, %v539_v38  ;;  %v4393_v38 = vor.u32 %v5522_v36, %v4392_v35  ;;  %v5521_v39 = vld [vmem:[#allocation8 + $0xac] sm:$0xf]  ;;  %v4334_v36 = vld [vmem:[#allocation8 + $0x3c] sm:$0xf0] }
  0xf3   :  { %1181 = vmatpush.bf16.msrb.mxu0 %v4225_v30  ;;  %v4352_v30 = vld [vmem:[#allocation8 + $0x50] sm:$0xf] }
  0xf4   :  { %v5765_v41 = vpack.c.bf16 %v541_v40, %v541_v40  ;;  %v6130_v42 = vsel %vm548_vm11, %v541_v40, 0.0  ;;  %v4394_v40 = vld [vmem:[#allocation8 + $0xb4] sm:$0xf0]  ;;  %1375 = vmatpush.bf16.msrb.mxu3 %v4393_v38  ;;  %v4353_v32 = vor.u32 %v5511_v0, %v4352_v30  ;;  %v5508_v38 = vld [vmem:[#allocation8 + $0x40] sm:$0xf0] }
  0xf5   :  { %551 = vst [vmem:[#allocation9] sm:$0xff] %v6130_v42  ;;  %1194 = vmatpush.bf16.msrb.mxu1 %v4229_v31  ;;  %v4397_v43 = vor.u32 %v5521_v39, %v4394_v40  ;;  %v737_v31 = vadd.f32 %v6135_v1, %v6101_v4  ;;  %v4337_v40 = vor.u32 %v5506_v34, %v4334_v36  ;;  %v4256_v30 = vld [vmem:[#allocation6 + $0x50] sm:$0xf]  ;;  %v5870_v0 = vld [vmem:[%s6375_s0] sm:$0xff]  ;;  %v4244_v34 = vld [vmem:[#allocation6 + $0x38] sm:$0xf] }
  0xf6   :  { %5766 = vmatmul.msk.bf16.vlgmr.msra.gmra.mxu1 %vm5764_vm12, %v5765_v41  ;;  %5769 = vmatmul.msk.bf16.vlgmr.msra.gmra.mxu2 %vm5764_vm12, %v5765_v41  ;;  %vm4404_vm13 = vcmp.gt.s32.totalorder %v5870_v0, 2  ;;  %vm4599_vm15 = vcmp.gt.s32.totalorder %v5870_v0, 3  ;;  %vm5379_vm5 = vcmp.gt.s32.totalorder %v5870_v0, 7 }
  0xf7   :  { %5772 = vmatmul.msk.bf16.vlgmr.msra.gmra.mxu3 %vm5764_vm12, %v5765_v41  ;;  %v4400_v41 = vld [vmem:[#allocation8 + $0xb0] sm:$0xf]  ;;  %1182 = vmatpush.bf16.msrb.mxu0 %v4213_v8  ;;  %v5507_v8 = vld [vmem:[#allocation8 + $0x38] sm:$0xf0] }
  0xf8   :  { %v4401_v45 = vor.u32 %v5523_v44, %v4400_v41  ;;  %1376 = vmatpush.bf16.msrb.mxu3 %v4381_v50  ;;  %v4333_v35 = vor.u32 %v5507_v8, %v4332_v33  ;;  %v5499_v44 = vld [vmem:[#allocation6 + $0xb8] sm:$0xf0]  ;;  %v5504_v50 = vld [vmem:[#allocation8 + $0x20] sm:$0xf0]  ;;  %v1465_v33 = vsel %vm4404_vm13, 1, %v6011_v47 }
  0xf9   :  { %v738_v6 = vpop.f32.mrf.mxu3  ;;  %1195 = vmatpush.bf16.msrb.mxu1 %v4217_v37  ;;  %v4340_v37 = vld [vmem:[#allocation8 + $0x38] sm:$0xf]  ;;  %v4321_v53 = vor.u32 %v5504_v50, %v4320_v49  ;;  %1467 = vperm.xlu1 %5787, %v1465_v33   ;;  %v1926_v49 = vsel %vm4599_vm15, 1, %v6011_v47  ;;  %v5540_v33 = vld [vmem:[#allocation6 + $0x80] sm:$0xf0] }
  0xfa   :  { %v5517_v6 = vld [vmem:[#allocation8 + $0x88] sm:$0xf0]  ;;  %1183 = vmatmul.bf16.vlgmr.msrb.gmra.mxu0 %v6141_v27  ;;  %v4341_v41 = vor.u32 %v5508_v38, %v4340_v37 }
  0xfb   :  { %1388 = vmatpush.bf16.msra.mxu0 %v4397_v43  ;;  %v4377_v10 = vor.u32 %v5517_v6, %v4376_v3  ;;  %v4304_v43 = vld [vmem:[#allocation6 + $0xb0] sm:$0xf] }
  0xfc   :  { %1377 = vmatpush.bf16.msrb.mxu3 %v4369_v62  ;;  %v4305_v48 = vor.u32 %v5499_v44, %v4304_v43  ;;  %v5496_v62 = vld [vmem:[#allocation6 + $0xa0] sm:$0xf0]  ;;  %v4232_v44 = vld [vmem:[#allocation6 + $0x20] sm:$0xf] }
  0xfd   :  { %1401 = vmatpush.bf16.msra.mxu1 %v4401_v45  ;;  %v4293_v6 = vor.u32 %v5496_v62, %v4292_v61  ;;  %v4220_v61 = vld [vmem:[#allocation6 + $0x8] sm:$0xf]  ;;  %v5478_v62 = vld [vmem:[#allocation6 + $0x10] sm:$0xf0] }
  0xfe   :  { %1201 = vmatpush.bf16.msrb.mxu2 %v4305_v48 }
  0xff   :  { %1389 = vmatpush.bf16.msra.mxu0 %v4385_v54  ;;  %v4322_v54 = vld [vmem:[#allocation8 + $0x24] sm:$0xf0] }
 0x100   :  { %1378 = vmatpush.bf16.msrb.mxu3 %v4357_v14  ;;  %v4325_v57 = vor.u32 %v5503_v51, %v4322_v54  ;;  %v4310_v14 = vld [vmem:[#allocation8 + $0xc] sm:$0xf0] }
 0x101   :  { %1402 = vmatpush.bf16.msra.mxu1 %v4389_v55  ;;  %v4328_v55 = vld [vmem:[#allocation8 + $0x20] sm:$0xf]  ;;  %1928 = vperm.xlu1 %5787, %v1926_v49   ;;  %v4445_v49 = vld [vmem:[#allocation6 + $0x54] sm:$0xf0] }
 0x102   :  { %v4329_v3 = vor.u32 %v5505_v59, %v4328_v55  ;;  %1202 = vmatpush.bf16.msrb.mxu2 %v4293_v6  ;;  %v4221_v6 = vor.u32 %v5478_v62, %v4220_v61  ;;  %v5528_v61 = vld [vmem:[#allocation6 + $0x20] sm:$0xf0]  ;;  %v5527_v62 = vld [vmem:[#allocation6 + $0x1c] sm:$0xf] }
 0x103   :  { %1390 = vmatpush.bf16.msra.mxu0 %v4373_v9 }
 0x104   :  { %1379 = vmatpush.bf16.msrb.mxu3 %v4345_v28  ;;  %v5490_v28 = vld [vmem:[#allocation6 + $0x70] sm:$0xf0] }
 0x105   :  { %1403 = vmatpush.bf16.msra.mxu1 %v4377_v10  ;;  %v4308_v10 = vld [vmem:[#allocation8] sm:$0xf] }
 0x106   :  { %1196 = vmatmul.bf16.vlgmr.msrb.gmra.mxu1 %v6141_v27  ;;  %v4309_v12 = vor.u32 %v5501_v11, %v4308_v10 }
 0x107   :  { %1391 = vmatpush.bf16.msra.mxu0 %v4361_v18 }
 0x108   :  { %1380 = vmatpush.bf16.msrb.mxu3 %v4333_v35  ;;  %v5484_v35 = vld [vmem:[#allocation6 + $0x40] sm:$0xf0] }
 0x109   :  { %1404 = vmatpush.bf16.msra.mxu1 %v4365_v19  ;;  %v4313_v19 = vor.u32 %v5500_v13, %v4310_v14 }
 0x10b   :  { %1392 = vmatpush.bf16.msra.mxu0 %v4349_v60  ;;  %v5487_v60 = vld [vmem:[#allocation6 + $0x58] sm:$0xf0] }
 0x10c   :  { %1381 = vmatpush.bf16.msrb.mxu3 %v4321_v53 }
 0x10d   :  { %1405 = vmatpush.bf16.msra.mxu1 %v4353_v32  ;;  %v4257_v32 = vor.u32 %v5487_v60, %v4256_v30 }
 0x10f   :  { %1393 = vmatpush.bf16.msra.mxu0 %v4337_v40  ;;  %v4245_v40 = vor.u32 %v5484_v35, %v4244_v34  ;;  %v4469_v35 = vld [vmem:[#allocation6 + $0x84] sm:$0xf0] }
 0x110   :  { %1382 = vmatpush.bf16.msrb.mxu3 %v4309_v12 }
 0x111   :  { %1406 = vmatpush.bf16.msra.mxu1 %v4341_v41 }
 0x113   :  { %1394 = vmatpush.bf16.msra.mxu0 %v4325_v57 }
 0x115   :  { %1407 = vmatpush.bf16.msra.mxu1 %v4329_v3 }
 0x117   :  { %1395 = vmatpush.bf16.msra.mxu0 %v4313_v19 }
 0x157   :  { %v6137_v56 = vpop.f32.mrf.mxu0 }
 0x15f   :  { %v751_v22 = vpop.f32.mrf.mxu0 }
 0x160   :  { %v5493_v22 = vld [vmem:[#allocation6 + $0x88] sm:$0xf0] }
 0x173   :  { %v923_v21 = vpop.f32.mrf.mxu1 }
 0x174   :  { %v953_v26 = vadd.f32 %v923_v21, %v724_v20  ;;  %v4317_v20 = vor.u32 %v5502_v17, %v4316_v15  ;;  %v4280_v21 = vld [vmem:[#allocation6 + $0x80] sm:$0xf]  ;;  %v1007_v15 = vpop.permute.xlu0 %1006 }
 0x175   :  { %v4281_v23 = vor.u32 %v5493_v22, %v4280_v21  ;;  %vm1008_vm8 = vcmp.eq.s32.totalorder %v1007_v15, 1  ;;  %v5546_v21 = vld [vmem:[#allocation6 + $0xb0] sm:$0xf0]  ;;  %v5569_v15 = vld [vmem:[#allocation8 + $0xac] sm:$0xf] }
 0x176   :  { %v4207_v7 = vmul.f32 -1.442695, %v953_v26  ;;  %1408 = vmatpush.bf16.msra.mxu1 %v4317_v20  ;;  %v4268_v26 = vld [vmem:[#allocation6 + $0x68] sm:$0xf] }
 0x177   :  { %1203 = vmatpush.bf16.msrb.mxu2 %v4281_v23  ;;  %v4269_v29 = vor.u32 %v5490_v28, %v4268_v26  ;;  %v4491_v20 = vld [vmem:[#allocation6 + $0xa8] sm:$0xf]  ;;  %v4493_v23 = vld [vmem:[#allocation6 + $0xb4] sm:$0xf0]  ;;  %v5542_v28 = vld [vmem:[#allocation6 + $0x94] sm:$0xf]  ;;  %v6166_v60 = vpop.f32.mrf.mxu0 }
 0x178   :  { %5800 = vpow2.f32 %v4207_v7  ;;  %v4492_v22 = vor.u32 %v5546_v21, %v4491_v20  ;;  %v5571_v20 = vld [vmem:[#allocation8 + $0xb8] sm:$0xf0] }
 0x179   :  { %v936_v39 = vpop.f32.mrf.mxu2 }
 0x17a   :  { %v973_v45 = vadd.f32 %v936_v39, %v737_v31  ;;  %v6147_v1 = vpop.f32.mrf.mxu3 }
 0x17b   :  { %v925_v46 = vpop.f32.mrf.mxu1  ;;  %1204 = vmatpush.bf16.msrb.mxu2 %v4269_v29  ;;  %v4481_v29 = vld [vmem:[#allocation6 + $0x9c] sm:$0xf0] }
 0x17c   :  { %v4208_v52 = vmul.f32 -1.442695, %v973_v45  ;;  %v5481_v45 = vld [vmem:[#allocation6 + $0x28] sm:$0xf0]  ;;  %v750_v46 = vadd.f32 %v6137_v56, %v6125_v16  ;;  %v4484_v30 = vor.u32 %v5542_v28, %v4481_v29  ;;  %v5568_v28 = vld [vmem:[#allocation8 + $0xa0] sm:$0xf0] }
 0x17d   :  { %v4233_v54 = vor.u32 %v5481_v45, %v4232_v44  ;;  %v4443_v44 = vld [vmem:[#allocation6 + $0x48] sm:$0xf]  ;;  %v5534_v45 = vld [vmem:[#allocation6 + $0x50] sm:$0xf0] }
 0x17e   :  { %v5801_v63 = vpop.eup %5800  ;;  %5802 = vpow2.f32 %v4208_v52  ;;  %v993_v52 = vadd.f32 %v6120_v5, %v6147_v1  ;;  %v3770_v1 = vsel %vm5379_vm5, 1, %v6011_v47 }
 0x17f   :  { %v957_v9 = vadd.f32 1.0, %v5801_v63  ;;  %1205 = vmatpush.bf16.msrb.mxu2 %v4257_v32  ;;  %3772 = vperm.xlu1 %5787, %v3770_v1   ;;  %v4467_v32 = vld [vmem:[#allocation6 + $0x78] sm:$0xf] }
 0x180   :  { %v4468_v34 = vor.u32 %v5540_v33, %v4467_v32  ;;  %v5564_v32 = vld [vmem:[#allocation8 + $0x80] sm:$0xf0]  ;;  %v5563_v33 = vld [vmem:[#allocation8 + $0x7c] sm:$0xf] }
 0x181   :  { %5804 = vrcp.f32 %v957_v9  ;;  %v938_v58 = vpop.f32.mrf.mxu2  ;;  %v969_v36 = vand.u32 2147483648, %v957_v9  ;;  %v967_v38 = vand.u32 2147483647, %v957_v9  ;;  %vm963_vm0 = vweird.f32 %v957_v9 }
 0x182   :  { %v951_v18 = vpop.f32.mrf.mxu3 }
 0x183   :  { %v970_v48 = vor.u32 1.1754944e-38, %v969_v36  ;;  %vm968_vm2 = vcmp.eq.f32.partialorder %v967_v38, 8.507059e+37  ;;  %1206 = vmatpush.bf16.msrb.mxu2 %v4245_v40  ;;  %v6168_v0 = vpop.f32.mrf.mxu1  ;;  %v5537_v38 = vld [vmem:[#allocation6 + $0x68] sm:$0xf0] }
 0x184   :  { %v5803_v24 = vpop.eup %5802 }
 0x185   :  { %v977_v25 = vadd.f32 1.0, %v5803_v24  ;;  %v4479_v24 = vld [vmem:[#allocation6 + $0x90] sm:$0xf] }
 0x187   :  { %v5805_v31 = vpop.eup %5804  ;;  %5806 = vrcp.f32 %v977_v25  ;;  %v989_v57 = vand.u32 2147483648, %v977_v25  ;;  %v987_v63 = vand.u32 2147483647, %v977_v25  ;;  %vm983_vm4 = vweird.f32 %v977_v25  ;;  %1207 = vmatpush.bf16.msrb.mxu2 %v4233_v54 }
 0x188   :  { %v959_v7 = vmul.f32 %v5805_v31, %v957_v9  ;;  %vm964_vm14 = vweird.f32 %v5805_v31 }
 0x189   :  { %vm965_vm1 = vmor %vm963_vm0, %vm964_vm14  ;;  %v990_v9 = vor.u32 1.1754944e-38, %v989_v57  ;;  %vm988_vm7 = vcmp.eq.f32.partialorder %v987_v63, 8.507059e+37 }
 0x18a   :  { %v960_v8 = vsub.f32 1.0, %v959_v7 }
 0x18b   :  { %1208 = vmatpush.bf16.msrb.mxu2 %v4221_v6  ;;  %v1199_v7 = vpop.f32.mrf.mxu1  ;;  %v4407_v6 = vld [vmem:[#allocation6] sm:$0xf] }
 0x18c   :  { %v961_v37 = vmul.f32 %v5805_v31, %v960_v8  ;;  %v5539_v8 = vld [vmem:[#allocation6 + $0x7c] sm:$0xf]  ;;  %v4563_v7 = vld [vmem:[#allocation8 + $0x78] sm:$0xf] }
 0x18d   :  { %v5807_v39 = vpop.eup %5806  ;;  %v4472_v36 = vor.u32 %v5539_v8, %v4469_v35  ;;  %v4564_v8 = vor.u32 %v5564_v32, %v4563_v7  ;;  %v4571_v35 = vld [vmem:[#allocation8 + $0x80] sm:$0xf] }
 0x18e   :  { %v979_v41 = vmul.f32 %v5807_v39, %v977_v25  ;;  %v962_v43 = vadd.f32 %v5805_v31, %v961_v37  ;;  %vm984_vm3 = vweird.f32 %v5807_v39  ;;  %1209 = vmatmul.bf16.vlgmr.msrb.gmra.mxu2 %v6141_v27  ;;  %v5545_v27 = vld [vmem:[#allocation6 + $0xac] sm:$0xf]  ;;  %v5543_v25 = vld [vmem:[#allocation6 + $0x98] sm:$0xf0]  ;;  %v4455_v37 = vld [vmem:[#allocation6 + $0x60] sm:$0xf] }
 0x18f   :  { %vm985_vm6 = vmor %vm983_vm4, %vm984_vm3  ;;  %v4496_v26 = vor.u32 %v5545_v27, %v4493_v23  ;;  %1636 = vmatpush.bf16.msra.mxu2 %v4492_v22  ;;  %v4456_v40 = vor.u32 %v5537_v38, %v4455_v37  ;;  %v4575_v27 = vld [vmem:[#allocation8 + $0x90] sm:$0xf]  ;;  %v5567_v22 = vld [vmem:[#allocation8 + $0x98] sm:$0xf0] }
 0x190   :  { %v980_v50 = vsub.f32 1.0, %v979_v41  ;;  %v966_v51 = vsel %vm965_vm1, %v5805_v31, %v962_v43  ;;  %v1186_v31 = vpop.f32.mrf.mxu0  ;;  %v4457_v41 = vld [vmem:[#allocation6 + $0x6c] sm:$0xf0]  ;;  %v5566_v23 = vld [vmem:[#allocation8 + $0x94] sm:$0xf] }
 0x191   :  { %v971_v53 = vsel %vm968_vm2, %v970_v48, %v966_v51  ;;  %1649 = vmatpush.bf16.msra.mxu3 %v4496_v26  ;;  %v5533_v48 = vld [vmem:[#allocation6 + $0x4c] sm:$0xf]  ;;  %v4431_v51 = vld [vmem:[#allocation6 + $0x30] sm:$0xf]  ;;  %v4583_v26 = vld [vmem:[#allocation8 + $0x98] sm:$0xf] }
 0x192   :  { %v981_v55 = vmul.f32 %v5807_v39, %v980_v50  ;;  %v994_v59 = vmul.f32 %v993_v52, %v971_v53  ;;  %v4448_v50 = vor.u32 %v5533_v48, %v4445_v49  ;;  %v5531_v52 = vld [vmem:[#allocation6 + $0x38] sm:$0xf0]  ;;  %v5530_v53 = vld [vmem:[#allocation6 + $0x34] sm:$0xf]  ;;  %v4553_v49 = vld [vmem:[#allocation8 + $0x6c] sm:$0xf0] }
 0x193   :  { %v4432_v54 = vor.u32 %v5531_v52, %v4431_v51  ;;  %v4559_v51 = vld [vmem:[#allocation8 + $0x68] sm:$0xf]  ;;  %v5562_v52 = vld [vmem:[#allocation8 + $0x70] sm:$0xf0] }
 0x194   :  { %v982_v56 = vadd.f32 %v5807_v39, %v981_v55  ;;  %v995_v3 = vadd.f32 %v994_v59, %v750_v46  ;;  %v4444_v46 = vor.u32 %v5534_v45, %v4443_v44  ;;  %v4433_v55 = vld [vmem:[#allocation6 + $0x3c] sm:$0xf0]  ;;  %v4419_v59 = vld [vmem:[#allocation6 + $0x18] sm:$0xf]  ;;  %v5561_v44 = vld [vmem:[#allocation8 + $0x68] sm:$0xf0] }
 0x195   :  { %1650 = vmatpush.bf16.msra.mxu3 %v4484_v30  ;;  %v4436_v57 = vor.u32 %v5530_v53, %v4433_v55  ;;  %v4420_v63 = vor.u32 %v5528_v61, %v4419_v59  ;;  %v1198_v30 = vadd.f32 %v6168_v0, %v6101_v4  ;;  %v6176_v0 = vld [vmem:[#allocation3 + $0xc] sm:$0xf]  ;;  %v1185_v53 = vadd.f32 %v6166_v60, %v6088_v2  ;;  %v4539_v59 = vld [vmem:[#allocation8 + $0x48] sm:$0xf]  ;;  %v5558_v61 = vld [vmem:[#allocation8 + $0x50] sm:$0xf0] }
 0x196   :  { %v986_v5 = vsel %vm985_vm6, %v5807_v39, %v982_v56  ;;  %5808 = vtanh.f32 %v995_v3  ;;  %v5536_v39 = vld [vmem:[#allocation6 + $0x64] sm:$0xf]  ;;  %v4421_v56 = vld [vmem:[#allocation6 + $0x24] sm:$0xf0] }
 0x197   :  { %v991_v10 = vsel %vm988_vm7, %v990_v9, %v986_v5  ;;  %v4460_v43 = vor.u32 %v5536_v39, %v4457_v41  ;;  %v4424_v3 = vor.u32 %v5527_v62, %v4421_v56  ;;  %v5525_v9 = vld [vmem:[#allocation6 + $0x8] sm:$0xf0]  ;;  %v5524_v5 = vld [vmem:[#allocation6 + $0x4] sm:$0xf]  ;;  %v4540_v56 = vor.u32 %v5558_v61, %v4539_v59  ;;  %v4463_v59 = vld [vmem:[#allocation6 + $0x68] sm:$0xf] }
 0x198   :  { %v997_v11 = vsub.f32 1.0, %v991_v10  ;;  %v999_v14 = vmul.f32 %v991_v10, %v6130_v42  ;;  %v4408_v1 = vor.u32 %v5525_v9, %v4407_v6  ;;  %v4409_v10 = vld [vmem:[#allocation6 + $0xc] sm:$0xf0]  ;;  %v5557_v62 = vld [vmem:[#allocation8 + $0x4c] sm:$0xf] }
 0x199   :  { %1651 = vmatpush.bf16.msra.mxu3 %v4472_v36  ;;  %v5565_v36 = vld [vmem:[#allocation8 + $0x88] sm:$0xf0]  ;;  %v4547_v6 = vld [vmem:[#allocation8 + $0x50] sm:$0xf]  ;;  %v5559_v9 = vld [vmem:[#allocation8 + $0x58] sm:$0xf0] }
 0x19a   :  { %v4572_v39 = vor.u32 %v5565_v36, %v4571_v35  ;;  %v4487_v36 = vld [vmem:[#allocation6 + $0x98] sm:$0xf]  ;;  %v5538_v61 = vld [vmem:[#allocation6 + $0x70] sm:$0xf0] }
 0x19c   :  { %v5809_v12 = vpop.eup %5808 }
 0x19d   :  { %v998_v13 = vmul.f32 %v5809_v12, %v997_v11  ;;  %1652 = vmatpush.bf16.msra.mxu3 %v4460_v43  ;;  %v4587_v11 = vld [vmem:[#allocation8 + $0xa8] sm:$0xf]  ;;  %v5570_v12 = vld [vmem:[#allocation8 + $0xb0] sm:$0xf0]  ;;  %v4551_v43 = vld [vmem:[#allocation8 + $0x60] sm:$0xf] }
 0x19e   :  { %v4552_v48 = vor.u32 %v5561_v44, %v4551_v43  ;;  %v5549_v43 = vld [vmem:[#allocation8 + $0x8] sm:$0xf0] }
 0x19f   :  { %v1000_v58 = vadd.f32 %v999_v14, %v998_v13  ;;  %v4412_v13 = vor.u32 %v5524_v5, %v4409_v10  ;;  %v4588_v14 = vor.u32 %v5570_v12, %v4587_v11  ;;  %v4548_v10 = vor.u32 %v5559_v9, %v4547_v6  ;;  %v4527_v12 = vld [vmem:[#allocation8 + $0x30] sm:$0xf] }
 0x1a1   :  { %v1010_v17 = vsel %vm1008_vm8, %v1000_v58, 0.0  ;;  %v6162_v18 = vsel %vm1008_vm8, %v1000_v58, %v6130_v42  ;;  %v4480_v42 = vor.u32 %v5543_v25, %v4479_v24  ;;  %1653 = vmatpush.bf16.msra.mxu3 %v4448_v50  ;;  %v4589_v58 = vld [vmem:[#allocation8 + $0xb4] sm:$0xf0]  ;;  %1836 = vmatpush.bf16.msrb.mxu1 %v4588_v14  ;;  %v4576_v24 = vor.u32 %v5567_v22, %v4575_v27  ;;  %v4577_v25 = vld [vmem:[#allocation8 + $0x9c] sm:$0xf0] }
 0x1a2   :  { %1012 = vst [vmem:[#allocation9 + $0x8] sm:$0xff] %v1010_v17  ;;  %v1214_v19 = vpack.c.bf16 %v6162_v18, %v6162_v18  ;;  %v4595_v17 = vld [vmem:[#allocation8 + $0xb0] sm:$0xf]  ;;  %v4580_v29 = vor.u32 %v5566_v23, %v4577_v25  ;;  %v5554_v14 = vld [vmem:[#allocation8 + $0x34] sm:$0xf] }
 0x1a3   :  { %1637 = vmatpush.bf16.msra.mxu2 %v4480_v42  ;;  %v4596_v21 = vor.u32 %v5571_v20, %v4595_v17  ;;  %v4584_v42 = vor.u32 %v5568_v28, %v4583_v26  ;;  %v4529_v17 = vld [vmem:[#allocation8 + $0x3c] sm:$0xf0]  ;;  %v5556_v20 = vld [vmem:[#allocation8 + $0x40] sm:$0xf0]  ;;  %v4499_v23 = vld [vmem:[#allocation6 + $0xb0] sm:$0xf] }
 0x1a4   :  { %1383 = vmatmul.bf16.vlgmr.msrb.gmra.mxu3 %v1214_v19  ;;  %1396 = vmatmul.bf16.vlgmr.msra.gmra.mxu0 %v1214_v19  ;;  %v4532_v27 = vor.u32 %v5554_v14, %v4529_v17  ;;  %v4515_v28 = vld [vmem:[#allocation8 + $0x18] sm:$0xf] }
 0x1a5   :  { %1409 = vmatmul.bf16.vlgmr.msra.gmra.mxu1 %v1214_v19  ;;  %1654 = vmatpush.bf16.msra.mxu3 %v4436_v57  ;;  %v4592_v19 = vor.u32 %v5569_v15, %v4589_v58 }
 0x1a6   :  { %1837 = vmatpush.bf16.msrb.mxu1 %v4576_v24  ;;  %v5547_v24 = vld [vmem:[#allocation6 + $0xb8] sm:$0xf0] }
 0x1a7   :  { %1638 = vmatpush.bf16.msra.mxu2 %v4468_v34  ;;  %v4565_v34 = vld [vmem:[#allocation8 + $0x84] sm:$0xf0]  ;;  %v4500_v25 = vor.u32 %v5547_v24, %v4499_v23 }
 0x1a8   :  { %v4568_v38 = vor.u32 %v5563_v33, %v4565_v34  ;;  %v4523_v33 = vld [vmem:[#allocation8 + $0x20] sm:$0xf] }
 0x1a9   :  { %1655 = vmatpush.bf16.msra.mxu3 %v4424_v3  ;;  %v4541_v3 = vld [vmem:[#allocation8 + $0x54] sm:$0xf0]  ;;  %1662 = vmatpush.bf16.msrb.mxu0 %v4500_v25 }
 0x1aa   :  { %1838 = vmatpush.bf16.msrb.mxu1 %v4564_v8  ;;  %v5553_v8 = vld [vmem:[#allocation8 + $0x28] sm:$0xf0] }
 0x1ab   :  { %1639 = vmatpush.bf16.msra.mxu2 %v4456_v40  ;;  %v4524_v35 = vor.u32 %v5553_v8, %v4523_v33 }
 0x1ad   :  { %1656 = vmatpush.bf16.msra.mxu3 %v4412_v13  ;;  %v5555_v13 = vld [vmem:[#allocation8 + $0x38] sm:$0xf0] }
 0x1ae   :  { %1839 = vmatpush.bf16.msrb.mxu1 %v4552_v48  ;;  %v4528_v58 = vor.u32 %v5555_v13, %v4527_v12  ;;  %v4505_v48 = vld [vmem:[#allocation8 + $0xc] sm:$0xf0] }
 0x1af   :  { %1640 = vmatpush.bf16.msra.mxu2 %v4444_v46  ;;  %v5560_v46 = vld [vmem:[#allocation8 + $0x64] sm:$0xf] }
 0x1b0   :  { %v4556_v50 = vor.u32 %v5560_v46, %v4553_v49  ;;  %v4511_v46 = vld [vmem:[#allocation8 + $0x8] sm:$0xf]  ;;  %v5550_v49 = vld [vmem:[#allocation8 + $0x10] sm:$0xf0] }
 0x1b1   :  { %1862 = vmatpush.bf16.msrb.mxu3 %v4596_v21 }
 0x1b2   :  { %1840 = vmatpush.bf16.msrb.mxu1 %v4540_v56  ;;  %v4451_v56 = vld [vmem:[#allocation6 + $0x50] sm:$0xf] }
 0x1b3   :  { %1641 = vmatpush.bf16.msra.mxu2 %v4432_v54  ;;  %v4560_v54 = vor.u32 %v5562_v52, %v4559_v51  ;;  %v4475_v51 = vld [vmem:[#allocation6 + $0x80] sm:$0xf]  ;;  %v5541_v52 = vld [vmem:[#allocation6 + $0x88] sm:$0xf0] }
 0x1b4   :  { %1657 = vmatmul.bf16.vlgmr.msra.gmra.mxu3 %v6176_v0 }
 0x1b5   :  { %1863 = vmatpush.bf16.msrb.mxu3 %v4584_v42  ;;  %v5551_v42 = vld [vmem:[#allocation8 + $0x1c] sm:$0xf] }
 0x1b6   :  { %1841 = vmatpush.bf16.msrb.mxu1 %v4528_v58 }
 0x1b7   :  { %1642 = vmatpush.bf16.msra.mxu2 %v4420_v63 }
 0x1b9   :  { %1864 = vmatpush.bf16.msrb.mxu3 %v4572_v39 }
 0x1bb   :  { %1643 = vmatpush.bf16.msra.mxu2 %v4408_v1  ;;  %v4544_v1 = vor.u32 %v5557_v62, %v4541_v3  ;;  %v4464_v62 = vor.u32 %v5538_v61, %v4463_v59  ;;  %v5535_v3 = vld [vmem:[#allocation6 + $0x58] sm:$0xf0] }
 0x1bc   :  { %v5587_v61 = vld [vmem:[#allocation6 + $0x7c] sm:$0xf] }
 0x1bd   :  { %1865 = vmatpush.bf16.msrb.mxu3 %v4560_v54  ;;  %v4512_v54 = vor.u32 %v5550_v49, %v4511_v46  ;;  %v5593_v46 = vld [vmem:[#allocation6 + $0xac] sm:$0xf] }
 0x1be   :  { %1644 = vmatmul.bf16.vlgmr.msra.gmra.mxu2 %v6176_v0 }
 0x1bf   :  { %1849 = vmatpush.bf16.msrb.mxu2 %v4592_v19  ;;  %v4535_v19 = vld [vmem:[#allocation8 + $0x38] sm:$0xf] }
 0x1c0   :  { %v4536_v22 = vor.u32 %v5556_v20, %v4535_v19  ;;  %v4427_v19 = vld [vmem:[#allocation6 + $0x20] sm:$0xf]  ;;  %v5529_v20 = vld [vmem:[#allocation6 + $0x28] sm:$0xf0] }
 0x1c1   :  { %1866 = vmatpush.bf16.msrb.mxu3 %v4548_v10 }
 0x1c3   :  { %1850 = vmatpush.bf16.msrb.mxu2 %v4580_v29  ;;  %v5552_v29 = vld [vmem:[#allocation8 + $0x20] sm:$0xf0] }
 0x1c4   :  { %v4516_v7 = vor.u32 %v5552_v29, %v4515_v28 }
 0x1c5   :  { %1867 = vmatpush.bf16.msrb.mxu3 %v4536_v22 }
 0x1c6   :  { %1842 = vmatpush.bf16.msrb.mxu1 %v4516_v7  ;;  %v5526_v7 = vld [vmem:[#allocation6 + $0x10] sm:$0xf0] }
 0x1c7   :  { %1851 = vmatpush.bf16.msrb.mxu2 %v4568_v38 }
 0x1c9   :  { %1868 = vmatpush.bf16.msrb.mxu3 %v4524_v35 }
 0x1cb   :  { %1852 = vmatpush.bf16.msrb.mxu2 %v4556_v50 }
 0x1cd   :  { %1869 = vmatpush.bf16.msrb.mxu3 %v4512_v54  ;;  %v4676_v54 = vld [vmem:[#allocation6 + $0x9c] sm:$0xf0] }
 0x1cf   :  { %1853 = vmatpush.bf16.msrb.mxu2 %v4544_v1  ;;  %v4452_v1 = vor.u32 %v5535_v3, %v4451_v56 }
 0x1d3   :  { %1854 = vmatpush.bf16.msrb.mxu2 %v4532_v27  ;;  %v6193_v27 = vld [vmem:[%s6380_s5] ss:$0 sm:$0xff] }
 0x211   :  { %v6172_v31 = vpop.f32.mrf.mxu2 }
 0x212   :  { %v1211_v23 = vadd.f32 %v6172_v31, %v6125_v16 }
 0x219   :  { %v1212_v57 = vpop.f32.mrf.mxu2 }
 0x221   :  { %v1397_v37 = vpop.f32.mrf.mxu0 }
 0x222   :  { %v1434_v40 = vadd.f32 %v1397_v37, %v1198_v30  ;;  %v6174_v41 = vpop.f32.mrf.mxu1  ;;  %v4517_v30 = vld [vmem:[#allocation8 + $0x24] sm:$0xf0]  ;;  %v5544_v37 = vld [vmem:[#allocation6 + $0xa0] sm:$0xf0] }
 0x223   :  { %v4520_v32 = vor.u32 %v5551_v42, %v4517_v30  ;;  %v4488_v39 = vor.u32 %v5544_v37, %v4487_v36  ;;  %v1454_v22 = vadd.f32 %v6193_v27, %v6174_v41  ;;  %v4428_v42 = vor.u32 %v5529_v20, %v4427_v19  ;;  %v4415_v41 = vld [vmem:[#allocation6 + $0x8] sm:$0xf]  ;;  %v1468_v37 = vpop.permute.xlu1 %1467  ;;  %v4640_v19 = vld [vmem:[#allocation6 + $0x54] sm:$0xf0] }
 0x224   :  { %v4403_v45 = vmul.f32 -1.442695, %v1434_v40  ;;  %v4503_v40 = vld [vmem:[#allocation8] sm:$0xf]  ;;  %v4416_v8 = vor.u32 %v5526_v7, %v4415_v41  ;;  %vm1469_vm1 = vcmp.eq.s32.totalorder %v1468_v37, 1 }
 0x225   :  { %1855 = vmatpush.bf16.msrb.mxu2 %v4520_v32  ;;  %v4504_v44 = vor.u32 %v5549_v43, %v4503_v40  ;;  %1663 = vmatpush.bf16.msrb.mxu0 %v4488_v39  ;;  %v4616_v7 = vld [vmem:[#allocation6 + $0x24] sm:$0xf0]  ;;  %v5618_v37 = vld [vmem:[#allocation8 + $0xb0] sm:$0xf0] }
 0x226   :  { %5810 = vpow2.f32 %v4403_v45  ;;  %v5548_v45 = vld [vmem:[#allocation8 + $0x4] sm:$0xf] }
 0x227   :  { %v1384_v55 = vpop.f32.mrf.mxu3  ;;  %1843 = vmatpush.bf16.msrb.mxu1 %v4504_v44 }
 0x228   :  { %v1414_v63 = vadd.f32 %v1384_v55, %v1185_v53  ;;  %v4508_v53 = vor.u32 %v5548_v45, %v4505_v48  ;;  %v4476_v55 = vor.u32 %v5541_v52, %v4475_v51  ;;  %v4686_v45 = vld [vmem:[#allocation6 + $0xa8] sm:$0xf]  ;;  %v5594_v48 = vld [vmem:[#allocation6 + $0xb0] sm:$0xf0]  ;;  %v5591_v52 = vld [vmem:[#allocation6 + $0x98] sm:$0xf0] }
 0x229   :  { %v1399_v5 = vpop.f32.mrf.mxu0  ;;  %v4687_v49 = vor.u32 %v5594_v48, %v4686_v45  ;;  %v5619_v48 = vld [vmem:[#allocation8 + $0xb8] sm:$0xf0] }
 0x22a   :  { %v4402_v11 = vmul.f32 -1.442695, %v1414_v63  ;;  %v1412_v60 = vpop.f32.mrf.mxu1  ;;  %1856 = vmatpush.bf16.msrb.mxu2 %v4508_v53  ;;  %1664 = vmatpush.bf16.msrb.mxu0 %v4476_v55  ;;  %v4662_v55 = vld [vmem:[#allocation6 + $0x78] sm:$0xf] }
 0x22b   :  { %v5532_v60 = vld [vmem:[#allocation6 + $0x40] sm:$0xf0] }
 0x22c   :  { %v5811_v15 = vpop.eup %5810  ;;  %5812 = vpow2.f32 %v4402_v11  ;;  %v4439_v11 = vld [vmem:[#allocation6 + $0x38] sm:$0xf] }
 0x22d   :  { %v6182_v21 = vadd.f32 1.0, %v5811_v15  ;;  %v4440_v58 = vor.u32 %v5532_v60, %v4439_v11  ;;  %v5584_v11 = vld [vmem:[#allocation6 + $0x64] sm:$0xf] }
 0x22e   :  { %1665 = vmatpush.bf16.msrb.mxu0 %v4464_v62  ;;  %v4664_v62 = vld [vmem:[#allocation6 + $0x84] sm:$0xf0] }
 0x22f   :  { %v1386_v26 = vpop.f32.mrf.mxu3  ;;  %5814 = vrcp.f32 %v6182_v21  ;;  %v1450_v29 = vand.u32 2147483648, %v6182_v21  ;;  %vm1444_vm14 = vweird.f32 %v6182_v21  ;;  %v1448_v30 = vand.u32 2147483647, %v6182_v21 }
 0x230   :  { %v4667_v56 = vor.u32 %v5587_v61, %v4664_v62  ;;  %v5611_v61 = vld [vmem:[#allocation8 + $0x7c] sm:$0xf] }
 0x231   :  { %v1451_v33 = vor.u32 1.1754944e-38, %v1450_v29  ;;  %vm1449_vm0 = vcmp.eq.f32.partialorder %v1448_v30, 8.507059e+37  ;;  %v4614_v29 = vld [vmem:[#allocation6 + $0x18] sm:$0xf]  ;;  %v5575_v30 = vld [vmem:[#allocation6 + $0x1c] sm:$0xf] }
 0x232   :  { %v5813_v34 = vpop.eup %5812  ;;  %1666 = vmatpush.bf16.msrb.mxu0 %v4452_v1  ;;  %v4650_v1 = vld [vmem:[#allocation6 + $0x60] sm:$0xf] }
 0x233   :  { %v1418_v38 = vadd.f32 1.0, %v5813_v34 }
 0x235   :  { %5816 = vrcp.f32 %v1418_v38  ;;  %v6185_v50 = vpop.eup %5814  ;;  %v1430_v10 = vand.u32 2147483648, %v1418_v38  ;;  %v1428_v13 = vand.u32 2147483647, %v1418_v38  ;;  %vm1424_vm10 = vweird.f32 %v1418_v38 }
 0x236   :  { %v1440_v57 = vmul.f32 %v6185_v50, %v6182_v21  ;;  %vm1445_vm13 = vweird.f32 %v6185_v50  ;;  %1667 = vmatpush.bf16.msrb.mxu0 %v4440_v58  ;;  %v5581_v58 = vld [vmem:[#allocation6 + $0x4c] sm:$0xf] }
 0x237   :  { %v1431_v17 = vor.u32 1.1754944e-38, %v1430_v10  ;;  %vm1429_vm12 = vcmp.eq.f32.partialorder %v1428_v13, 8.507059e+37  ;;  %vm1446_vm15 = vmor %vm1444_vm14, %vm1445_vm13  ;;  %v5585_v10 = vld [vmem:[#allocation6 + $0x68] sm:$0xf0]  ;;  %v4643_v20 = vor.u32 %v5581_v58, %v4640_v19  ;;  %v5610_v58 = vld [vmem:[#allocation8 + $0x70] sm:$0xf0] }
 0x238   :  { %v1441_v9 = vsub.f32 1.0, %v1440_v57  ;;  %v5588_v57 = vld [vmem:[#allocation6 + $0x80] sm:$0xf0]  ;;  %v4651_v60 = vor.u32 %v5585_v10, %v4650_v1 }
 0x23a   :  { %v1442_v14 = vmul.f32 %v6185_v50, %v1441_v9  ;;  %1668 = vmatpush.bf16.msrb.mxu0 %v4428_v42  ;;  %v5576_v42 = vld [vmem:[#allocation6 + $0x20] sm:$0xf0] }
 0x23b   :  { %v5817_v63 = vpop.eup %5816  ;;  %v4615_v41 = vor.u32 %v5576_v42, %v4614_v29  ;;  %v6220_v29 = vld [vmem:[#allocation3 + $0x10] sm:$0xf] }
 0x23c   :  { %v1420_v6 = vmul.f32 %v5817_v63, %v1418_v38  ;;  %vm1425_vm9 = vweird.f32 %v5817_v63  ;;  %v1443_v26 = vadd.f32 %v6185_v50, %v1442_v14  ;;  %v4638_v14 = vld [vmem:[#allocation6 + $0x48] sm:$0xf] }
 0x23d   :  { %vm1426_vm11 = vmor %vm1424_vm10, %vm1425_vm9 }
 0x23e   :  { %v1421_v5 = vsub.f32 1.0, %v1420_v6  ;;  %v1447_v31 = vsel %vm1446_vm15, %v6185_v50, %v1443_v26  ;;  %1669 = vmatpush.bf16.msrb.mxu0 %v4416_v8  ;;  %v4688_v50 = vld [vmem:[#allocation6 + $0xb4] sm:$0xf0]  ;;  %v6214_v6 = vpop.f32.mrf.mxu3  ;;  %v4628_v26 = vld [vmem:[#allocation6 + $0x3c] sm:$0xf0] }
 0x23f   :  { %v1452_v34 = vsel %vm1449_vm0, %v1451_v33, %v1447_v31  ;;  %v4691_v51 = vor.u32 %v5593_v46, %v4688_v50  ;;  %v4602_v31 = vld [vmem:[#allocation6] sm:$0xf]  ;;  %v5573_v33 = vld [vmem:[#allocation6 + $0x8] sm:$0xf0]  ;;  %v5572_v8 = vld [vmem:[#allocation6 + $0x4] sm:$0xf] }
 0x240   :  { %v1422_v12 = vmul.f32 %v5817_v63, %v1421_v5  ;;  %v1458_v35 = vsub.f32 1.0, %v1452_v34  ;;  %v1460_v39 = vmul.f32 %v1452_v34, %v6162_v18  ;;  %v4603_v34 = vor.u32 %v5573_v33, %v4602_v31  ;;  %v5615_v50 = vld [vmem:[#allocation8 + $0x98] sm:$0xf0] }
 0x241   :  { %1670 = vmatmul.bf16.vlgmr.msrb.gmra.mxu0 %v6176_v0  ;;  %2110 = vmatpush.bf16.msra.mxu1 %v4691_v51  ;;  %v4674_v0 = vld [vmem:[#allocation6 + $0x90] sm:$0xf]  ;;  %v6212_v3 = vpop.f32.mrf.mxu2  ;;  %v5614_v51 = vld [vmem:[#allocation8 + $0x94] sm:$0xf] }
 0x242   :  { %v1423_v15 = vadd.f32 %v5817_v63, %v1422_v12  ;;  %2097 = vmatpush.bf16.msra.mxu0 %v4687_v49  ;;  %v4675_v53 = vor.u32 %v5591_v52, %v4674_v0  ;;  %v4652_v12 = vld [vmem:[#allocation6 + $0x6c] sm:$0xf0]  ;;  %v4772_v52 = vld [vmem:[#allocation8 + $0x9c] sm:$0xf0] }
 0x243   :  { %v4655_v13 = vor.u32 %v5584_v11, %v4652_v12  ;;  %v4770_v49 = vld [vmem:[#allocation8 + $0x90] sm:$0xf]  ;;  %v4746_v11 = vld [vmem:[#allocation8 + $0x60] sm:$0xf]  ;;  %v5608_v12 = vld [vmem:[#allocation8 + $0x64] sm:$0xf] }
 0x244   :  { %v1427_v24 = vsel %vm1426_vm11, %v5817_v63, %v1423_v15  ;;  %v4663_v63 = vor.u32 %v5588_v57, %v4662_v55  ;;  %v5582_v15 = vld [vmem:[#allocation6 + $0x50] sm:$0xf0]  ;;  %v4771_v0 = vor.u32 %v5615_v50, %v4770_v49  ;;  %v4758_v57 = vld [vmem:[#allocation8 + $0x78] sm:$0xf] }
 0x245   :  { %v1432_v25 = vsel %vm1429_vm12, %v1431_v17, %v1427_v24  ;;  %v4639_v17 = vor.u32 %v5582_v15, %v4638_v14  ;;  %v5578_v24 = vld [vmem:[#allocation6 + $0x34] sm:$0xf]  ;;  %v4748_v14 = vld [vmem:[#allocation8 + $0x6c] sm:$0xf0]  ;;  %v4754_v15 = vld [vmem:[#allocation8 + $0x68] sm:$0xf] }
 0x246   :  { %v1455_v28 = vmul.f32 %v1454_v22, %v1432_v25  ;;  %2098 = vmatpush.bf16.msra.mxu0 %v4675_v53  ;;  %v1660_v5 = vpop.f32.mrf.mxu3  ;;  %v4626_v22 = vld [vmem:[#allocation6 + $0x30] sm:$0xf]  ;;  %v5616_v53 = vld [vmem:[#allocation8 + $0xa0] sm:$0xf0]  ;;  %v4755_v19 = vor.u32 %v5610_v58, %v4754_v15  ;;  %v5598_v58 = vld [vmem:[#allocation8 + $0x10] sm:$0xf0] }
 0x247   :  { %v5613_v5 = vld [vmem:[#allocation8 + $0x88] sm:$0xf0] }
 0x248   :  { %v1456_v32 = vadd.f32 %v1455_v28, %v1211_v23  ;;  %v5579_v23 = vld [vmem:[#allocation6 + $0x38] sm:$0xf0]  ;;  %v4631_v28 = vor.u32 %v5578_v24, %v4628_v26  ;;  %v5606_v24 = vld [vmem:[#allocation8 + $0x50] sm:$0xf0] }
 0x249   :  { %v1647_v9 = vpop.f32.mrf.mxu2  ;;  %v4627_v25 = vor.u32 %v5579_v23, %v4626_v22  ;;  %v4734_v23 = vld [vmem:[#allocation8 + $0x48] sm:$0xf] }
 0x24a   :  { %5818 = vtanh.f32 %v1456_v32  ;;  %2099 = vmatpush.bf16.msra.mxu0 %v4663_v63  ;;  %v4619_v32 = vor.u32 %v5575_v30, %v4616_v7  ;;  %v4766_v9 = vld [vmem:[#allocation8 + $0x80] sm:$0xf]  ;;  %v4735_v42 = vor.u32 %v5606_v24, %v4734_v23  ;;  %v4736_v30 = vld [vmem:[#allocation8 + $0x54] sm:$0xf0]  ;;  %v5589_v23 = vld [vmem:[#allocation6 + $0x88] sm:$0xf0] }
 0x24b   :  { %v4767_v10 = vor.u32 %v5613_v5, %v4766_v9 }
 0x24e   :  { %2100 = vmatpush.bf16.msra.mxu0 %v4651_v60  ;;  %v5609_v60 = vld [vmem:[#allocation8 + $0x68] sm:$0xf0] }
 0x250   :  { %v5819_v36 = vpop.eup %5818 }
 0x251   :  { %v1459_v38 = vmul.f32 %v5819_v36, %v1458_v35  ;;  %v4604_v35 = vld [vmem:[#allocation6 + $0xc] sm:$0xf0]  ;;  %v4782_v36 = vld [vmem:[#allocation8 + $0xa8] sm:$0xf] }
 0x252   :  { %2101 = vmatpush.bf16.msra.mxu0 %v4639_v17  ;;  %v4751_v17 = vor.u32 %v5608_v12, %v4748_v14  ;;  %v5596_v12 = vld [vmem:[#allocation8 + $0x4] sm:$0xf]  ;;  %v4706_v14 = vld [vmem:[#allocation8 + $0x8] sm:$0xf] }
 0x253   :  { %v1461_v21 = vadd.f32 %v1460_v39, %v1459_v38  ;;  %v4607_v38 = vor.u32 %v5572_v8, %v4604_v35  ;;  %v4783_v39 = vor.u32 %v5618_v37, %v4782_v36  ;;  %v4722_v8 = vld [vmem:[#allocation8 + $0x30] sm:$0xf]  ;;  %v5602_v35 = vld [vmem:[#allocation8 + $0x34] sm:$0xf]  ;;  %v4724_v37 = vld [vmem:[#allocation8 + $0x3c] sm:$0xf0] }
 0x255   :  { %v6208_v40 = vsel %vm1469_vm1, %v1461_v21, %v6162_v18  ;;  %v1471_v43 = vsel %vm1469_vm1, %v1461_v21, 0.0  ;;  %v5590_v18 = vld [vmem:[#allocation6 + $0x94] sm:$0xf]  ;;  %v5617_v21 = vld [vmem:[#allocation8 + $0xac] sm:$0xf]  ;;  %2297 = vmatpush.bf16.msra.mxu3 %v4783_v39 }
 0x256   :  { %1473 = vst [vmem:[#allocation9 + $0x10] sm:$0xff] %v1471_v43  ;;  %v1675_v44 = vpack.c.bf16 %v6208_v40, %v6208_v40  ;;  %v4679_v59 = vor.u32 %v5590_v18, %v4676_v54  ;;  %2102 = vmatpush.bf16.msra.mxu0 %v4627_v25  ;;  %v4784_v43 = vld [vmem:[#allocation8 + $0xb4] sm:$0xf0]  ;;  %v4775_v54 = vor.u32 %v5614_v51, %v4772_v52  ;;  %v5605_v25 = vld [vmem:[#allocation8 + $0x4c] sm:$0xf] }
 0x257   :  { %v4787_v45 = vor.u32 %v5617_v21, %v4784_v43  ;;  %v4778_v18 = vld [vmem:[#allocation8 + $0x98] sm:$0xf]  ;;  %v4739_v7 = vor.u32 %v5605_v25, %v4736_v30  ;;  %v5604_v39 = vld [vmem:[#allocation8 + $0x40] sm:$0xf0]  ;;  %v4727_v43 = vor.u32 %v5602_v35, %v4724_v37  ;;  %v5599_v52 = vld [vmem:[#allocation8 + $0x1c] sm:$0xf] }
 0x258   :  { %1844 = vmatmul.bf16.vlgmr.msrb.gmra.mxu1 %v1675_v44  ;;  %1857 = vmatmul.bf16.vlgmr.msrb.gmra.mxu2 %v1675_v44  ;;  %v4779_v55 = vor.u32 %v5616_v53, %v4778_v18  ;;  %v4710_v51 = vld [vmem:[#allocation8 + $0x18] sm:$0xf] }
 0x259   :  { %1870 = vmatmul.bf16.vlgmr.msrb.gmra.mxu3 %v1675_v44  ;;  %2111 = vmatpush.bf16.msra.mxu1 %v4679_v59  ;;  %v4790_v44 = vld [vmem:[#allocation8 + $0xb0] sm:$0xf]  ;;  %v5612_v59 = vld [vmem:[#allocation8 + $0x80] sm:$0xf0]  ;;  %v4634_v35 = vld [vmem:[#allocation6 + $0x38] sm:$0xf] }
 0x25a   :  { %2103 = vmatpush.bf16.msra.mxu0 %v4615_v41  ;;  %v4791_v46 = vor.u32 %v5619_v48, %v4790_v44  ;;  %2298 = vmatpush.bf16.msra.mxu3 %v4771_v0  ;;  %v4759_v63 = vor.u32 %v5612_v59, %v4758_v57  ;;  %v4742_v41 = vld [vmem:[#allocation8 + $0x50] sm:$0xf]  ;;  %v5595_v48 = vld [vmem:[#allocation6 + $0xb8] sm:$0xf0]  ;;  %v5600_v0 = vld [vmem:[#allocation8 + $0x20] sm:$0xf0] }
 0x25b   :  { %v4711_v53 = vor.u32 %v5600_v0, %v4710_v51  ;;  %v5601_v59 = vld [vmem:[#allocation8 + $0x28] sm:$0xf0] }
 0x25d   :  { %2112 = vmatpush.bf16.msra.mxu1 %v4667_v56  ;;  %v4760_v56 = vld [vmem:[#allocation8 + $0x84] sm:$0xf0] }
 0x25e   :  { %2104 = vmatpush.bf16.msra.mxu0 %v4603_v34  ;;  %v4763_v1 = vor.u32 %v5611_v61, %v4760_v56  ;;  %2299 = vmatpush.bf16.msra.mxu3 %v4759_v63  ;;  %v5603_v34 = vld [vmem:[#allocation8 + $0x38] sm:$0xf0]  ;;  %v4682_v61 = vld [vmem:[#allocation6 + $0x98] sm:$0xf]  ;;  %v5592_v63 = vld [vmem:[#allocation6 + $0xa0] sm:$0xf0] }
 0x25f   :  { %v4723_v36 = vor.u32 %v5603_v34, %v4722_v8  ;;  %v4683_v5 = vor.u32 %v5592_v63, %v4682_v61  ;;  %v4610_v61 = vld [vmem:[#allocation6 + $0x8] sm:$0xf]  ;;  %v5574_v63 = vld [vmem:[#allocation6 + $0x10] sm:$0xf0] }
 0x261   :  { %2113 = vmatpush.bf16.msra.mxu1 %v4655_v13  ;;  %v4747_v13 = vor.u32 %v5609_v60, %v4746_v11  ;;  %2105 = vmatmul.bf16.vlgmr.msra.gmra.mxu0 %v6220_v29  ;;  %v5597_v11 = vld [vmem:[#allocation8 + $0x8] sm:$0xf0] }
 0x262   :  { %2310 = vmatpush.bf16.msrb.mxu0 %v4787_v45  ;;  %v4694_v45 = vld [vmem:[#allocation6 + $0xb0] sm:$0xf] }
 0x263   :  { %2300 = vmatpush.bf16.msra.mxu3 %v4747_v13  ;;  %v4695_v49 = vor.u32 %v5595_v48, %v4694_v45  ;;  %v4700_v13 = vld [vmem:[#allocation8 + $0xc] sm:$0xf0]  ;;  %v4622_v48 = vld [vmem:[#allocation6 + $0x20] sm:$0xf] }
 0x265   :  { %2114 = vmatpush.bf16.msra.mxu1 %v4643_v20  ;;  %v1646_v20 = vadd.f32 %v6212_v3, %v6088_v2  ;;  %v5607_v3 = vld [vmem:[#allocation8 + $0x58] sm:$0xf0]  ;;  %2123 = vmatpush.bf16.msra.mxu2 %v4695_v49 }
 0x266   :  { %2311 = vmatpush.bf16.msrb.mxu0 %v4775_v54  ;;  %v4743_v33 = vor.u32 %v5607_v3, %v4742_v41  ;;  %v4712_v54 = vld [vmem:[#allocation8 + $0x24] sm:$0xf0]  ;;  %v4646_v41 = vld [vmem:[#allocation6 + $0x50] sm:$0xf]  ;;  %v5872_v3 = vld [vmem:[%s6375_s0] sm:$0xff] }
 0x267   :  { %2301 = vmatpush.bf16.msra.mxu3 %v4735_v42  ;;  %v4715_v57 = vor.u32 %v5599_v52, %v4712_v54  ;;  %v5586_v42 = vld [vmem:[#allocation6 + $0x70] sm:$0xf0]  ;;  %vm4794_vm2 = vcmp.gt.s32.totalorder %v5872_v3, 4  ;;  %vm4989_vm4 = vcmp.gt.s32.totalorder %v5872_v3, 5 }
 0x268   :  { %v2387_v8 = vsel %vm4794_vm2, 1, %v6011_v47  ;;  %v2848_v51 = vsel %vm4989_vm4, 1, %v6011_v47 }
 0x269   :  { %2115 = vmatpush.bf16.msra.mxu1 %v4631_v28  ;;  %2124 = vmatpush.bf16.msra.mxu2 %v4683_v5 }
 0x26a   :  { %2312 = vmatpush.bf16.msrb.mxu0 %v4763_v1  ;;  %2389 = vperm.xlu2 %5788, %v2387_v8  }
 0x26b   :  { %2302 = vmatpush.bf16.msra.mxu3 %v4723_v36  ;;  %v5580_v36 = vld [vmem:[#allocation6 + $0x40] sm:$0xf0] }
 0x26d   :  { %2116 = vmatpush.bf16.msra.mxu1 %v4619_v32  ;;  %v1659_v32 = vadd.f32 %v6214_v6, %v6101_v4 }
 0x26e   :  { %2313 = vmatpush.bf16.msrb.mxu0 %v4751_v17 }
 0x26f   :  { %2303 = vmatpush.bf16.msra.mxu3 %v4711_v53 }
 0x271   :  { %2117 = vmatpush.bf16.msra.mxu1 %v4607_v38  ;;  %v4730_v38 = vld [vmem:[#allocation8 + $0x38] sm:$0xf] }
 0x272   :  { %2314 = vmatpush.bf16.msrb.mxu0 %v4739_v7  ;;  %v4731_v44 = vor.u32 %v5604_v39, %v4730_v38  ;;  %v5583_v7 = vld [vmem:[#allocation6 + $0x58] sm:$0xf0]  ;;  %2850 = vperm.xlu2 %5788, %v2848_v51   ;;  %v4821_v51 = vld [vmem:[#allocation6 + $0x30] sm:$0xf] }
 0x274   :  { %2118 = vmatmul.bf16.vlgmr.msra.gmra.mxu1 %v6220_v29 }
 0x275   :  { %2323 = vmatpush.bf16.msrb.mxu1 %v4791_v46 }
 0x276   :  { %2315 = vmatpush.bf16.msrb.mxu0 %v4727_v43  ;;  %v4635_v43 = vor.u32 %v5580_v36, %v4634_v35  ;;  %v4845_v36 = vld [vmem:[#allocation6 + $0x60] sm:$0xf] }
 0x279   :  { %2324 = vmatpush.bf16.msrb.mxu1 %v4779_v55  ;;  %v4718_v55 = vld [vmem:[#allocation8 + $0x20] sm:$0xf] }
 0x27a   :  { %v4719_v9 = vor.u32 %v5601_v59, %v4718_v55  ;;  %2316 = vmatpush.bf16.msrb.mxu0 %v4715_v57 }
 0x27d   :  { %2325 = vmatpush.bf16.msrb.mxu1 %v4767_v10  ;;  %v4698_v10 = vld [vmem:[#allocation8] sm:$0xf] }
 0x27e   :  { %v4699_v60 = vor.u32 %v5597_v11, %v4698_v10 }
 0x280   :  { %2304 = vmatpush.bf16.msra.mxu3 %v4699_v60 }
 0x281   :  { %2326 = vmatpush.bf16.msrb.mxu1 %v4755_v19  ;;  %v4703_v19 = vor.u32 %v5596_v12, %v4700_v13  ;;  %v1929_v12 = vpop.permute.xlu1 %1928 }
 0x282   :  { %vm1930_vm12 = vcmp.eq.s32.totalorder %v1929_v12, 1  ;;  %v4979_v12 = vld [vmem:[#allocation8 + $0xb4] sm:$0xf0] }
 0x283   :  { %2317 = vmatpush.bf16.msrb.mxu0 %v4703_v19  ;;  %v5642_v19 = vld [vmem:[#allocation6 + $0xb0] sm:$0xf0] }
 0x285   :  { %2327 = vmatpush.bf16.msrb.mxu1 %v4743_v33  ;;  %v4647_v33 = vor.u32 %v5583_v7, %v4646_v41 }
 0x289   :  { %2328 = vmatpush.bf16.msrb.mxu1 %v4731_v44 }
 0x28d   :  { %2329 = vmatpush.bf16.msrb.mxu1 %v4719_v9  ;;  %v4611_v9 = vor.u32 %v5574_v63, %v4610_v61  ;;  %v4811_v63 = vld [vmem:[#allocation6 + $0x24] sm:$0xf0] }
 0x2be   :  { %v6216_v62 = vpop.f32.mrf.mxu0 }
 0x2c6   :  { %v1673_v28 = vpop.f32.mrf.mxu0 }
 0x2c7   :  { %v4658_v28 = vld [vmem:[#allocation6 + $0x68] sm:$0xf] }
 0x2c8   :  { %v4659_v30 = vor.u32 %v5586_v42, %v4658_v28  ;;  %v4871_v28 = vld [vmem:[#allocation6 + $0x9c] sm:$0xf0] }
 0x2d5   :  { %v1845_v22 = vpop.f32.mrf.mxu1 }
 0x2d6   :  { %v1875_v26 = vadd.f32 %v1845_v22, %v1646_v20  ;;  %v4707_v20 = vor.u32 %v5598_v58, %v4706_v14  ;;  %v4670_v22 = vld [vmem:[#allocation6 + $0x80] sm:$0xf] }
 0x2d7   :  { %v4671_v24 = vor.u32 %v5589_v23, %v4670_v22  ;;  %v4883_v22 = vld [vmem:[#allocation6 + $0xb4] sm:$0xf0]  ;;  %v4869_v23 = vld [vmem:[#allocation6 + $0x90] sm:$0xf] }
 0x2d8   :  { %v4597_v31 = vmul.f32 -1.442695, %v1875_v26  ;;  %2330 = vmatpush.bf16.msrb.mxu1 %v4707_v20 }
 0x2d9   :  { %2125 = vmatpush.bf16.msra.mxu2 %v4671_v24  ;;  %v5639_v24 = vld [vmem:[#allocation6 + $0x98] sm:$0xf0] }
 0x2da   :  { %5820 = vpow2.f32 %v4597_v31 }
 0x2db   :  { %v1858_v21 = vpop.f32.mrf.mxu2 }
 0x2dc   :  { %v1895_v46 = vadd.f32 %v1858_v21, %v1659_v32  ;;  %v6226_v6 = vpop.f32.mrf.mxu3 }
 0x2dd   :  { %v1847_v50 = vpop.f32.mrf.mxu1  ;;  %2126 = vmatpush.bf16.msra.mxu2 %v4659_v30 }
 0x2de   :  { %v4598_v18 = vmul.f32 -1.442695, %v1895_v46  ;;  %v5577_v46 = vld [vmem:[#allocation6 + $0x28] sm:$0xf0]  ;;  %v1672_v50 = vadd.f32 %v6216_v62, %v6125_v16  ;;  %v6244_v30 = vpop.f32.mrf.mxu0 }
 0x2df   :  { %v4623_v54 = vor.u32 %v5577_v46, %v4622_v48  ;;  %v5629_v48 = vld [vmem:[#allocation6 + $0x4c] sm:$0xf] }
 0x2e0   :  { %v5821_v56 = vpop.eup %5820  ;;  %5822 = vpow2.f32 %v4598_v18  ;;  %v1915_v18 = vadd.f32 %v6193_v27, %v6226_v6 }
 0x2e1   :  { %v1879_v1 = vadd.f32 1.0, %v5821_v56  ;;  %2127 = vmatpush.bf16.msra.mxu2 %v4647_v33  ;;  %v5635_v33 = vld [vmem:[#allocation6 + $0x7c] sm:$0xf] }
 0x2e3   :  { %5824 = vrcp.f32 %v1879_v1  ;;  %v1860_v15 = vpop.f32.mrf.mxu2  ;;  %v1891_v37 = vand.u32 2147483648, %v1879_v1  ;;  %v1889_v39 = vand.u32 2147483647, %v1879_v1  ;;  %vm1885_vm5 = vweird.f32 %v1879_v1 }
 0x2e4   :  { %v1873_v17 = vpop.f32.mrf.mxu3 }
 0x2e5   :  { %v1892_v49 = vor.u32 1.1754944e-38, %v1891_v37  ;;  %vm1890_vm7 = vcmp.eq.f32.partialorder %v1889_v39, 8.507059e+37  ;;  %2128 = vmatpush.bf16.msra.mxu2 %v4635_v43  ;;  %v4881_v17 = vld [vmem:[#allocation6 + $0xa8] sm:$0xf]  ;;  %v5633_v37 = vld [vmem:[#allocation6 + $0x68] sm:$0xf0] }
 0x2e6   :  { %v5823_v25 = vpop.eup %5822  ;;  %v4882_v20 = vor.u32 %v5642_v19, %v4881_v17  ;;  %v2108_v7 = vpop.f32.mrf.mxu0  ;;  %v4846_v39 = vor.u32 %v5633_v37, %v4845_v36  ;;  %v4965_v19 = vld [vmem:[#allocation8 + $0x90] sm:$0xf] }
 0x2e7   :  { %v1899_v26 = vadd.f32 1.0, %v5823_v25  ;;  %v4953_v7 = vld [vmem:[#allocation8 + $0x78] sm:$0xf] }
 0x2e9   :  { %v5825_v32 = vpop.eup %5824  ;;  %5826 = vrcp.f32 %v1899_v26  ;;  %v1911_v57 = vand.u32 2147483648, %v1899_v26  ;;  %v1909_v56 = vand.u32 2147483647, %v1899_v26  ;;  %vm1905_vm9 = vweird.f32 %v1899_v26  ;;  %2129 = vmatpush.bf16.msra.mxu2 %v4623_v54 }
 0x2ea   :  { %v1881_v31 = vmul.f32 %v5825_v32, %v1879_v1  ;;  %vm1886_vm3 = vweird.f32 %v5825_v32 }
 0x2eb   :  { %vm1887_vm6 = vmor %vm1885_vm5, %vm1886_vm3  ;;  %v1912_v5 = vor.u32 1.1754944e-38, %v1911_v57  ;;  %vm1910_vm11 = vcmp.eq.f32.partialorder %v1909_v56, 8.507059e+37  ;;  %v5624_v57 = vld [vmem:[#allocation6 + $0x20] sm:$0xf0] }
 0x2ec   :  { %v1882_v34 = vsub.f32 1.0, %v1881_v31  ;;  %v5636_v31 = vld [vmem:[#allocation6 + $0x80] sm:$0xf0] }
 0x2ed   :  { %2130 = vmatpush.bf16.msra.mxu2 %v4611_v9  ;;  %v5620_v9 = vld [vmem:[#allocation6 + $0x4] sm:$0xf] }
 0x2ee   :  { %v1883_v38 = vmul.f32 %v5825_v32, %v1882_v34  ;;  %v4859_v34 = vld [vmem:[#allocation6 + $0x84] sm:$0xf0] }
 0x2ef   :  { %v5827_v21 = vpop.eup %5826  ;;  %v4862_v35 = vor.u32 %v5635_v33, %v4859_v34  ;;  %v4955_v33 = vld [vmem:[#allocation8 + $0x84] sm:$0xf0]  ;;  %v5661_v34 = vld [vmem:[#allocation8 + $0x88] sm:$0xf0] }
 0x2f0   :  { %v1901_v44 = vmul.f32 %v5827_v21, %v1899_v26  ;;  %v1884_v45 = vadd.f32 %v5825_v32, %v1883_v38  ;;  %vm1906_vm8 = vweird.f32 %v5827_v21  ;;  %2131 = vmatmul.bf16.vlgmr.msra.gmra.mxu2 %v6220_v29  ;;  %v5641_v29 = vld [vmem:[#allocation6 + $0xac] sm:$0xf]  ;;  %v5638_v26 = vld [vmem:[#allocation6 + $0x94] sm:$0xf]  ;;  %v5632_v38 = vld [vmem:[#allocation6 + $0x64] sm:$0xf] }
 0x2f1   :  { %vm1907_vm10 = vmor %vm1905_vm9, %vm1906_vm8  ;;  %v4886_v25 = vor.u32 %v5641_v29, %v4883_v22  ;;  %2558 = vmatpush.bf16.msrb.mxu2 %v4882_v20  ;;  %v4874_v42 = vor.u32 %v5638_v26, %v4871_v28  ;;  %v6246_v41 = vpop.f32.mrf.mxu1  ;;  %v5663_v29 = vld [vmem:[#allocation8 + $0x98] sm:$0xf0]  ;;  %v5662_v20 = vld [vmem:[#allocation8 + $0x94] sm:$0xf] }
 0x2f2   :  { %v1902_v0 = vsub.f32 1.0, %v1901_v44  ;;  %v1888_v52 = vsel %vm1887_vm6, %v5825_v32, %v1884_v45  ;;  %v4857_v32 = vld [vmem:[#allocation6 + $0x78] sm:$0xf]  ;;  %v4833_v44 = vld [vmem:[#allocation6 + $0x48] sm:$0xf]  ;;  %v4966_v22 = vor.u32 %v5663_v29, %v4965_v19 }
 0x2f3   :  { %v1893_v53 = vsel %vm1890_vm7, %v1892_v49, %v1888_v52  ;;  %2571 = vmatpush.bf16.msrb.mxu3 %v4886_v25  ;;  %v4858_v8 = vor.u32 %v5636_v31, %v4857_v32  ;;  %v5630_v45 = vld [vmem:[#allocation6 + $0x50] sm:$0xf0]  ;;  %v4835_v49 = vld [vmem:[#allocation6 + $0x54] sm:$0xf0]  ;;  %v5664_v25 = vld [vmem:[#allocation8 + $0xa0] sm:$0xf0] }
 0x2f4   :  { %v1903_v55 = vmul.f32 %v5827_v21, %v1902_v0  ;;  %v1916_v59 = vmul.f32 %v1915_v18, %v1893_v53  ;;  %v4834_v46 = vor.u32 %v5630_v45, %v4833_v44  ;;  %v5627_v0 = vld [vmem:[#allocation6 + $0x38] sm:$0xf0]  ;;  %v5626_v52 = vld [vmem:[#allocation6 + $0x34] sm:$0xf]  ;;  %v4823_v53 = vld [vmem:[#allocation6 + $0x3c] sm:$0xf0] }
 0x2f5   :  { %v4822_v18 = vor.u32 %v5627_v0, %v4821_v51  ;;  %v4826_v54 = vor.u32 %v5626_v52, %v4823_v53  ;;  %v5659_v32 = vld [vmem:[#allocation8 + $0x7c] sm:$0xf]  ;;  %v5658_v51 = vld [vmem:[#allocation8 + $0x70] sm:$0xf0]  ;;  %v2107_v0 = vadd.f32 %v6244_v30, %v6088_v2  ;;  %v4889_v29 = vld [vmem:[#allocation6 + $0xb0] sm:$0xf] }
 0x2f6   :  { %v1904_v62 = vadd.f32 %v5827_v21, %v1903_v55  ;;  %v1917_v47 = vadd.f32 %v1916_v59, %v1672_v50  ;;  %v4838_v50 = vor.u32 %v5629_v48, %v4835_v49  ;;  %v4809_v55 = vld [vmem:[#allocation6 + $0x18] sm:$0xf]  ;;  %v5623_v59 = vld [vmem:[#allocation6 + $0x1c] sm:$0xf]  ;;  %v4958_v36 = vor.u32 %v5659_v32, %v4955_v33  ;;  %v5656_v48 = vld [vmem:[#allocation8 + $0x64] sm:$0xf] }
 0x2f7   :  { %2572 = vmatpush.bf16.msrb.mxu3 %v4874_v42  ;;  %v4810_v61 = vor.u32 %v5624_v57, %v4809_v55  ;;  %v4814_v56 = vor.u32 %v5623_v59, %v4811_v63  ;;  %v5654_v55 = vld [vmem:[#allocation8 + $0x50] sm:$0xf0]  ;;  %v5653_v57 = vld [vmem:[#allocation8 + $0x4c] sm:$0xf]  ;;  %v4931_v63 = vld [vmem:[#allocation8 + $0x54] sm:$0xf0] }
 0x2f8   :  { %v1908_v1 = vsel %vm1907_vm10, %v5827_v21, %v1904_v62  ;;  %5828 = vtanh.f32 %v1917_v47  ;;  %v4847_v21 = vld [vmem:[#allocation6 + $0x6c] sm:$0xf0]  ;;  %v4797_v62 = vld [vmem:[#allocation6] sm:$0xf]  ;;  %v5621_v47 = vld [vmem:[#allocation6 + $0x8] sm:$0xf0] }
 0x2f9   :  { %v1913_v27 = vsel %vm1910_vm11, %v1912_v5, %v1908_v1  ;;  %v2121_v3 = vpop.f32.mrf.mxu1  ;;  %v4850_v43 = vor.u32 %v5632_v38, %v4847_v21  ;;  %v4798_v5 = vor.u32 %v5621_v47, %v4797_v62  ;;  %v4799_v1 = vld [vmem:[#allocation6 + $0xc] sm:$0xf0]  ;;  %v4941_v21 = vld [vmem:[#allocation8 + $0x60] sm:$0xf]  ;;  %v5655_v62 = vld [vmem:[#allocation8 + $0x58] sm:$0xf0] }
 0x2fa   :  { %v1919_v6 = vsub.f32 1.0, %v1913_v27  ;;  %v1921_v60 = vmul.f32 %v1913_v27, %v6208_v40  ;;  %v4977_v27 = vld [vmem:[#allocation8 + $0xa8] sm:$0xf]  ;;  %v5660_v3 = vld [vmem:[#allocation8 + $0x80] sm:$0xf0] }
 0x2fb   :  { %2573 = vmatpush.bf16.msrb.mxu3 %v4862_v35  ;;  %v4954_v31 = vor.u32 %v5660_v3, %v4953_v7  ;;  %v4913_v3 = vld [vmem:[#allocation8 + $0x20] sm:$0xf]  ;;  %v5649_v32 = vld [vmem:[#allocation8 + $0x28] sm:$0xf0] }
 0x2fc   :  { %v4914_v33 = vor.u32 %v5649_v32, %v4913_v3 }
 0x2fe   :  { %v5829_v10 = vpop.eup %5828 }
 0x2ff   :  { %v1920_v11 = vmul.f32 %v5829_v10, %v1919_v6  ;;  %2574 = vmatpush.bf16.msrb.mxu3 %v4850_v43  ;;  %v5666_v6 = vld [vmem:[#allocation8 + $0xb0] sm:$0xf0]  ;;  %v4802_v10 = vor.u32 %v5620_v9, %v4799_v1  ;;  %v5657_v43 = vld [vmem:[#allocation8 + $0x68] sm:$0xf0]  ;;  %v4934_v9 = vor.u32 %v5653_v57, %v4931_v63  ;;  %v4841_v57 = vld [vmem:[#allocation6 + $0x50] sm:$0xf] }
 0x300   :  { %v4942_v45 = vor.u32 %v5657_v43, %v4941_v21  ;;  %v5644_v43 = vld [vmem:[#allocation8 + $0x4] sm:$0xf] }
 0x301   :  { %v1922_v13 = vadd.f32 %v1921_v60, %v1920_v11  ;;  %v4978_v11 = vor.u32 %v5666_v6, %v4977_v27  ;;  %v5665_v60 = vld [vmem:[#allocation8 + $0xac] sm:$0xf]  ;;  %v4917_v27 = vld [vmem:[#allocation8 + $0x30] sm:$0xf]  ;;  %v5651_v6 = vld [vmem:[#allocation8 + $0x38] sm:$0xf0] }
 0x303   :  { %v1932_v14 = vsel %vm1930_vm12, %v1922_v13, 0.0  ;;  %v6240_v15 = vsel %vm1930_vm12, %v1922_v13, %v6208_v40  ;;  %v4870_v40 = vor.u32 %v5639_v24, %v4869_v23  ;;  %2575 = vmatpush.bf16.msrb.mxu3 %v4838_v50  ;;  %v4985_v13 = vld [vmem:[#allocation8 + $0xb0] sm:$0xf]  ;;  %2758 = vmatpush.bf16.msra.mxu1 %v4978_v11  ;;  %v4967_v23 = vld [vmem:[#allocation8 + $0x9c] sm:$0xf0] }
 0x304   :  { %1934 = vst [vmem:[#allocation9 + $0x18] sm:$0xff] %v1932_v14  ;;  %v2136_v58 = vpack.c.bf16 %v6240_v15, %v6240_v15  ;;  %v4982_v14 = vor.u32 %v5665_v60, %v4979_v12  ;;  %v4973_v24 = vld [vmem:[#allocation8 + $0x98] sm:$0xf]  ;;  %v4970_v26 = vor.u32 %v5662_v20, %v4967_v23  ;;  %v4949_v50 = vld [vmem:[#allocation8 + $0x68] sm:$0xf]  ;;  %v4918_v60 = vor.u32 %v5651_v6, %v4917_v27 }
 0x305   :  { %2559 = vmatpush.bf16.msrb.mxu2 %v4870_v40  ;;  %v4974_v28 = vor.u32 %v5664_v25, %v4973_v24  ;;  %v2120_v40 = vadd.f32 %v6246_v41, %v6101_v4  ;;  %v6254_v41 = vld [vmem:[#allocation3 + $0x14] sm:$0xf]  ;;  %v4950_v52 = vor.u32 %v5658_v51, %v4949_v50  ;;  %v4919_v12 = vld [vmem:[#allocation8 + $0x3c] sm:$0xf0]  ;;  %v5643_v20 = vld [vmem:[#allocation6 + $0xb8] sm:$0xf0] }
 0x306   :  { %2305 = vmatmul.bf16.vlgmr.msra.gmra.mxu3 %v2136_v58  ;;  %2318 = vmatmul.bf16.vlgmr.msrb.gmra.mxu0 %v2136_v58  ;;  %v4905_v24 = vld [vmem:[#allocation8 + $0x18] sm:$0xf]  ;;  %v5648_v25 = vld [vmem:[#allocation8 + $0x20] sm:$0xf0]  ;;  %v4865_v50 = vld [vmem:[#allocation6 + $0x80] sm:$0xf] }
 0x307   :  { %2331 = vmatmul.bf16.vlgmr.msrb.gmra.mxu1 %v2136_v58  ;;  %2576 = vmatpush.bf16.msrb.mxu3 %v4826_v54  ;;  %v5667_v58 = vld [vmem:[#allocation8 + $0xb8] sm:$0xf0]  ;;  %v4929_v54 = vld [vmem:[#allocation8 + $0x48] sm:$0xf]  ;;  %v5637_v51 = vld [vmem:[#allocation6 + $0x88] sm:$0xf0] }
 0x308   :  { %v4986_v17 = vor.u32 %v5667_v58, %v4985_v13  ;;  %2759 = vmatpush.bf16.msra.mxu1 %v4966_v22  ;;  %v4925_v13 = vld [vmem:[#allocation8 + $0x38] sm:$0xf]  ;;  %v4890_v22 = vor.u32 %v5643_v20, %v4889_v29 }
 0x309   :  { %2560 = vmatpush.bf16.msrb.mxu2 %v4858_v8  ;;  %v4961_v8 = vld [vmem:[#allocation8 + $0x80] sm:$0xf] }
 0x30a   :  { %v4962_v37 = vor.u32 %v5661_v34, %v4961_v8  ;;  %2584 = vmatpush.bf16.msra.mxu0 %v4890_v22  ;;  %v4877_v8 = vld [vmem:[#allocation6 + $0x98] sm:$0xf]  ;;  %v5640_v34 = vld [vmem:[#allocation6 + $0xa0] sm:$0xf0] }
 0x30b   :  { %2577 = vmatpush.bf16.msrb.mxu3 %v4814_v56  ;;  %v4937_v56 = vld [vmem:[#allocation8 + $0x50] sm:$0xf] }
 0x30c   :  { %2760 = vmatpush.bf16.msra.mxu1 %v4954_v31 }
 0x30d   :  { %2561 = vmatpush.bf16.msrb.mxu2 %v4846_v39 }
 0x30f   :  { %2578 = vmatpush.bf16.msrb.mxu3 %v4802_v10  ;;  %v5650_v10 = vld [vmem:[#allocation8 + $0x34] sm:$0xf] }
 0x310   :  { %2761 = vmatpush.bf16.msra.mxu1 %v4942_v45  ;;  %v4901_v45 = vld [vmem:[#allocation8 + $0x8] sm:$0xf] }
 0x311   :  { %2562 = vmatpush.bf16.msrb.mxu2 %v4834_v46  ;;  %v4943_v46 = vld [vmem:[#allocation8 + $0x6c] sm:$0xf0] }
 0x312   :  { %v4946_v49 = vor.u32 %v5656_v48, %v4943_v46  ;;  %v5646_v48 = vld [vmem:[#allocation8 + $0x10] sm:$0xf0] }
 0x313   :  { %2784 = vmatpush.bf16.msra.mxu3 %v4986_v17  ;;  %v4922_v17 = vor.u32 %v5650_v10, %v4919_v12  ;;  %v5625_v12 = vld [vmem:[#allocation6 + $0x28] sm:$0xf0] }
 0x315   :  { %2563 = vmatpush.bf16.msrb.mxu2 %v4822_v18 }
 0x316   :  { %2579 = vmatmul.bf16.vlgmr.msrb.gmra.mxu3 %v6254_v41 }
 0x317   :  { %2785 = vmatpush.bf16.msra.mxu3 %v4974_v28  ;;  %v4907_v28 = vld [vmem:[#allocation8 + $0x24] sm:$0xf0] }
 0x319   :  { %2564 = vmatpush.bf16.msrb.mxu2 %v4810_v61  ;;  %v4930_v61 = vor.u32 %v5654_v55, %v4929_v54  ;;  %v5634_v54 = vld [vmem:[#allocation6 + $0x70] sm:$0xf0] }
 0x31b   :  { %2786 = vmatpush.bf16.msra.mxu3 %v4962_v37  ;;  %2762 = vmatpush.bf16.msra.mxu1 %v4930_v61  ;;  %v4893_v37 = vld [vmem:[#allocation8] sm:$0xf] }
 0x31d   :  { %2565 = vmatpush.bf16.msrb.mxu2 %v4798_v5  ;;  %v4938_v5 = vor.u32 %v5655_v62, %v4937_v56 }
 0x31f   :  { %2787 = vmatpush.bf16.msra.mxu3 %v4950_v52  ;;  %2763 = vmatpush.bf16.msra.mxu1 %v4918_v60  ;;  %v4866_v52 = vor.u32 %v5637_v51, %v4865_v50  ;;  %v4817_v60 = vld [vmem:[#allocation6 + $0x20] sm:$0xf] }
 0x320   :  { %2566 = vmatmul.bf16.vlgmr.msrb.gmra.mxu2 %v6254_v41  ;;  %v5066_v51 = vld [vmem:[#allocation6 + $0x9c] sm:$0xf0] }
 0x321   :  { %2771 = vmatpush.bf16.msra.mxu2 %v4982_v14  ;;  %v5652_v14 = vld [vmem:[#allocation8 + $0x40] sm:$0xf0] }
 0x322   :  { %v4926_v19 = vor.u32 %v5652_v14, %v4925_v13  ;;  %v6271_v14 = vld [vmem:[%s6380_s5] ss:$0 sm:$0xff] }
 0x323   :  { %2788 = vmatpush.bf16.msra.mxu3 %v4938_v5  ;;  %v5628_v5 = vld [vmem:[#allocation6 + $0x40] sm:$0xf0] }
 0x325   :  { %2772 = vmatpush.bf16.msra.mxu2 %v4970_v26  ;;  %v5647_v26 = vld [vmem:[#allocation8 + $0x1c] sm:$0xf] }
 0x326   :  { %v4910_v7 = vor.u32 %v5647_v26, %v4907_v28  ;;  %v4805_v26 = vld [vmem:[#allocation6 + $0x8] sm:$0xf]  ;;  %v5622_v28 = vld [vmem:[#allocation6 + $0x10] sm:$0xf0] }
 0x327   :  { %2789 = vmatpush.bf16.msra.mxu3 %v4926_v19 }
 0x329   :  { %2773 = vmatpush.bf16.msra.mxu2 %v4958_v36  ;;  %v4878_v36 = vor.u32 %v5640_v34, %v4877_v8  ;;  %v2390_v8 = vpop.permute.xlu2 %2389 }
 0x32a   :  { %vm2391_vm5 = vcmp.eq.s32.totalorder %v2390_v8, 1 }
 0x32b   :  { %2790 = vmatpush.bf16.msra.mxu3 %v4914_v33  ;;  %2585 = vmatpush.bf16.msra.mxu0 %v4878_v36 }
 0x32d   :  { %2774 = vmatpush.bf16.msra.mxu2 %v4946_v49 }
 0x32f   :  { %2586 = vmatpush.bf16.msra.mxu0 %v4866_v52  ;;  %v5684_v52 = vld [vmem:[#allocation6 + $0x80] sm:$0xf0] }
 0x331   :  { %2775 = vmatpush.bf16.msra.mxu2 %v4934_v9  ;;  %v4829_v9 = vld [vmem:[#allocation6 + $0x38] sm:$0xf] }
 0x332   :  { %v4830_v10 = vor.u32 %v5628_v5, %v4829_v9  ;;  %v5680_v9 = vld [vmem:[#allocation6 + $0x64] sm:$0xf] }
 0x335   :  { %2776 = vmatpush.bf16.msra.mxu2 %v4922_v17 }
 0x339   :  { %2777 = vmatpush.bf16.msra.mxu2 %v4910_v7  ;;  %v4806_v7 = vor.u32 %v5622_v28, %v4805_v26  ;;  %v5006_v28 = vld [vmem:[#allocation6 + $0x24] sm:$0xf0] }
 0x373   :  { %v6250_v42 = vpop.f32.mrf.mxu2 }
 0x374   :  { %v2133_v19 = vadd.f32 %v6250_v42, %v6125_v16 }
 0x37b   :  { %v2134_v53 = vpop.f32.mrf.mxu2 }
 0x37c   :  { %v4853_v53 = vld [vmem:[#allocation6 + $0x68] sm:$0xf] }
 0x37d   :  { %v4854_v55 = vor.u32 %v5634_v54, %v4853_v53  ;;  %v5683_v53 = vld [vmem:[#allocation6 + $0x7c] sm:$0xf]  ;;  %v5054_v54 = vld [vmem:[#allocation6 + $0x84] sm:$0xf0] }
 0x37f   :  { %2587 = vmatpush.bf16.msra.mxu0 %v4854_v55 }
 0x383   :  { %v2319_v35 = vpop.f32.mrf.mxu0 }
 0x384   :  { %v2356_v38 = vadd.f32 %v2319_v35, %v2120_v40  ;;  %v6252_v39 = vpop.f32.mrf.mxu1  ;;  %v4906_v40 = vor.u32 %v5648_v25, %v4905_v24 }
 0x385   :  { %v2376_v17 = vadd.f32 %v6271_v14, %v6252_v39 }
 0x386   :  { %v4793_v44 = vmul.f32 -1.442695, %v2356_v38  ;;  %2764 = vmatpush.bf16.msra.mxu1 %v4906_v40  ;;  %v5645_v38 = vld [vmem:[#allocation8 + $0x8] sm:$0xf0] }
 0x387   :  { %v4894_v21 = vor.u32 %v5645_v38, %v4893_v37 }
 0x388   :  { %5830 = vpow2.f32 %v4793_v44  ;;  %v4895_v44 = vld [vmem:[#allocation8 + $0xc] sm:$0xf0] }
 0x389   :  { %v2306_v18 = vpop.f32.mrf.mxu3  ;;  %v4898_v49 = vor.u32 %v5644_v43, %v4895_v44  ;;  %v5690_v43 = vld [vmem:[#allocation6 + $0xb0] sm:$0xf0] }
 0x38a   :  { %v2336_v59 = vadd.f32 %v2306_v18, %v2107_v0  ;;  %2765 = vmatpush.bf16.msra.mxu1 %v4894_v21  ;;  %v4902_v0 = vor.u32 %v5646_v48, %v4901_v45  ;;  %v5076_v21 = vld [vmem:[#allocation6 + $0xa8] sm:$0xf]  ;;  %v5078_v45 = vld [vmem:[#allocation6 + $0xb4] sm:$0xf0] }
 0x38b   :  { %v2321_v47 = vpop.f32.mrf.mxu0  ;;  %2778 = vmatpush.bf16.msra.mxu2 %v4898_v49  ;;  %v5077_v44 = vor.u32 %v5690_v43, %v5076_v21  ;;  %v5687_v49 = vld [vmem:[#allocation6 + $0x98] sm:$0xf0] }
 0x38c   :  { %v4792_v1 = vmul.f32 -1.442695, %v2336_v59  ;;  %v2334_v30 = vpop.f32.mrf.mxu1  ;;  %2791 = vmatpush.bf16.msra.mxu3 %v4902_v0  ;;  %v5631_v59 = vld [vmem:[#allocation6 + $0x58] sm:$0xf0]  ;;  %v5052_v0 = vld [vmem:[#allocation6 + $0x78] sm:$0xf] }
 0x38d   :  { %v4842_v62 = vor.u32 %v5631_v59, %v4841_v57  ;;  %v5053_v55 = vor.u32 %v5684_v52, %v5052_v0  ;;  %v5057_v57 = vor.u32 %v5683_v53, %v5054_v54  ;;  %v5715_v21 = vld [vmem:[#allocation8 + $0xb8] sm:$0xf0]  ;;  %v5148_v52 = vld [vmem:[#allocation8 + $0x78] sm:$0xf] }
 0x38e   :  { %v5831_v11 = vpop.eup %5830  ;;  %5832 = vpow2.f32 %v4792_v1  ;;  %v5707_v53 = vld [vmem:[#allocation8 + $0x7c] sm:$0xf] }
 0x38f   :  { %v6260_v58 = vadd.f32 1.0, %v5831_v11  ;;  %2588 = vmatpush.bf16.msra.mxu0 %v4842_v62  ;;  %v5040_v62 = vld [vmem:[#allocation6 + $0x60] sm:$0xf] }
 0x391   :  { %v2308_v23 = vpop.f32.mrf.mxu3  ;;  %5834 = vrcp.f32 %v6260_v58  ;;  %v2372_v25 = vand.u32 2147483648, %v6260_v58  ;;  %vm2366_vm2 = vweird.f32 %v6260_v58  ;;  %v2370_v39 = vand.u32 2147483647, %v6260_v58 }
 0x392   :  { %v4818_v23 = vor.u32 %v5625_v12, %v4817_v60  ;;  %v5030_v60 = vld [vmem:[#allocation6 + $0x54] sm:$0xf0] }
 0x393   :  { %2589 = vmatpush.bf16.msra.mxu0 %v4830_v10  ;;  %v2373_v3 = vor.u32 1.1754944e-38, %v2372_v25  ;;  %vm2371_vm4 = vcmp.eq.f32.partialorder %v2370_v39, 8.507059e+37  ;;  %v5677_v10 = vld [vmem:[#allocation6 + $0x4c] sm:$0xf]  ;;  %v5671_v25 = vld [vmem:[#allocation6 + $0x1c] sm:$0xf] }
 0x394   :  { %v5833_v31 = vpop.eup %5832  ;;  %v5033_v12 = vor.u32 %v5677_v10, %v5030_v60  ;;  %v5009_v39 = vor.u32 %v5671_v25, %v5006_v28  ;;  %v5132_v25 = vld [vmem:[#allocation8 + $0x50] sm:$0xf] }
 0x395   :  { %v2340_v35 = vadd.f32 1.0, %v5833_v31 }
 0x397   :  { %5836 = vrcp.f32 %v2340_v35  ;;  %v6263_v46 = vpop.eup %5834  ;;  %v2352_v1 = vand.u32 2147483648, %v2340_v35  ;;  %v2350_v27 = vand.u32 2147483647, %v2340_v35  ;;  %vm2346_vm14 = vweird.f32 %v2340_v35  ;;  %2590 = vmatpush.bf16.msra.mxu0 %v4818_v23  ;;  %v5004_v23 = vld [vmem:[#allocation6 + $0x18] sm:$0xf] }
 0x398   :  { %v2362_v18 = vmul.f32 %v6263_v46, %v6260_v58  ;;  %vm2367_vm1 = vweird.f32 %v6263_v46 }
 0x399   :  { %v2353_v13 = vor.u32 1.1754944e-38, %v2352_v1  ;;  %vm2351_vm0 = vcmp.eq.f32.partialorder %v2350_v27, 8.507059e+37  ;;  %vm2368_vm3 = vmor %vm2366_vm2, %vm2367_vm1  ;;  %v5042_v1 = vld [vmem:[#allocation6 + $0x6c] sm:$0xf0]  ;;  %v5028_v27 = vld [vmem:[#allocation6 + $0x48] sm:$0xf] }
 0x39a   :  { %v2363_v56 = vsub.f32 1.0, %v2362_v18 }
 0x39b   :  { %2591 = vmatpush.bf16.msra.mxu0 %v4806_v7  ;;  %v5668_v7 = vld [vmem:[#allocation6 + $0x4] sm:$0xf] }
 0x39c   :  { %v2364_v6 = vmul.f32 %v6263_v46, %v2363_v56 }
 0x39d   :  { %v5837_v61 = vpop.eup %5836 }
 0x39e   :  { %v2342_v63 = vmul.f32 %v5837_v61, %v2340_v35  ;;  %vm2347_vm13 = vweird.f32 %v5837_v61  ;;  %v2365_v22 = vadd.f32 %v6263_v46, %v2364_v6  ;;  %2592 = vmatmul.bf16.vlgmr.msra.gmra.mxu0 %v6254_v41  ;;  %v5689_v41 = vld [vmem:[#allocation6 + $0xac] sm:$0xf]  ;;  %v5678_v6 = vld [vmem:[#allocation6 + $0x50] sm:$0xf0] }
 0x39f   :  { %vm2348_vm15 = vmor %vm2346_vm14, %vm2347_vm13  ;;  %v5081_v48 = vor.u32 %v5689_v41, %v5078_v45  ;;  %3019 = vmatpush.bf16.msrb.mxu0 %v5077_v44  ;;  %v5160_v41 = vld [vmem:[#allocation8 + $0x90] sm:$0xf]  ;;  %v5711_v44 = vld [vmem:[#allocation8 + $0x98] sm:$0xf0] }
 0x3a0   :  { %v2343_v47 = vsub.f32 1.0, %v2342_v63  ;;  %v2369_v42 = vsel %vm2368_vm3, %v6263_v46, %v2365_v22  ;;  %v5064_v46 = vld [vmem:[#allocation6 + $0x90] sm:$0xf]  ;;  %v5710_v45 = vld [vmem:[#allocation8 + $0x94] sm:$0xf] }
 0x3a1   :  { %v2374_v32 = vsel %vm2371_vm4, %v2373_v3, %v2369_v42  ;;  %3032 = vmatpush.bf16.msrb.mxu1 %v5081_v48  ;;  %v5065_v50 = vor.u32 %v5687_v49, %v5064_v46  ;;  %v5669_v42 = vld [vmem:[#allocation6 + $0x8] sm:$0xf0]  ;;  %v5161_v48 = vor.u32 %v5711_v44, %v5160_v41  ;;  %v5162_v46 = vld [vmem:[#allocation8 + $0x9c] sm:$0xf0]  ;;  %v5168_v49 = vld [vmem:[#allocation8 + $0x98] sm:$0xf] }
 0x3a2   :  { %v2344_v30 = vmul.f32 %v5837_v61, %v2343_v47  ;;  %v2380_v31 = vsub.f32 1.0, %v2374_v32  ;;  %v2382_v35 = vmul.f32 %v2374_v32, %v6240_v15  ;;  %v5681_v47 = vld [vmem:[#allocation6 + $0x68] sm:$0xf0]  ;;  %v4994_v32 = vld [vmem:[#allocation6 + $0xc] sm:$0xf0] }
 0x3a3   :  { %3020 = vmatpush.bf16.msrb.mxu0 %v5065_v50  ;;  %v6290_v59 = vpop.f32.mrf.mxu2  ;;  %v5041_v5 = vor.u32 %v5681_v47, %v5040_v62  ;;  %v4997_v8 = vor.u32 %v5668_v7, %v4994_v32  ;;  %v5165_v50 = vor.u32 %v5710_v45, %v5162_v46  ;;  %v5136_v47 = vld [vmem:[#allocation8 + $0x60] sm:$0xf]  ;;  %v5699_v7 = vld [vmem:[#allocation8 + $0x38] sm:$0xf0]  ;;  %v5100_v44 = vld [vmem:[#allocation8 + $0x18] sm:$0xf] }
 0x3a4   :  { %v2345_v11 = vadd.f32 %v5837_v61, %v2344_v30  ;;  %v5045_v30 = vor.u32 %v5680_v9, %v5042_v1  ;;  %v5705_v9 = vld [vmem:[#allocation8 + $0x68] sm:$0xf0]  ;;  %v2568_v60 = vadd.f32 %v6290_v59, %v6088_v2  ;;  %v5703_v59 = vld [vmem:[#allocation8 + $0x58] sm:$0xf0]  ;;  %v5696_v45 = vld [vmem:[#allocation8 + $0x20] sm:$0xf0] }
 0x3a5   :  { %v5137_v1 = vor.u32 %v5705_v9, %v5136_v47  ;;  %v5692_v9 = vld [vmem:[#allocation8 + $0x4] sm:$0xf] }
 0x3a6   :  { %v2349_v29 = vsel %vm2348_vm15, %v5837_v61, %v2345_v11  ;;  %v6292_v61 = vpop.f32.mrf.mxu3  ;;  %v5029_v11 = vor.u32 %v5678_v6, %v5028_v27  ;;  %v5144_v27 = vld [vmem:[#allocation8 + $0x68] sm:$0xf]  ;;  %v5706_v6 = vld [vmem:[#allocation8 + $0x70] sm:$0xf0] }
 0x3a7   :  { %v2354_v20 = vsel %vm2351_vm0, %v2353_v13, %v2349_v29  ;;  %3021 = vmatpush.bf16.msrb.mxu0 %v5053_v55  ;;  %v5016_v13 = vld [vmem:[#allocation6 + $0x30] sm:$0xf]  ;;  %v5150_v55 = vld [vmem:[#allocation8 + $0x84] sm:$0xf0]  ;;  %v2581_v28 = vadd.f32 %v6292_v61, %v6101_v4 }
 0x3a8   :  { %v2377_v24 = vmul.f32 %v2376_v17, %v2354_v20  ;;  %v5675_v17 = vld [vmem:[#allocation6 + $0x38] sm:$0xf0]  ;;  %v5018_v20 = vld [vmem:[#allocation6 + $0x3c] sm:$0xf0] }
 0x3a9   :  { %v5017_v29 = vor.u32 %v5675_v17, %v5016_v13  ;;  %v5124_v17 = vld [vmem:[#allocation8 + $0x48] sm:$0xf] }
 0x3aa   :  { %v2378_v40 = vadd.f32 %v2377_v24, %v2133_v19  ;;  %v5674_v19 = vld [vmem:[#allocation6 + $0x34] sm:$0xf]  ;;  %v5672_v24 = vld [vmem:[#allocation6 + $0x20] sm:$0xf0] }
 0x3ab   :  { %v2569_v63 = vpop.f32.mrf.mxu2  ;;  %3022 = vmatpush.bf16.msrb.mxu0 %v5041_v5  ;;  %v5021_v22 = vor.u32 %v5674_v19, %v5018_v20  ;;  %v5005_v26 = vor.u32 %v5672_v24, %v5004_v23  ;;  %v5704_v5 = vld [vmem:[#allocation8 + $0x64] sm:$0xf]  ;;  %v5702_v19 = vld [vmem:[#allocation8 + $0x50] sm:$0xf0]  ;;  %v5126_v24 = vld [vmem:[#allocation8 + $0x54] sm:$0xf0] }
 0x3ac   :  { %5838 = vtanh.f32 %v2378_v40  ;;  %v4992_v40 = vld [vmem:[#allocation6] sm:$0xf]  ;;  %v5709_v63 = vld [vmem:[#allocation8 + $0x88] sm:$0xf0]  ;;  %v5125_v23 = vor.u32 %v5702_v19, %v5124_v17 }
 0x3ad   :  { %v4993_v3 = vor.u32 %v5669_v42, %v4992_v40  ;;  %v5133_v40 = vor.u32 %v5703_v59, %v5132_v25  ;;  %v5112_v42 = vld [vmem:[#allocation8 + $0x30] sm:$0xf]  ;;  %v5679_v25 = vld [vmem:[#allocation6 + $0x58] sm:$0xf0] }
 0x3ae   :  { %v2582_v56 = vpop.f32.mrf.mxu3  ;;  %v5113_v32 = vor.u32 %v5699_v7, %v5112_v42  ;;  %v5676_v42 = vld [vmem:[#allocation6 + $0x40] sm:$0xf0] }
 0x3af   :  { %3023 = vmatpush.bf16.msrb.mxu0 %v5029_v11  ;;  %v5153_v56 = vor.u32 %v5707_v53, %v5150_v55  ;;  %v5145_v11 = vor.u32 %v5706_v6, %v5144_v27  ;;  %v5688_v53 = vld [vmem:[#allocation6 + $0xa0] sm:$0xf0]  ;;  %v5694_v27 = vld [vmem:[#allocation8 + $0x10] sm:$0xf0] }
 0x3b2   :  { %v5839_v33 = vpop.eup %5838 }
 0x3b3   :  { %v2381_v34 = vmul.f32 %v5839_v33, %v2380_v31  ;;  %3024 = vmatpush.bf16.msrb.mxu0 %v5017_v29  ;;  %v5172_v31 = vld [vmem:[#allocation8 + $0xa8] sm:$0xf]  ;;  %v5714_v33 = vld [vmem:[#allocation8 + $0xb0] sm:$0xf0]  ;;  %v5701_v29 = vld [vmem:[#allocation8 + $0x4c] sm:$0xf] }
 0x3b5   :  { %v2383_v58 = vadd.f32 %v2382_v35, %v2381_v34  ;;  %v5173_v34 = vor.u32 %v5714_v33, %v5172_v31  ;;  %v5713_v35 = vld [vmem:[#allocation8 + $0xac] sm:$0xf]  ;;  %v5114_v31 = vld [vmem:[#allocation8 + $0x3c] sm:$0xf0]  ;;  %v5120_v33 = vld [vmem:[#allocation8 + $0x38] sm:$0xf] }
 0x3b7   :  { %v6286_v36 = vsel %vm2391_vm5, %v2383_v58, %v6240_v15  ;;  %v2393_v37 = vsel %vm2391_vm5, %v2383_v58, 0.0  ;;  %v5686_v15 = vld [vmem:[#allocation6 + $0x94] sm:$0xf]  ;;  %3025 = vmatpush.bf16.msrb.mxu0 %v5005_v26  ;;  %v5174_v58 = vld [vmem:[#allocation8 + $0xb4] sm:$0xf0]  ;;  %3219 = vmatpush.bf16.msrb.mxu3 %v5173_v34  ;;  %v5129_v26 = vor.u32 %v5701_v29, %v5126_v24 }
 0x3b8   :  { %2395 = vst [vmem:[#allocation9 + $0x20] sm:$0xff] %v2393_v37  ;;  %v2597_v38 = vpack.c.bf16 %v6286_v36, %v6286_v36  ;;  %v5069_v18 = vor.u32 %v5686_v15, %v5066_v51  ;;  %v5180_v37 = vld [vmem:[#allocation8 + $0xb0] sm:$0xf]  ;;  %v5712_v15 = vld [vmem:[#allocation8 + $0xa0] sm:$0xf0] }
 0x3b9   :  { %v5181_v43 = vor.u32 %v5715_v21, %v5180_v37  ;;  %v5169_v51 = vor.u32 %v5712_v15, %v5168_v49  ;;  %v5084_v37 = vld [vmem:[#allocation6 + $0xb0] sm:$0xf]  ;;  %v5101_v49 = vor.u32 %v5696_v45, %v5100_v44  ;;  %v5102_v15 = vld [vmem:[#allocation8 + $0x24] sm:$0xf0] }
 0x3ba   :  { %2766 = vmatmul.bf16.vlgmr.msra.gmra.mxu1 %v2597_v38  ;;  %2779 = vmatmul.bf16.vlgmr.msra.gmra.mxu2 %v2597_v38  ;;  %v5048_v29 = vld [vmem:[#allocation6 + $0x68] sm:$0xf]  ;;  %v5036_v24 = vld [vmem:[#allocation6 + $0x50] sm:$0xf] }
 0x3bb   :  { %2792 = vmatmul.bf16.vlgmr.msra.gmra.mxu3 %v2597_v38  ;;  %3033 = vmatpush.bf16.msrb.mxu1 %v5069_v18  ;;  %v5177_v38 = vor.u32 %v5713_v35, %v5174_v58  ;;  %v5708_v18 = vld [vmem:[#allocation8 + $0x80] sm:$0xf0] }
 0x3bc   :  { %3026 = vmatpush.bf16.msrb.mxu0 %v4993_v3  ;;  %3220 = vmatpush.bf16.msrb.mxu3 %v5161_v48  ;;  %v5149_v54 = vor.u32 %v5708_v18, %v5148_v52  ;;  %v5698_v3 = vld [vmem:[#allocation8 + $0x34] sm:$0xf]  ;;  %v5695_v48 = vld [vmem:[#allocation8 + $0x1c] sm:$0xf]  ;;  %v5697_v52 = vld [vmem:[#allocation8 + $0x28] sm:$0xf0] }
 0x3bd   :  { %v5117_v35 = vor.u32 %v5698_v3, %v5114_v31  ;;  %v5072_v18 = vld [vmem:[#allocation6 + $0x98] sm:$0xf] }
 0x3bf   :  { %3034 = vmatpush.bf16.msrb.mxu1 %v5057_v57  ;;  %v5156_v57 = vld [vmem:[#allocation8 + $0x80] sm:$0xf] }
 0x3c0   :  { %3232 = vmatpush.bf16.msra.mxu0 %v5177_v38  ;;  %v5157_v62 = vor.u32 %v5709_v63, %v5156_v57  ;;  %3221 = vmatpush.bf16.msrb.mxu3 %v5149_v54  ;;  %v5691_v38 = vld [vmem:[#allocation6 + $0xb8] sm:$0xf0]  ;;  %v5073_v57 = vor.u32 %v5688_v53, %v5072_v18 }
 0x3c3   :  { %3035 = vmatpush.bf16.msrb.mxu1 %v5045_v30  ;;  %v5138_v30 = vld [vmem:[#allocation8 + $0x6c] sm:$0xf0] }
 0x3c4   :  { %3233 = vmatpush.bf16.msra.mxu0 %v5165_v50  ;;  %v5141_v10 = vor.u32 %v5704_v5, %v5138_v30  ;;  %3222 = vmatpush.bf16.msrb.mxu3 %v5137_v1  ;;  %v5108_v50 = vld [vmem:[#allocation8 + $0x20] sm:$0xf]  ;;  %v5090_v5 = vld [vmem:[#allocation8 + $0xc] sm:$0xf0]  ;;  %v5096_v1 = vld [vmem:[#allocation8 + $0x8] sm:$0xf] }
 0x3c5   :  { %v5109_v55 = vor.u32 %v5697_v52, %v5108_v50  ;;  %v5670_v50 = vld [vmem:[#allocation6 + $0x10] sm:$0xf0] }
 0x3c7   :  { %3036 = vmatpush.bf16.msrb.mxu1 %v5033_v12 }
 0x3c8   :  { %3234 = vmatpush.bf16.msra.mxu0 %v5153_v56  ;;  %3223 = vmatpush.bf16.msrb.mxu3 %v5125_v23  ;;  %v5088_v56 = vld [vmem:[#allocation8] sm:$0xf] }
 0x3cb   :  { %3037 = vmatpush.bf16.msrb.mxu1 %v5021_v22  ;;  %v6298_v22 = vld [vmem:[#allocation3 + $0x18] sm:$0xf] }
 0x3cc   :  { %3235 = vmatpush.bf16.msra.mxu0 %v5141_v10  ;;  %3224 = vmatpush.bf16.msrb.mxu3 %v5113_v32  ;;  %v5093_v10 = vor.u32 %v5692_v9, %v5090_v5 }
 0x3cd   :  { %3027 = vmatmul.bf16.vlgmr.msrb.gmra.mxu0 %v6298_v22 }
 0x3cf   :  { %3038 = vmatpush.bf16.msrb.mxu1 %v5009_v39 }
 0x3d0   :  { %3236 = vmatpush.bf16.msra.mxu0 %v5129_v26  ;;  %3225 = vmatpush.bf16.msrb.mxu3 %v5101_v49 }
 0x3d3   :  { %3039 = vmatpush.bf16.msrb.mxu1 %v4997_v8  ;;  %v5700_v8 = vld [vmem:[#allocation8 + $0x40] sm:$0xf0] }
 0x3d4   :  { %v5121_v58 = vor.u32 %v5700_v8, %v5120_v33  ;;  %3237 = vmatpush.bf16.msra.mxu0 %v5117_v35  ;;  %v5012_v35 = vld [vmem:[#allocation6 + $0x20] sm:$0xf] }
 0x3d6   :  { %3040 = vmatmul.bf16.vlgmr.msrb.gmra.mxu1 %v6298_v22 }
 0x3d7   :  { %3245 = vmatpush.bf16.msra.mxu1 %v5181_v43  ;;  %v5085_v43 = vor.u32 %v5691_v38, %v5084_v37 }
 0x3d9   :  { %3045 = vmatpush.bf16.msrb.mxu2 %v5085_v43 }
 0x3db   :  { %3246 = vmatpush.bf16.msra.mxu1 %v5169_v51  ;;  %v5105_v51 = vor.u32 %v5695_v48, %v5102_v15  ;;  %v5000_v15 = vld [vmem:[#allocation6 + $0x8] sm:$0xf] }
 0x3dd   :  { %3238 = vmatpush.bf16.msra.mxu0 %v5105_v51  ;;  %3046 = vmatpush.bf16.msrb.mxu2 %v5073_v57  ;;  %v2851_v57 = vpop.permute.xlu2 %2850 }
 0x3de   :  { %vm2852_vm14 = vcmp.eq.s32.totalorder %v2851_v57, 1 }
 0x3df   :  { %3247 = vmatpush.bf16.msra.mxu1 %v5157_v62  ;;  %v5693_v62 = vld [vmem:[#allocation8 + $0x8] sm:$0xf0] }
 0x3e0   :  { %v5089_v47 = vor.u32 %v5693_v62, %v5088_v56 }
 0x3e1   :  { %3239 = vmatpush.bf16.msra.mxu0 %v5093_v10  ;;  %v5259_v10 = vld [vmem:[#allocation6 + $0x90] sm:$0xf] }
 0x3e2   :  { %3226 = vmatpush.bf16.msrb.mxu3 %v5089_v47 }
 0x3e3   :  { %3248 = vmatpush.bf16.msra.mxu1 %v5145_v11  ;;  %v5097_v11 = vor.u32 %v5694_v27, %v5096_v1  ;;  %v5271_v1 = vld [vmem:[#allocation6 + $0xa8] sm:$0xf] }
 0x3e7   :  { %3249 = vmatpush.bf16.msra.mxu1 %v5133_v40  ;;  %v5024_v40 = vld [vmem:[#allocation6 + $0x38] sm:$0xf] }
 0x3e8   :  { %v5025_v33 = vor.u32 %v5676_v42, %v5024_v40  ;;  %v5235_v40 = vld [vmem:[#allocation6 + $0x60] sm:$0xf]  ;;  %v5729_v42 = vld [vmem:[#allocation6 + $0x68] sm:$0xf0] }
 0x3eb   :  { %3250 = vmatpush.bf16.msra.mxu1 %v5121_v58  ;;  %v5673_v58 = vld [vmem:[#allocation6 + $0x28] sm:$0xf0] }
 0x3ec   :  { %v5013_v45 = vor.u32 %v5673_v58, %v5012_v35  ;;  %v5225_v58 = vld [vmem:[#allocation6 + $0x54] sm:$0xf0] }
 0x3ef   :  { %3251 = vmatpush.bf16.msra.mxu1 %v5109_v55 }
 0x3f3   :  { %3252 = vmatpush.bf16.msra.mxu1 %v5097_v11  ;;  %v5735_v11 = vld [vmem:[#allocation6 + $0x98] sm:$0xf0] }
 0x41b   :  { %v6294_v0 = vpop.f32.mrf.mxu0 }
 0x41c   :  { %v2594_v38 = vadd.f32 %v6294_v0, %v6125_v16  ;;  %v5001_v0 = vor.u32 %v5670_v50, %v5000_v15  ;;  %v5201_v50 = vld [vmem:[#allocation6 + $0x24] sm:$0xf0] }
 0x423   :  { %v2595_v13 = vpop.f32.mrf.mxu0 }
 0x437   :  { %v2767_v12 = vpop.f32.mrf.mxu1 }
 0x438   :  { %v2797_v20 = vadd.f32 %v2767_v12, %v2568_v60  ;;  %v5060_v60 = vld [vmem:[#allocation6 + $0x80] sm:$0xf]  ;;  %v5685_v12 = vld [vmem:[#allocation6 + $0x88] sm:$0xf0] }
 0x439   :  { %v5061_v13 = vor.u32 %v5685_v12, %v5060_v60  ;;  %v5734_v12 = vld [vmem:[#allocation6 + $0x94] sm:$0xf] }
 0x43a   :  { %v4987_v39 = vmul.f32 -1.442695, %v2797_v20  ;;  %v5682_v20 = vld [vmem:[#allocation6 + $0x70] sm:$0xf0] }
 0x43b   :  { %3047 = vmatpush.bf16.msrb.mxu2 %v5061_v13  ;;  %v5049_v23 = vor.u32 %v5682_v20, %v5048_v29  ;;  %v5261_v13 = vld [vmem:[#allocation6 + $0x9c] sm:$0xf0] }
 0x43c   :  { %5840 = vpow2.f32 %v4987_v39 }
 0x43d   :  { %v2780_v34 = vpop.f32.mrf.mxu2 }
 0x43e   :  { %v2817_v21 = vadd.f32 %v2780_v34, %v2581_v28  ;;  %v6304_v61 = vpop.f32.mrf.mxu3  ;;  %v5037_v28 = vor.u32 %v5679_v25, %v5036_v24  ;;  %v5247_v24 = vld [vmem:[#allocation6 + $0x78] sm:$0xf]  ;;  %v5732_v25 = vld [vmem:[#allocation6 + $0x80] sm:$0xf0] }
 0x43f   :  { %v2769_v41 = vpop.f32.mrf.mxu1  ;;  %3048 = vmatpush.bf16.msrb.mxu2 %v5049_v23 }
 0x440   :  { %v4988_v46 = vmul.f32 -1.442695, %v2817_v21  ;;  %v2837_v41 = vadd.f32 %v6271_v14, %v6304_v61 }
 0x442   :  { %v5841_v54 = vpop.eup %5840  ;;  %5842 = vpow2.f32 %v4988_v46 }
 0x443   :  { %v2801_v63 = vadd.f32 1.0, %v5841_v54  ;;  %3049 = vmatpush.bf16.msrb.mxu2 %v5037_v28  ;;  %v5249_v28 = vld [vmem:[#allocation6 + $0x84] sm:$0xf0] }
 0x445   :  { %5844 = vrcp.f32 %v2801_v63  ;;  %v2782_v30 = vpop.f32.mrf.mxu2  ;;  %v2813_v7 = vand.u32 2147483648, %v2801_v63  ;;  %v2811_v32 = vand.u32 2147483647, %v2801_v63  ;;  %vm2807_vm7 = vweird.f32 %v2801_v63 }
 0x446   :  { %v2795_v6 = vpop.f32.mrf.mxu3  ;;  %v5738_v30 = vld [vmem:[#allocation6 + $0xb0] sm:$0xf0] }
 0x447   :  { %v2814_v37 = vor.u32 1.1754944e-38, %v2813_v7  ;;  %vm2812_vm9 = vcmp.eq.f32.partialorder %v2811_v32, 8.507059e+37  ;;  %3050 = vmatpush.bf16.msrb.mxu2 %v5025_v33  ;;  %v5272_v27 = vor.u32 %v5738_v30, %v5271_v1  ;;  %v5273_v6 = vld [vmem:[#allocation6 + $0xb4] sm:$0xf0]  ;;  %v5728_v7 = vld [vmem:[#allocation6 + $0x64] sm:$0xf] }
 0x448   :  { %v5843_v17 = vpop.eup %5842  ;;  %v5237_v32 = vld [vmem:[#allocation6 + $0x6c] sm:$0xf0]  ;;  %v5223_v33 = vld [vmem:[#allocation6 + $0x48] sm:$0xf] }
 0x449   :  { %v2821_v19 = vadd.f32 1.0, %v5843_v17  ;;  %v5264_v17 = vor.u32 %v5734_v12, %v5261_v13  ;;  %v5355_v30 = vld [vmem:[#allocation8 + $0x90] sm:$0xf] }
 0x44b   :  { %v5845_v26 = vpop.eup %5844  ;;  %5846 = vrcp.f32 %v2821_v19  ;;  %v2833_v46 = vand.u32 2147483648, %v2821_v19  ;;  %v2831_v51 = vand.u32 2147483647, %v2821_v19  ;;  %vm2827_vm11 = vweird.f32 %v2821_v19  ;;  %3051 = vmatpush.bf16.msrb.mxu2 %v5013_v45 }
 0x44c   :  { %v2803_v59 = vmul.f32 %v5845_v26, %v2801_v63  ;;  %vm2808_vm6 = vweird.f32 %v5845_v26 }
 0x44d   :  { %vm2809_vm8 = vmor %vm2807_vm7, %vm2808_vm6  ;;  %v2834_v53 = vor.u32 1.1754944e-38, %v2833_v46  ;;  %vm2832_vm13 = vcmp.eq.f32.partialorder %v2831_v51, 8.507059e+37  ;;  %v5720_v46 = vld [vmem:[#allocation6 + $0x20] sm:$0xf0] }
 0x44e   :  { %v2804_v39 = vsub.f32 1.0, %v2803_v59  ;;  %v5248_v59 = vor.u32 %v5732_v25, %v5247_v24  ;;  %v5755_v24 = vld [vmem:[#allocation8 + $0x7c] sm:$0xf] }
 0x44f   :  { %3052 = vmatpush.bf16.msrb.mxu2 %v5001_v0  ;;  %v5716_v0 = vld [vmem:[#allocation6 + $0x4] sm:$0xf] }
 0x450   :  { %v2805_v3 = vmul.f32 %v5845_v26, %v2804_v39 }
 0x451   :  { %v5847_v31 = vpop.eup %5846 }
 0x452   :  { %v2823_v8 = vmul.f32 %v5847_v31, %v2821_v19  ;;  %v2806_v34 = vadd.f32 %v5845_v26, %v2805_v3  ;;  %vm2828_vm10 = vweird.f32 %v5847_v31  ;;  %3053 = vmatmul.bf16.vlgmr.msrb.gmra.mxu2 %v6298_v22  ;;  %v5737_v22 = vld [vmem:[#allocation6 + $0xac] sm:$0xf]  ;;  %v6317_v19 = vpop.f32.mrf.mxu0  ;;  %v5236_v3 = vor.u32 %v5729_v42, %v5235_v40 }
 0x453   :  { %vm2829_vm12 = vmor %vm2827_vm11, %vm2828_vm10  ;;  %v5276_v60 = vor.u32 %v5737_v22, %v5273_v6  ;;  %3480 = vmatpush.bf16.msra.mxu2 %v5272_v27  ;;  %v6319_v29 = vpop.f32.mrf.mxu1  ;;  %v5759_v22 = vld [vmem:[#allocation8 + $0x98] sm:$0xf0]  ;;  %v5758_v27 = vld [vmem:[#allocation8 + $0x94] sm:$0xf] }
 0x454   :  { %v2824_v21 = vsub.f32 1.0, %v2823_v8  ;;  %v2810_v43 = vsel %vm2809_vm8, %v5845_v26, %v2806_v34  ;;  %v5731_v26 = vld [vmem:[#allocation6 + $0x7c] sm:$0xf]  ;;  %v5726_v8 = vld [vmem:[#allocation6 + $0x50] sm:$0xf0]  ;;  %v5356_v6 = vor.u32 %v5759_v22, %v5355_v30 }
 0x455   :  { %v2815_v44 = vsel %vm2812_vm9, %v2814_v37, %v2810_v43  ;;  %3493 = vmatpush.bf16.msra.mxu3 %v5276_v60  ;;  %v5252_v39 = vor.u32 %v5731_v26, %v5249_v28  ;;  %v5725_v34 = vld [vmem:[#allocation6 + $0x4c] sm:$0xf]  ;;  %v5224_v35 = vor.u32 %v5726_v8, %v5223_v33  ;;  %v5722_v43 = vld [vmem:[#allocation6 + $0x34] sm:$0xf]  ;;  %v5760_v60 = vld [vmem:[#allocation8 + $0xa0] sm:$0xf0] }
 0x456   :  { %v2825_v48 = vmul.f32 %v5847_v31, %v2824_v21  ;;  %v2838_v49 = vmul.f32 %v2837_v41, %v2815_v44  ;;  %v5228_v37 = vor.u32 %v5725_v34, %v5225_v58  ;;  %v5723_v21 = vld [vmem:[#allocation6 + $0x38] sm:$0xf0]  ;;  %v5213_v44 = vld [vmem:[#allocation6 + $0x3c] sm:$0xf0]  ;;  %v5345_v26 = vld [vmem:[#allocation8 + $0x84] sm:$0xf0] }
 0x457   :  { %v5216_v45 = vor.u32 %v5722_v43, %v5213_v44  ;;  %v5757_v28 = vld [vmem:[#allocation8 + $0x88] sm:$0xf0]  ;;  %v5348_v40 = vor.u32 %v5755_v24, %v5345_v26  ;;  %v5752_v34 = vld [vmem:[#allocation8 + $0x64] sm:$0xf]  ;;  %v5279_v22 = vld [vmem:[#allocation6 + $0xb0] sm:$0xf] }
 0x458   :  { %v2826_v52 = vadd.f32 %v5847_v31, %v2825_v48  ;;  %v2839_v18 = vadd.f32 %v2838_v49, %v2594_v38  ;;  %v5211_v38 = vld [vmem:[#allocation6 + $0x30] sm:$0xf]  ;;  %v5199_v48 = vld [vmem:[#allocation6 + $0x18] sm:$0xf]  ;;  %v5719_v49 = vld [vmem:[#allocation6 + $0x1c] sm:$0xf] }
 0x459   :  { %3494 = vmatpush.bf16.msra.mxu3 %v5264_v17  ;;  %v5212_v41 = vor.u32 %v5723_v21, %v5211_v38  ;;  %v5200_v15 = vor.u32 %v5720_v46, %v5199_v48  ;;  %v5204_v51 = vor.u32 %v5719_v49, %v5201_v50  ;;  %v5754_v38 = vld [vmem:[#allocation8 + $0x70] sm:$0xf0]  ;;  %v3029_v21 = vadd.f32 %v6317_v19, %v6088_v2  ;;  %v5749_v46 = vld [vmem:[#allocation8 + $0x4c] sm:$0xf]  ;;  %v5321_v50 = vld [vmem:[#allocation8 + $0x54] sm:$0xf0] }
 0x45a   :  { %v2830_v54 = vsel %vm2829_vm12, %v5847_v31, %v2826_v52  ;;  %5848 = vtanh.f32 %v2839_v18  ;;  %v3030_v20 = vpop.f32.mrf.mxu0  ;;  %v5240_v31 = vor.u32 %v5728_v7, %v5237_v32  ;;  %v5187_v52 = vld [vmem:[#allocation6] sm:$0xf]  ;;  %v5717_v18 = vld [vmem:[#allocation6 + $0x8] sm:$0xf0]  ;;  %v5750_v48 = vld [vmem:[#allocation8 + $0x50] sm:$0xf0] }
 0x45b   :  { %v2835_v14 = vsel %vm2832_vm13, %v2834_v53, %v2830_v54  ;;  %v3043_v23 = vpop.f32.mrf.mxu1  ;;  %v5188_v53 = vor.u32 %v5717_v18, %v5187_v52  ;;  %v5189_v54 = vld [vmem:[#allocation6 + $0xc] sm:$0xf0]  ;;  %v5343_v20 = vld [vmem:[#allocation8 + $0x78] sm:$0xf]  ;;  %v5331_v32 = vld [vmem:[#allocation8 + $0x60] sm:$0xf] }
 0x45c   :  { %v2841_v61 = vsub.f32 1.0, %v2835_v14  ;;  %v2843_v56 = vmul.f32 %v2835_v14, %v6286_v36  ;;  %v5367_v14 = vld [vmem:[#allocation8 + $0xa8] sm:$0xf]  ;;  %v5756_v23 = vld [vmem:[#allocation8 + $0x80] sm:$0xf0] }
 0x45d   :  { %3495 = vmatpush.bf16.msra.mxu3 %v5252_v39  ;;  %v5344_v25 = vor.u32 %v5756_v23, %v5343_v20  ;;  %v5751_v52 = vld [vmem:[#allocation8 + $0x58] sm:$0xf0]  ;;  %v5303_v23 = vld [vmem:[#allocation8 + $0x20] sm:$0xf]  ;;  %v5745_v24 = vld [vmem:[#allocation8 + $0x28] sm:$0xf0] }
 0x45e   :  { %v5304_v26 = vor.u32 %v5745_v24, %v5303_v23 }
 0x460   :  { %v5849_v55 = vpop.eup %5848 }
 0x461   :  { %v2842_v63 = vmul.f32 %v5849_v55, %v2841_v61  ;;  %3496 = vmatpush.bf16.msra.mxu3 %v5240_v31  ;;  %v5762_v61 = vld [vmem:[#allocation8 + $0xb0] sm:$0xf0]  ;;  %v5192_v55 = vor.u32 %v5716_v0, %v5189_v54  ;;  %v5753_v31 = vld [vmem:[#allocation8 + $0x68] sm:$0xf0]  ;;  %v5324_v0 = vor.u32 %v5749_v46, %v5321_v50  ;;  %v5231_v46 = vld [vmem:[#allocation6 + $0x50] sm:$0xf] }
 0x462   :  { %v5368_v57 = vor.u32 %v5762_v61, %v5367_v14  ;;  %v5332_v8 = vor.u32 %v5753_v31, %v5331_v32  ;;  %v5307_v14 = vld [vmem:[#allocation8 + $0x30] sm:$0xf]  ;;  %v5747_v61 = vld [vmem:[#allocation8 + $0x38] sm:$0xf0]  ;;  %v5740_v31 = vld [vmem:[#allocation8 + $0x4] sm:$0xf] }
 0x463   :  { %v2844_v62 = vadd.f32 %v2843_v56, %v2842_v63  ;;  %v5761_v63 = vld [vmem:[#allocation8 + $0xac] sm:$0xf]  ;;  %v5369_v56 = vld [vmem:[#allocation8 + $0xb4] sm:$0xf0] }
 0x464   :  { %3680 = vmatpush.bf16.msrb.mxu1 %v5368_v57 }
 0x465   :  { %v2854_v47 = vsel %vm2852_vm14, %v2844_v62, 0.0  ;;  %v6313_v9 = vsel %vm2852_vm14, %v2844_v62, %v6286_v36  ;;  %v5260_v36 = vor.u32 %v5735_v11, %v5259_v10  ;;  %3497 = vmatpush.bf16.msra.mxu3 %v5228_v37  ;;  %v5375_v62 = vld [vmem:[#allocation8 + $0xb0] sm:$0xf]  ;;  %v5357_v10 = vld [vmem:[#allocation8 + $0x9c] sm:$0xf0] }
 0x466   :  { %2856 = vst [vmem:[#allocation9 + $0x28] sm:$0xff] %v2854_v47  ;;  %v3058_v5 = vpack.c.bf16 %v6313_v9, %v6313_v9  ;;  %v5372_v47 = vor.u32 %v5761_v63, %v5369_v56  ;;  %v5363_v11 = vld [vmem:[#allocation8 + $0x98] sm:$0xf]  ;;  %v5360_v12 = vor.u32 %v5758_v27, %v5357_v10  ;;  %v5339_v37 = vld [vmem:[#allocation8 + $0x68] sm:$0xf]  ;;  %v5308_v63 = vor.u32 %v5747_v61, %v5307_v14 }
 0x467   :  { %3481 = vmatpush.bf16.msra.mxu2 %v5260_v36  ;;  %v5364_v13 = vor.u32 %v5760_v60, %v5363_v11  ;;  %v3042_v36 = vadd.f32 %v6319_v29, %v6101_v4  ;;  %v6327_v29 = vld [vmem:[#allocation3 + $0x1c] sm:$0xf]  ;;  %v5340_v43 = vor.u32 %v5754_v38, %v5339_v37  ;;  %v5309_v56 = vld [vmem:[#allocation8 + $0x3c] sm:$0xf0]  ;;  %v5295_v11 = vld [vmem:[#allocation8 + $0x18] sm:$0xf] }
 0x468   :  { %3227 = vmatmul.bf16.vlgmr.msrb.gmra.mxu3 %v3058_v5  ;;  %3240 = vmatmul.bf16.vlgmr.msra.gmra.mxu0 %v3058_v5  ;;  %v5739_v27 = vld [vmem:[#allocation6 + $0xb8] sm:$0xf0]  ;;  %v5744_v60 = vld [vmem:[#allocation8 + $0x20] sm:$0xf0]  ;;  %v5255_v38 = vld [vmem:[#allocation6 + $0x80] sm:$0xf] }
 0x469   :  { %3253 = vmatmul.bf16.vlgmr.msra.gmra.mxu1 %v3058_v5  ;;  %3498 = vmatpush.bf16.msra.mxu3 %v5216_v45  ;;  %v5763_v5 = vld [vmem:[#allocation8 + $0xb8] sm:$0xf0]  ;;  %v5319_v45 = vld [vmem:[#allocation8 + $0x48] sm:$0xf] }
 0x46a   :  { %v5376_v1 = vor.u32 %v5763_v5, %v5375_v62  ;;  %3681 = vmatpush.bf16.msrb.mxu1 %v5356_v6  ;;  %v5315_v62 = vld [vmem:[#allocation8 + $0x38] sm:$0xf]  ;;  %v5280_v6 = vor.u32 %v5739_v27, %v5279_v22 }
 0x46b   :  { %3482 = vmatpush.bf16.msra.mxu2 %v5248_v59  ;;  %v5351_v59 = vld [vmem:[#allocation8 + $0x80] sm:$0xf] }
 0x46c   :  { %v5352_v42 = vor.u32 %v5757_v28, %v5351_v59  ;;  %3506 = vmatpush.bf16.msrb.mxu0 %v5280_v6  ;;  %v5267_v59 = vld [vmem:[#allocation6 + $0x98] sm:$0xf]  ;;  %v5736_v28 = vld [vmem:[#allocation6 + $0xa0] sm:$0xf0] }
 0x46d   :  { %3499 = vmatpush.bf16.msra.mxu3 %v5204_v51  ;;  %v5327_v51 = vld [vmem:[#allocation8 + $0x50] sm:$0xf] }
 0x46e   :  { %3682 = vmatpush.bf16.msrb.mxu1 %v5344_v25 }
 0x46f   :  { %3483 = vmatpush.bf16.msra.mxu2 %v5236_v3 }
 0x471   :  { %3500 = vmatpush.bf16.msra.mxu3 %v5192_v55  ;;  %v5746_v55 = vld [vmem:[#allocation8 + $0x34] sm:$0xf] }
 0x472   :  { %3683 = vmatpush.bf16.msrb.mxu1 %v5332_v8  ;;  %v5291_v8 = vld [vmem:[#allocation8 + $0x8] sm:$0xf] }
 0x473   :  { %3484 = vmatpush.bf16.msra.mxu2 %v5224_v35  ;;  %v5333_v35 = vld [vmem:[#allocation8 + $0x6c] sm:$0xf0] }
 0x474   :  { %v5336_v58 = vor.u32 %v5752_v34, %v5333_v35  ;;  %v5742_v34 = vld [vmem:[#allocation8 + $0x10] sm:$0xf0] }
 0x475   :  { %3706 = vmatpush.bf16.msrb.mxu3 %v5376_v1  ;;  %v5312_v1 = vor.u32 %v5746_v55, %v5309_v56  ;;  %v5292_v37 = vor.u32 %v5742_v34, %v5291_v8  ;;  %v5721_v56 = vld [vmem:[#allocation6 + $0x28] sm:$0xf0] }
 0x477   :  { %3485 = vmatpush.bf16.msra.mxu2 %v5212_v41 }
 0x478   :  { %3501 = vmatmul.bf16.vlgmr.msra.gmra.mxu3 %v6327_v29 }
 0x479   :  { %3707 = vmatpush.bf16.msrb.mxu3 %v5364_v13  ;;  %v5297_v13 = vld [vmem:[#allocation8 + $0x24] sm:$0xf0] }
 0x47b   :  { %3486 = vmatpush.bf16.msra.mxu2 %v5200_v15  ;;  %v5320_v15 = vor.u32 %v5750_v48, %v5319_v45  ;;  %v5730_v45 = vld [vmem:[#allocation6 + $0x70] sm:$0xf0] }
 0x47d   :  { %3708 = vmatpush.bf16.msrb.mxu3 %v5352_v42  ;;  %3684 = vmatpush.bf16.msrb.mxu1 %v5320_v15  ;;  %v5283_v42 = vld [vmem:[#allocation8] sm:$0xf] }
 0x47f   :  { %3487 = vmatpush.bf16.msra.mxu2 %v5188_v53  ;;  %v5328_v53 = vor.u32 %v5751_v52, %v5327_v51 }
 0x481   :  { %3709 = vmatpush.bf16.msrb.mxu3 %v5340_v43  ;;  %3685 = vmatpush.bf16.msrb.mxu1 %v5308_v63  ;;  %v5207_v63 = vld [vmem:[#allocation6 + $0x20] sm:$0xf] }
 0x482   :  { %3488 = vmatmul.bf16.vlgmr.msra.gmra.mxu2 %v6327_v29 }
 0x483   :  { %3693 = vmatpush.bf16.msrb.mxu2 %v5372_v47  ;;  %v5748_v47 = vld [vmem:[#allocation8 + $0x40] sm:$0xf0] }
 0x484   :  { %v5316_v30 = vor.u32 %v5748_v47, %v5315_v62  ;;  %v6344_v47 = vld [vmem:[%s6380_s5] ss:$0 sm:$0xff]  ;;  %s6012_s5 = smov [#allocation9]  }
 0x485   :  { %3710 = vmatpush.bf16.msrb.mxu3 %v5328_v53  ;;  %v5724_v53 = vld [vmem:[#allocation6 + $0x40] sm:$0xf0]  ;;  %s3788_s8 = sshll.u32 %s6012_s5, 4  ;;  %s3789_s8 = int_to_ptr.vmem [resolvable:$true] %s3788_s8 }
 0x487   :  { %3694 = vmatpush.bf16.msrb.mxu2 %v5360_v12  ;;  %v5743_v12 = vld [vmem:[#allocation8 + $0x1c] sm:$0xf] }
 0x488   :  { %v5300_v20 = vor.u32 %v5743_v12, %v5297_v13  ;;  %v5195_v12 = vld [vmem:[#allocation6 + $0x8] sm:$0xf]  ;;  %v5718_v13 = vld [vmem:[#allocation6 + $0x10] sm:$0xf0] }
 0x489   :  { %3711 = vmatpush.bf16.msrb.mxu3 %v5316_v30 }
 0x48b   :  { %3695 = vmatpush.bf16.msrb.mxu2 %v5348_v40  ;;  %v5268_v40 = vor.u32 %v5736_v28, %v5267_v59  ;;  %v3312_v59 = vpop.permute.xlu0 %3311 }
 0x48c   :  { %vm3313_vm7 = vcmp.eq.s32.totalorder %v3312_v59, 1 }
 0x48d   :  { %3712 = vmatpush.bf16.msrb.mxu3 %v5304_v26  ;;  %3507 = vmatpush.bf16.msrb.mxu0 %v5268_v40 }
 0x48f   :  { %3696 = vmatpush.bf16.msrb.mxu2 %v5336_v58 }
 0x491   :  { %3713 = vmatpush.bf16.msrb.mxu3 %v5292_v37 }
 0x493   :  { %3697 = vmatpush.bf16.msrb.mxu2 %v5324_v0  ;;  %v5219_v0 = vld [vmem:[#allocation6 + $0x38] sm:$0xf] }
 0x494   :  { %v5220_v55 = vor.u32 %v5724_v53, %v5219_v0 }
 0x497   :  { %3698 = vmatpush.bf16.msrb.mxu2 %v5312_v1 }
 0x49b   :  { %3699 = vmatpush.bf16.msrb.mxu2 %v5300_v20  ;;  %v5196_v20 = vor.u32 %v5718_v13, %v5195_v12 }
 0x4d5   :  { %v6323_v17 = vpop.f32.mrf.mxu2 }
 0x4d6   :  { %v3055_v30 = vadd.f32 %v6323_v17, %v6125_v16 }
 0x4dd   :  { %v3056_v44 = vpop.f32.mrf.mxu2 }
 0x4de   :  { %v5243_v44 = vld [vmem:[#allocation6 + $0x68] sm:$0xf] }
 0x4df   :  { %v5244_v48 = vor.u32 %v5730_v45, %v5243_v44 }
 0x4e5   :  { %v3241_v39 = vpop.f32.mrf.mxu0 }
 0x4e6   :  { %v3278_v7 = vadd.f32 %v3241_v39, %v3042_v36  ;;  %v6325_v3 = vpop.f32.mrf.mxu1  ;;  %v5296_v36 = vor.u32 %v5744_v60, %v5295_v11 }
 0x4e7   :  { %v3298_v1 = vadd.f32 %v6344_v47, %v6325_v3 }
 0x4e8   :  { %v5183_v33 = vmul.f32 -1.442695, %v3278_v7  ;;  %3686 = vmatpush.bf16.msrb.mxu1 %v5296_v36  ;;  %v5741_v7 = vld [vmem:[#allocation8 + $0x8] sm:$0xf0] }
 0x4e9   :  { %v5284_v32 = vor.u32 %v5741_v7, %v5283_v42 }
 0x4ea   :  { %5850 = vpow2.f32 %v5183_v33  ;;  %v5285_v33 = vld [vmem:[#allocation8 + $0xc] sm:$0xf0] }
 0x4eb   :  { %v3228_v41 = vpop.f32.mrf.mxu3  ;;  %v5288_v58 = vor.u32 %v5740_v31, %v5285_v33 }
 0x4ec   :  { %v3258_v49 = vadd.f32 %v3228_v41, %v3029_v21  ;;  %v5733_v21 = vld [vmem:[#allocation6 + $0x88] sm:$0xf0]  ;;  %3687 = vmatpush.bf16.msrb.mxu1 %v5284_v32 }
 0x4ed   :  { %v3243_v18 = vpop.f32.mrf.mxu0  ;;  %v5256_v43 = vor.u32 %v5733_v21, %v5255_v38  ;;  %3700 = vmatpush.bf16.msrb.mxu2 %v5288_v58 }
 0x4ee   :  { %v5182_v54 = vmul.f32 -1.442695, %v3258_v49  ;;  %v3256_v19 = vpop.f32.mrf.mxu1  ;;  %v5727_v49 = vld [vmem:[#allocation6 + $0x58] sm:$0xf0] }
 0x4ef   :  { %3508 = vmatpush.bf16.msrb.mxu0 %v5256_v43  ;;  %v5232_v52 = vor.u32 %v5727_v49, %v5231_v46 }
 0x4f0   :  { %v5851_v57 = vpop.eup %5850  ;;  %5852 = vpow2.f32 %v5182_v54 }
 0x4f1   :  { %v6333_v5 = vadd.f32 1.0, %v5851_v57 }
 0x4f3   :  { %v3230_v10 = vpop.f32.mrf.mxu3  ;;  %5854 = vrcp.f32 %v6333_v5  ;;  %3509 = vmatpush.bf16.msrb.mxu0 %v5244_v48  ;;  %v3294_v11 = vand.u32 2147483648, %v6333_v5  ;;  %vm3288_vm4 = vweird.f32 %v6333_v5  ;;  %v3292_v3 = vand.u32 2147483647, %v6333_v5 }
 0x4f4   :  { %v5208_v10 = vor.u32 %v5721_v56, %v5207_v63 }
 0x4f5   :  { %v3295_v23 = vor.u32 1.1754944e-38, %v3294_v11  ;;  %vm3293_vm6 = vcmp.eq.f32.partialorder %v3292_v3, 8.507059e+37 }
 0x4f6   :  { %v5853_v25 = vpop.eup %5852 }
 0x4f7   :  { %v3262_v39 = vadd.f32 1.0, %v5853_v25  ;;  %3510 = vmatpush.bf16.msrb.mxu0 %v5232_v52 }
 0x4f9   :  { %5856 = vrcp.f32 %v3262_v39  ;;  %v6336_v35 = vpop.eup %5854  ;;  %v3274_v54 = vand.u32 2147483648, %v3262_v39  ;;  %v3272_v14 = vand.u32 2147483647, %v3262_v39  ;;  %vm3268_vm0 = vweird.f32 %v3262_v39 }
 0x4fa   :  { %v3284_v41 = vmul.f32 %v6336_v35, %v6333_v5  ;;  %vm3289_vm3 = vweird.f32 %v6336_v35 }
 0x4fb   :  { %v3275_v62 = vor.u32 1.1754944e-38, %v3274_v54  ;;  %vm3273_vm2 = vcmp.eq.f32.partialorder %v3272_v14, 8.507059e+37  ;;  %3511 = vmatpush.bf16.msrb.mxu0 %v5220_v55  ;;  %vm3290_vm5 = vmor %vm3288_vm4, %vm3289_vm3  ;;  %v3502_v31 = vpop.f32.mrf.mxu3 }
 0x4fc   :  { %v3285_v51 = vsub.f32 1.0, %v3284_v41 }
 0x4fe   :  { %v3286_v61 = vmul.f32 %v6336_v35, %v3285_v51 }
 0x4ff   :  { %v5857_v15 = vpop.eup %5856  ;;  %3512 = vmatpush.bf16.msrb.mxu0 %v5208_v10 }
 0x500   :  { %v3264_v50 = vmul.f32 %v5857_v15, %v3262_v39  ;;  %vm3269_vm15 = vweird.f32 %v5857_v15  ;;  %v3287_v6 = vadd.f32 %v6336_v35, %v3286_v61 }
 0x501   :  { %vm3270_vm1 = vmor %vm3268_vm0, %vm3269_vm15 }
 0x502   :  { %v3265_v18 = vsub.f32 1.0, %v3264_v50  ;;  %v3291_v36 = vsel %vm3290_vm5, %v6336_v35, %v3287_v6 }
 0x503   :  { %v3296_v24 = vsel %vm3293_vm6, %v3295_v23, %v3291_v36  ;;  %3513 = vmatpush.bf16.msrb.mxu0 %v5196_v20  ;;  %v3504_v33 = vpop.f32.mrf.mxu3 }
 0x504   :  { %v3266_v19 = vmul.f32 %v5857_v15, %v3265_v18  ;;  %v3302_v25 = vsub.f32 1.0, %v3296_v24  ;;  %v3304_v39 = vmul.f32 %v3296_v24, %v6313_v9 }
 0x505   :  { %v3489_v32 = vpop.f32.mrf.mxu2 }
 0x506   :  { %v3267_v57 = vadd.f32 %v5857_v15, %v3266_v19  ;;  %3514 = vmatmul.bf16.vlgmr.msrb.gmra.mxu0 %v6327_v29  ;;  %v3490_v34 = vadd.f32 %v3489_v32, %v6088_v2 }
 0x508   :  { %v3271_v22 = vsel %vm3270_vm1, %v5857_v15, %v3267_v57 }
 0x509   :  { %v3276_v27 = vsel %vm3273_vm2, %v3275_v62, %v3271_v22 }
 0x50a   :  { %v3299_v60 = vmul.f32 %v3298_v1, %v3276_v27 }
 0x50c   :  { %v3300_v17 = vadd.f32 %v3299_v60, %v3055_v30 }
 0x50d   :  { %v3491_v29 = vpop.f32.mrf.mxu2 }
 0x50e   :  { %5858 = vtanh.f32 %v3300_v17 }
 0x514   :  { %v5859_v26 = vpop.eup %5858 }
 0x515   :  { %v3303_v28 = vmul.f32 %v5859_v26, %v3302_v25 }
 0x517   :  { %v3305_v5 = vadd.f32 %v3304_v39, %v3303_v28 }
 0x519   :  { %v3315_v40 = vsel %vm3313_vm7, %v3305_v5, 0.0  ;;  %v6359_v42 = vsel %vm3313_vm7, %v3305_v5, %v6313_v9  ;;  %v3503_v9 = vadd.f32 %v3502_v31, %v6101_v4 }
 0x51a   :  { %3317 = vst [vmem:[#allocation9 + $0x30] sm:$0xff] %v3315_v40  ;;  %v3519_v7 = vpack.c.bf16 %v6359_v42, %v6359_v42 }
 0x51c   :  { %3688 = vmatmul.bf16.vlgmr.msrb.gmra.mxu1 %v3519_v7  ;;  %3701 = vmatmul.bf16.vlgmr.msrb.gmra.mxu2 %v3519_v7 }
 0x51d   :  { %3714 = vmatmul.bf16.vlgmr.msrb.gmra.mxu3 %v3519_v7 }
 0x583   :  { %v3515_v8 = vpop.f32.mrf.mxu0 }
 0x584   :  { %v3516_v55 = vadd.f32 %v3515_v8, %v6125_v16 }
 0x58b   :  { %v3517_v58 = vpop.f32.mrf.mxu0 }
 0x599   :  { %v3689_v35 = vpop.f32.mrf.mxu1 }
 0x59a   :  { %v3719_v37 = vadd.f32 %v3689_v35, %v3490_v34 }
 0x59c   :  { %v5377_v38 = vmul.f32 -1.442695, %v3719_v37 }
 0x59e   :  { %5860 = vpow2.f32 %v5377_v38 }
 0x59f   :  { %v3702_v21 = vpop.f32.mrf.mxu2 }
 0x5a0   :  { %v3739_v43 = vadd.f32 %v3702_v21, %v3503_v9  ;;  %v3715_v41 = vpop.f32.mrf.mxu3 }
 0x5a1   :  { %v3691_v44 = vpop.f32.mrf.mxu1  ;;  %v3759_v56 = vadd.f32 %v6344_v47, %v3715_v41  ;;  %v3773_v47 = vpop.permute.xlu1 %3772 }
 0x5a2   :  { %v5378_v45 = vmul.f32 -1.442695, %v3739_v43  ;;  %vm3774_vm0 = vcmp.eq.s32.totalorder %v3773_v47, 1 }
 0x5a4   :  { %v5861_v48 = vpop.eup %5860  ;;  %5862 = vpow2.f32 %v5378_v45 }
 0x5a5   :  { %v3723_v46 = vadd.f32 1.0, %v5861_v48 }
 0x5a7   :  { %5864 = vrcp.f32 %v3723_v46  ;;  %v3704_v49 = vpop.f32.mrf.mxu2  ;;  %v3735_v4 = vand.u32 2147483648, %v3723_v46  ;;  %v3733_v53 = vand.u32 2147483647, %v3723_v46  ;;  %vm3729_vm9 = vweird.f32 %v3723_v46 }
 0x5a8   :  { %v3717_v15 = vpop.f32.mrf.mxu3 }
 0x5a9   :  { %v3736_v61 = vor.u32 1.1754944e-38, %v3735_v4  ;;  %vm3734_vm11 = vcmp.eq.f32.partialorder %v3733_v53, 8.507059e+37 }
 0x5aa   :  { %v5863_v50 = vpop.eup %5862 }
 0x5ab   :  { %v3743_v2 = vadd.f32 1.0, %v5863_v50 }
 0x5ad   :  { %v5865_v51 = vpop.eup %5864  ;;  %5866 = vrcp.f32 %v3743_v2  ;;  %v3755_v30 = vand.u32 2147483648, %v3743_v2  ;;  %v3753_v27 = vand.u32 2147483647, %v3743_v2  ;;  %vm3749_vm13 = vweird.f32 %v3743_v2 }
 0x5ae   :  { %v3725_v52 = vmul.f32 %v5865_v51, %v3723_v46  ;;  %vm3730_vm8 = vweird.f32 %v5865_v51 }
 0x5af   :  { %vm3731_vm10 = vmor %vm3729_vm9, %vm3730_vm8  ;;  %v3756_v11 = vor.u32 1.1754944e-38, %v3755_v30  ;;  %vm3754_vm15 = vcmp.eq.f32.partialorder %v3753_v27, 8.507059e+37 }
 0x5b0   :  { %v3726_v18 = vsub.f32 1.0, %v3725_v52 }
 0x5b2   :  { %v3727_v0 = vmul.f32 %v5865_v51, %v3726_v18 }
 0x5b3   :  { %v5867_v54 = vpop.eup %5866 }
 0x5b4   :  { %v3745_v19 = vmul.f32 %v5867_v54, %v3743_v2  ;;  %v3728_v14 = vadd.f32 %v5865_v51, %v3727_v0  ;;  %vm3750_vm12 = vweird.f32 %v5867_v54 }
 0x5b5   :  { %vm3751_vm14 = vmor %vm3749_vm13, %vm3750_vm12 }
 0x5b6   :  { %v3746_v57 = vsub.f32 1.0, %v3745_v19  ;;  %v3732_v63 = vsel %vm3731_vm10, %v5865_v51, %v3728_v14 }
 0x5b7   :  { %v3737_v62 = vsel %vm3734_vm11, %v3736_v61, %v3732_v63 }
 0x5b8   :  { %v3747_v1 = vmul.f32 %v5867_v54, %v3746_v57  ;;  %v3760_v22 = vmul.f32 %v3759_v56, %v3737_v62 }
 0x5ba   :  { %v3748_v6 = vadd.f32 %v5867_v54, %v3747_v1  ;;  %v3761_v10 = vadd.f32 %v3760_v22, %v3516_v55 }
 0x5bc   :  { %v3752_v60 = vsel %vm3751_vm14, %v5867_v54, %v3748_v6  ;;  %5868 = vtanh.f32 %v3761_v10 }
 0x5bd   :  { %v3757_v16 = vsel %vm3754_vm15, %v3756_v11, %v3752_v60 }
 0x5be   :  { %v3763_v12 = vsub.f32 1.0, %v3757_v16  ;;  %v3765_v17 = vmul.f32 %v3757_v16, %v6359_v42 }
 0x5c2   :  { %v5869_v13 = vpop.eup %5868 }
 0x5c3   :  { %v3764_v3 = vmul.f32 %v5869_v13, %v3763_v12 }
 0x5c5   :  { %v3766_v36 = vadd.f32 %v3765_v17, %v3764_v3 }
 0x5c7   :  { %v3776_v20 = vsel %vm3774_vm0, %v3766_v36, 0.0  ;;  %v3775_v23 = vsel %vm3774_vm0, %v3766_v36, %v6359_v42 }
 0x5c8   :  { %3778 = vst [vmem:[#allocation9 + $0x38] sm:$0xff] %v3776_v20 }
 0x5c9   :  { %3796 = dma.vmem_to_hbm [thread:$0]  %s3789_s8, 1024, %s3791_s11, [#allocation5], %s6014_s6, %s6014_s6, %s6015_s16   ;;  %3783 = vst [vmem:[#allocation10] sm:$0xff] %v3775_v23 }
 0x5ca   :  { %3807 = dma.vmem_to_hbm [thread:$0]  %s3803_s13, 128, %s3805_s15, [#allocation11]  }
 0x5cb   :  { %5999 = dma.done.wait [#allocation5], 1024  }
 0x5cc   :  { %6000 = vsyncadd [#allocation5], 4294966272 }
 0x5cd   :  { %6001 = dma.done.wait [#allocation11], 128  }
 0x5ce   :  { %6002 = vsyncadd [#allocation11], 4294967168 }
 0x5cf   :  { %3816 = vsyncpa [#allocation4], 1 }
 0x5d0   :  { %3817 = vsyncpa [#allocation7], 1 }
 0x5d1   :  { %3818 = vsyncpa [#allocation5], 1 }
 0x5d2   :  { %3819 = vsyncpa [#allocation11], 1 }

</bundles_post_ra>
